<compile_context>
chip_gen: v6e
topology: v6e:2x2x1
jax: 0.10.0
libtpu: 0.0.40
codegen_flags: <defaults>
</compile_context>

<pallas_src>
import jax
import jax.numpy as jnp
from jax.experimental import pallas as pl
from jax.experimental.pallas import tpu as pltpu

LANE = 128


def _round_up(x, m):
    return (x + m - 1) // m * m


# ----------------------------------------------------------------------------
# Fused Pallas kernel: embedding + n_layers x (Conv1d -> ReLU -> BN) + Linear
# ----------------------------------------------------------------------------
def _fused_prenet_kernel(tok_ref, emb_ref, wconv_ref, scale_ref, bias_ref,
                         pw_ref, pb_ref, o_ref, hpad_ref):
    """Whole prenet stack for one block of batch elements.

    tok_ref:   (Bb*T, 1)       int32 token ids (flattened rows of the batch block)
    emb_ref:   (Vp, Cp)        bf16 embedding table (vocab + channels lane-padded)
    wconv_ref: (L, K*Cp, Cp)   bf16 im2col conv weights (K-major rows)
    scale_ref: (L, 1, Cp)      f32  BN gamma / sqrt(running_var + eps)
    bias_ref:  (L, 1, Cp)      f32  BN beta - running_mean * scale
    pw_ref:    (Cp, Ap)        bf16 projection weight
    pb_ref:    (1, Ap)         f32  projection bias
    o_ref:     (Bb, T, Ap)     f32  output (lane-dense)
    hpad_ref:  (Bb, T+K-1, Cp) bf16 VMEM scratch for "same" padding
    """
    Bb, Tpad, Cp = hpad_ref.shape
    M = tok_ref.shape[0]
    T = M // Bb
    Vp = emb_ref.shape[0]
    n_layers = wconv_ref.shape[0]
    K = wconv_ref.shape[1] // Cp
    pad = (K - 1) // 2

    # Zero only the halo rows, and only once: the scratch persists across grid
    # steps and the halos are never overwritten (interior rows are fully
    # rewritten each layer).
    if pad > 0:
        @pl.when(pl.program_id(0) == 0)
        def _():
            halo = jnp.zeros((Bb, pad, Cp), hpad_ref.dtype)
            hpad_ref[:, :pad, :] = halo
            hpad_ref[:, pad + T:, :] = halo

    # Embedding lookup as a one-hot MXU matmul (in-kernel gather): (M,Vp)@(Vp,Cp).
    ids = tok_ref[...]                                             # (M, 1) int32
    vocab_iota = jax.lax.broadcasted_iota(jnp.int32, (M, Vp), 1)
    onehot = (vocab_iota == ids).astype(emb_ref.dtype)             # (M, Vp) bf16
    h = jnp.dot(onehot, emb_ref[...],
                preferred_element_type=jnp.float32)                # (M, Cp) f32

    # n_layers x (Conv1d(no bias) -> ReLU -> BatchNorm1d), statically unrolled.
    for layer in range(n_layers):
        # "same" padding: write activations into the pre-zeroed padded scratch.
        hpad_ref[:, pad:pad + T, :] = h.reshape(Bb, T, Cp).astype(hpad_ref.dtype)
        # im2col: K shifted windows concatenated along lanes -> single
        # long-contraction matmul (best for v5e/v6e; K accumulated matmuls is a
        # v7x/MRB alternative that avoids the xcol temporary).
        xcol = jnp.concatenate(
            [hpad_ref[:, k:k + T, :] for k in range(K)], axis=-1)  # (Bb, T, K*Cp)
        acc = jnp.dot(xcol.reshape(M, K * Cp), wconv_ref[layer],
                      preferred_element_type=jnp.float32)          # (M, Cp) f32
        acc = jnp.maximum(acc, 0.0)                                # ReLU (before BN, as in module)
        h = acc * scale_ref[layer] + bias_ref[layer]               # eval-mode BatchNorm1d
        # Dropout: identity in eval mode.

    out = jnp.dot(h.astype(pw_ref.dtype), pw_ref[...],
                  preferred_element_type=jnp.float32) + pb_ref[...]  # (M, Ap)
    o_ref[...] = out.reshape(Bb, T, o_ref.shape[2]).astype(o_ref.dtype)


# ----------------------------------------------------------------------------
# Wrapper: one pallas_call for the entire prenet
# ----------------------------------------------------------------------------
def _choose_batch_block(B, T):
    """Batch elements flattened into one grid step (matmul M-dim = Bb*T rows).

    Target >= ~256 rows per step when the problem allows.  NOTE: when the grid
    has more than one step, (Bb*T) should be a multiple of 8 (sublane tiling);
    with T a multiple of 8 this always holds.
    """
    if B * T <= 2048:
        return B                        # whole batch in a single grid step
    bb = max(1, -(-256 // T))           # ceil(256 / T)
    while bb > 1 and B % bb:            # must tile the batch exactly
        bb -= 1
    return bb


def _vmem_limit_bytes(sizes_bytes):
    need = sum(sizes_bytes)
    # 4x margin for pipeline buffers and compiler temporaries (im2col, one-hot,
    # f32 accumulators); clamp to the v7x physical VMEM budget (64 MiB).
    return int(min(max(4 * need, 8 * (1 << 20)), 64 * (1 << 20)))


def encoder_prenet_forward(tokens, kparams, keep_padded=False):
    """tokens: (B, T) int32 -> (B, T, attention_dim) f32 (or (B, T, Ap) if keep_padded)."""
    B, T = tokens.shape
    emb = kparams["embedding"]                       # (Vp, Cp) bf16
    conv_w = kparams["conv_w"]                       # (L, K*Cp, Cp) bf16
    Vp, Cp = emb.shape
    L, KCp, _ = conv_w.shape
    K = KCp // Cp
    Ap = kparams["proj_w"].shape[1]

    Bb = _choose_batch_block(B, T)
    assert B % Bb == 0
    num_blocks = B // Bb

    tokens2d = tokens.reshape(B * T, 1).astype(jnp.int32)

    vmem_limit = _vmem_limit_bytes([
        2 * Bb * T * 4,                  # token block (double-buffered)
        Vp * Cp * 2,                     # embedding table (bf16, single-buffered)
        L * KCp * Cp * 2,                # conv weights (bf16, single-buffered)
        2 * L * Cp * 4,                  # BN scale + bias (f32)
        Cp * Ap * 2 + Ap * 4,            # projection weight + bias
        2 * Bb * T * Ap * 4,             # output block (double-buffered)
        Bb * (T + K - 1) * Cp * 2,       # padded-activation scratch (bf16)
    ])

    def run(single_buffer_weights):
        if single_buffer_weights and hasattr(pl, "Buffered"):
            # Grid-invariant operands: constant index_map -> double-buffering buys
            # nothing; single-buffer to halve their VMEM footprint.
            def const_spec(shape, imap):
                return pl.BlockSpec(shape, imap, pipeline_mode=pl.Buffered(1))
        else:
            def const_spec(shape, imap):
                return pl.BlockSpec(shape, imap)

        return pl.pallas_call(
            _fused_prenet_kernel,
            out_shape=jax.ShapeDtypeStruct((B, T, Ap), jnp.float32),
            grid=(num_blocks,),
            in_specs=[
                pl.BlockSpec((Bb * T, 1), lambda b: (b, 0)),      # tokens
                const_spec((Vp, Cp), lambda b: (0, 0)),           # embedding table
                const_spec((L, KCp, Cp), lambda b: (0, 0, 0)),    # conv weights
                const_spec((L, 1, Cp), lambda b: (0, 0, 0)),      # BN scale
                const_spec((L, 1, Cp), lambda b: (0, 0, 0)),      # BN bias
                const_spec((Cp, Ap), lambda b: (0, 0)),           # projection weight
                const_spec((1, Ap), lambda b: (0, 0)),            # projection bias
            ],
            out_specs=pl.BlockSpec((Bb, T, Ap), lambda b: (b, 0, 0)),
            scratch_shapes=[pltpu.VMEM((Bb, T + K - 1, Cp), jnp.bfloat16)],
            compiler_params=pltpu.CompilerParams(
                # A small, weight-DMA-bound grid: megacore sharding would only
                # duplicate the weight set per TensorCore (v7x: 64 MiB VMEM).
                dimension_semantics=("arbitrary",),
                vmem_limit_bytes=vmem_limit),
        )(tokens2d, emb, conv_w, kparams["bn_scale"], kparams["bn_bias"],
          kparams["proj_w"], kparams["proj_b"])

    try:
        out_padded = run(True)
    except Exception:
        # Fallback for jax builds without pipeline_mode / Buffered(1) support.
        out_padded = run(False)

    if keep_padded:
        return out_padded                 # lane-dense (B, T, Ap); fuse slice into consumer
    return out_padded[:, :, :kparams["attention_dim"]]


# ----------------------------------------------------------------------------
# Parameters: PyTorch layout (for the reference) + packed/padded kernel layout
# ----------------------------------------------------------------------------
def make_torch_params(key, *, input_dim, embed_dim, conv_channels, attention_dim,
                      kernel_size, n_layers, padding_idx):
    keys = jax.random.split(key, 3 + 4 * n_layers)
    ki = iter(keys)
    eps = 1e-5

    emb = 0.1 * jax.random.normal(next(ki), (input_dim, embed_dim), jnp.float32)
    emb = emb.at[padding_idx].set(0.0)                       # padding_idx row is zero

    layers = []
    for layer in range(n_layers):
        cin = embed_dim if layer == 0 else conv_channels
        w = 0.1 * jax.random.normal(next(ki), (conv_channels, cin, kernel_size),
                                    jnp.float32)             # PyTorch (C_out, C_in, K)
        gamma = 1.0 + 0.05 * jax.random.normal(next(ki), (conv_channels,), jnp.float32)
        beta = 0.05 * jax.random.normal(next(ki), (conv_channels,), jnp.float32)
        run_mean = 0.05 * jax.random.normal(next(ki), (conv_channels,), jnp.float32)
        run_var = jnp.ones((conv_channels,), jnp.float32)
        scale = gamma / jnp.sqrt(run_var + eps)               # folded eval-mode BN
        bias = beta - run_mean * scale
        layers.append({"w": w, "bn_scale": scale, "bn_bias": bias})

    proj_w = 0.1 * jax.random.normal(next(ki), (attention_dim, conv_channels), jnp.float32)
    proj_b = 0.1 * jax.random.normal(next(ki), (attention_dim,), jnp.float32)

    return {"embedding": emb, "layers": layers, "proj_w": proj_w, "proj_b": proj_b,
            "kernel_size": kernel_size, "attention_dim": attention_dim}


def pack_params(tp):
    """Zero-pad channel/vocab dims to the 128-lane width and pack for the fused kernel."""
    emb = tp["embedding"]
    layers = tp["layers"]
    K = tp["kernel_size"]
    assert K % 2 == 1, "same-padding derivation assumes odd kernel_size"
    A = tp["attention_dim"]
    V, E = emb.shape
    Cc = layers[0]["w"].shape[0]
    Cp = _round_up(max(E, Cc), LANE)
    Ap = _round_up(A, LANE)
    Vp = _round_up(V, LANE)

    emb_p = jnp.pad(emb, ((0, Vp - V), (0, Cp - E)))          # padded rows/lanes are zero

    conv_w, bn_scale, bn_bias = [], [], []
    for layer in layers:
        w = layer["w"]                                        # (C_out, C_in, K)
        cout, cin, _ = w.shape
        w = jnp.transpose(w, (2, 1, 0))                       # (K, C_in, C_out)
        w = jnp.pad(w, ((0, 0), (0, Cp - cin), (0, Cp - cout)))
        conv_w.append(w.reshape(K * Cp, Cp))                  # im2col layout (K major)
        bn_scale.append(jnp.pad(layer["bn_scale"], (0, Cp - cout)))
        bn_bias.append(jnp.pad(layer["bn_bias"], (0, Cp - cout)))

    proj_w = jnp.pad(jnp.transpose(tp["proj_w"]), ((0, Cp - Cc), (0, Ap - A)))
    proj_b = jnp.pad(tp["proj_b"], (0, Ap - A))

    # TODO(synk): if production channel counts stay far below 128, pack the im2col
    #             contraction densely (pad K*C_in, not C_in) to cut zero lanes.
    return {
        "embedding": emb_p.astype(jnp.bfloat16),                        # (Vp, Cp)
        "conv_w": jnp.stack(conv_w).astype(jnp.bfloat16),               # (L, K*Cp, Cp)
        "bn_scale": jnp.stack(bn_scale)[:, None, :].astype(jnp.float32),  # (L, 1, Cp)
        "bn_bias": jnp.stack(bn_bias)[:, None, :].astype(jnp.float32),    # (L, 1, Cp)
        "proj_w": proj_w.astype(jnp.bfloat16),                          # (Cp, Ap)
        "proj_b": proj_b[None, :].astype(jnp.float32),                  # (1, Ap)
        "attention_dim": A,
    }


# ----------------------------------------------------------------------------
# Pure-JAX f32 reference (eval mode), PyTorch layouts -- correctness check
# ----------------------------------------------------------------------------
def encoder_prenet_reference(tokens, tp):
    x = jnp.take(tp["embedding"], tokens, axis=0)             # (B, T, E)
    K = tp["kernel_size"]
    pad = (K - 1) // 2
    T = x.shape[1]
    for layer in tp["layers"]:
        w = layer["w"]                                        # (C_out, C_in, K)
        xp = jnp.pad(x, ((0, 0), (pad, pad), (0, 0)))
        acc = jnp.zeros(x.shape[:2] + (w.shape[0],), jnp.float32)
        for k in range(K):
            acc = acc + jnp.einsum("btc,oc->bto", xp[:, k:k + T, :], w[:, :, k])
        acc = jnp.maximum(acc, 0.0)                           # Conv -> ReLU -> BN
        x = acc * layer["bn_scale"] + layer["bn_bias"]
    return jnp.einsum("btc,ac->bta", x, tp["proj_w"]) + tp["proj_b"]


if __name__ == "__main__":
    # Small config consistent with EncoderPrenetConfig.
    INPUT_DIM = 40        # vocab (number of phonemes)
    EMBED_DIM = 32
    ATTENTION_DIM = 32
    CONV_CHANNELS = 32
    KERNEL_SIZE = 5
    N_LAYERS = 3
    PADDING_IDX = 0
    BATCH, SEQ = 2, 16

    key = jax.random.PRNGKey(0)
    pkey, tkey = jax.random.split(key)

    torch_params = make_torch_params(
        pkey,
        input_dim=INPUT_DIM, embed_dim=EMBED_DIM, conv_channels=CONV_CHANNELS,
        attention_dim=ATTENTION_DIM, kernel_size=KERNEL_SIZE,
        n_layers=N_LAYERS, padding_idx=PADDING_IDX)
    kparams = pack_params(torch_params)

    tokens = jax.random.randint(tkey, (BATCH, SEQ), 0, INPUT_DIM, dtype=jnp.int32)

    out = encoder_prenet_forward(tokens, kparams)
    out = jax.block_until_ready(out)

    assert out.shape == (BATCH, SEQ, ATTENTION_DIM), out.shape
    assert out.dtype == jnp.float32

    ref = encoder_prenet_reference(tokens, torch_params)
    max_err = float(jnp.max(jnp.abs(out - ref)))
    assert max_err < 5e-2, f"max |kernel - reference| = {max_err}"

    print("KERNEL_OK")
</pallas_src>

<mosaic_0001>
module attributes {stable_mosaic.version = 11 : i64} {
  func.func @_fused_prenet_kernel(%arg0: i32, %arg1: memref<32x1xi32, #tpu.memory_space<vmem>>, %arg2: memref<128x128xbf16, #tpu.memory_space<vmem>>, %arg3: memref<3x640x128xbf16, #tpu.memory_space<vmem>>, %arg4: memref<3x1x128xf32, #tpu.memory_space<vmem>>, %arg5: memref<3x1x128xf32, #tpu.memory_space<vmem>>, %arg6: memref<128x128xbf16, #tpu.memory_space<vmem>>, %arg7: memref<1x128xf32, #tpu.memory_space<vmem>>, %arg8: memref<2x16x128xf32, #tpu.memory_space<vmem>>, %arg9: memref<2x20x128xbf16, #tpu.memory_space<vmem>>) attributes {dimension_semantics = [#tpu.dimension_semantics<arbitrary>], iteration_bounds = array<i64: 1>, scalar_prefetch = 0 : i64, scratch_operands = 1 : i64, tpu.core_type = #tpu.core_type<tc>, window_params = [{transform_indices = @transform_0, window_bounds = array<i64: 32, 1>}, {pipeline_mode = #tpu.pipeline_mode<synchronous>, transform_indices = @transform_1, window_bounds = array<i64: 128, 128>}, {pipeline_mode = #tpu.pipeline_mode<synchronous>, transform_indices = @transform_2, window_bounds = array<i64: 3, 640, 128>}, {pipeline_mode = #tpu.pipeline_mode<synchronous>, transform_indices = @transform_3, window_bounds = array<i64: 3, 1, 128>}, {pipeline_mode = #tpu.pipeline_mode<synchronous>, transform_indices = @transform_4, window_bounds = array<i64: 3, 1, 128>}, {pipeline_mode = #tpu.pipeline_mode<synchronous>, transform_indices = @transform_5, window_bounds = array<i64: 128, 128>}, {pipeline_mode = #tpu.pipeline_mode<synchronous>, transform_indices = @transform_6, window_bounds = array<i64: 1, 128>}, {transform_indices = @transform_7, window_bounds = array<i64: 2, 16, 128>}]} {
    %c0_i32 = arith.constant 0 : i32
    %0 = arith.cmpi eq, %arg0, %c0_i32 : i32
    %1 = arith.extui %0 : i1 to i32
    %c0_i32_0 = arith.constant 0 : i32
    %2 = arith.cmpi ne, %1, %c0_i32_0 : i32
    scf.if %2 {
      %cst_95 = arith.constant 0.000000e+00 : bf16
      %89 = vector.broadcast %cst_95 : bf16 to vector<2x2x128xbf16>
      %c0_96 = arith.constant 0 : index
      %c0_97 = arith.constant 0 : index
      %c0_98 = arith.constant 0 : index
      %90 = vector.load %arg9[%c0_96, %c0_97, %c0_98] : memref<2x20x128xbf16, #tpu.memory_space<vmem>>, vector<2x2x128xbf16>
      tpu.vector_store %arg9[%c0_96, %c0_97, %c0_98], %89 {strides = array<i32>} : memref<2x20x128xbf16, #tpu.memory_space<vmem>>, vector<2x2x128xbf16>,
      %c0_99 = arith.constant 0 : index
      %c18 = arith.constant 18 : index
      %c0_100 = arith.constant 0 : index
      %91 = vector.load %arg9[%c0_99, %c18, %c0_100] : memref<2x20x128xbf16, #tpu.memory_space<vmem>>, vector<2x2x128xbf16>
      tpu.vector_store %arg9[%c0_99, %c18, %c0_100], %89 {strides = array<i32>} : memref<2x20x128xbf16, #tpu.memory_space<vmem>>, vector<2x2x128xbf16>,
    } else {
    }
    %c0 = arith.constant 0 : index
    %c0_1 = arith.constant 0 : index
    %3 = vector.load %arg1[%c0, %c0_1] : memref<32x1xi32, #tpu.memory_space<vmem>>, vector<32x1xi32>
    %4 = tpu.iota {dimensions = array<i32: 1>} : vector<32x128xi32>
    %5 = vector.broadcast %3 : vector<32x1xi32> to vector<32x128xi32>
    %6 = arith.cmpi eq, %4, %5 : vector<32x128xi32>
    %7 = arith.extui %6 : vector<32x128xi1> to vector<32x128xi32>
    %8 = arith.sitofp %7 : vector<32x128xi32> to vector<32x128xf32>
    %9 = arith.truncf %8 : vector<32x128xf32> to vector<32x128xbf16>
    %c0_2 = arith.constant 0 : index
    %c0_3 = arith.constant 0 : index
    %10 = vector.load %arg2[%c0_2, %c0_3] : memref<128x128xbf16, #tpu.memory_space<vmem>>, vector<128x128xbf16>
    %cst = arith.constant dense<0.000000e+00> : vector<32x128xf32>
    %11 = tpu.matmul %9, %10, %cst {dimension_numbers = #tpu.dot_dimension_numbers<[1], [0], [0], [1], [0, 0, 1, 1], [], []>} : vector<32x128xbf16>, vector<128x128xbf16>, vector<32x128xf32> -> vector<32x128xf32>
    %12 = vector.shape_cast %11 : vector<32x128xf32> to vector<2x16x128xf32>
    %13 = arith.truncf %12 : vector<2x16x128xf32> to vector<2x16x128xbf16>
    %c0_4 = arith.constant 0 : index
    %c2 = arith.constant 2 : index
    %c0_5 = arith.constant 0 : index
    %14 = vector.load %arg9[%c0_4, %c2, %c0_5] : memref<2x20x128xbf16, #tpu.memory_space<vmem>>, vector<2x16x128xbf16>
    tpu.vector_store %arg9[%c0_4, %c2, %c0_5], %13 {strides = array<i32>} : memref<2x20x128xbf16, #tpu.memory_space<vmem>>, vector<2x16x128xbf16>,
    %c0_6 = arith.constant 0 : index
    %c0_7 = arith.constant 0 : index
    %c0_8 = arith.constant 0 : index
    %15 = vector.load %arg9[%c0_6, %c0_7, %c0_8] : memref<2x20x128xbf16, #tpu.memory_space<vmem>>, vector<2x16x128xbf16>
    %c0_9 = arith.constant 0 : index
    %c1 = arith.constant 1 : index
    %c0_10 = arith.constant 0 : index
    %16 = vector.load %arg9[%c0_9, %c1, %c0_10] : memref<2x20x128xbf16, #tpu.memory_space<vmem>>, vector<2x16x128xbf16>
    %c0_11 = arith.constant 0 : index
    %c2_12 = arith.constant 2 : index
    %c0_13 = arith.constant 0 : index
    %17 = vector.load %arg9[%c0_11, %c2_12, %c0_13] : memref<2x20x128xbf16, #tpu.memory_space<vmem>>, vector<2x16x128xbf16>
    %c0_14 = arith.constant 0 : index
    %c3 = arith.constant 3 : index
    %c0_15 = arith.constant 0 : index
    %18 = vector.load %arg9[%c0_14, %c3, %c0_15] : memref<2x20x128xbf16, #tpu.memory_space<vmem>>, vector<2x16x128xbf16>
    %c0_16 = arith.constant 0 : index
    %c4 = arith.constant 4 : index
    %c0_17 = arith.constant 0 : index
    %19 = vector.load %arg9[%c0_16, %c4, %c0_17] : memref<2x20x128xbf16, #tpu.memory_space<vmem>>, vector<2x16x128xbf16>
    %20 = tpu.concatenate %15, %16, %17, %18, %19 in 2 : vector<2x16x128xbf16>, vector<2x16x128xbf16>, vector<2x16x128xbf16>, vector<2x16x128xbf16>, vector<2x16x128xbf16> -> vector<2x16x640xbf16>
    %21 = vector.shape_cast %20 : vector<2x16x640xbf16> to vector<32x640xbf16>
    %c0_18 = arith.constant 0 : index
    %c0_19 = arith.constant 0 : index
    %c0_20 = arith.constant 0 : index
    %22 = vector.load %arg3[%c0_18, %c0_19, %c0_20] : memref<3x640x128xbf16, #tpu.memory_space<vmem>>, vector<1x640x128xbf16>
    %23 = vector.shape_cast %22 : vector<1x640x128xbf16> to vector<640x128xbf16>
    %cst_21 = arith.constant dense<0.000000e+00> : vector<32x128xf32>
    %24 = tpu.matmul %21, %23, %cst_21 {dimension_numbers = #tpu.dot_dimension_numbers<[1], [0], [0], [1], [0, 0, 1, 1], [], []>} : vector<32x640xbf16>, vector<640x128xbf16>, vector<32x128xf32> -> vector<32x128xf32>
    %cst_22 = arith.constant 0.000000e+00 : f32
    %25 = vector.broadcast %cst_22 : f32 to vector<32x128xf32>
    %26 = arith.maximumf %24, %25 : vector<32x128xf32>
    %c0_23 = arith.constant 0 : index
    %c0_24 = arith.constant 0 : index
    %c0_25 = arith.constant 0 : index
    %27 = vector.load %arg4[%c0_23, %c0_24, %c0_25] : memref<3x1x128xf32, #tpu.memory_space<vmem>>, vector<1x1x128xf32>
    %28 = vector.shape_cast %27 : vector<1x1x128xf32> to vector<1x128xf32>
    %29 = vector.broadcast %28 : vector<1x128xf32> to vector<32x128xf32>
    %30 = arith.mulf %26, %29 : vector<32x128xf32>
    %c0_26 = arith.constant 0 : index
    %c0_27 = arith.constant 0 : index
    %c0_28 = arith.constant 0 : index
    %31 = vector.load %arg5[%c0_26, %c0_27, %c0_28] : memref<3x1x128xf32, #tpu.memory_space<vmem>>, vector<1x1x128xf32>
    %32 = vector.shape_cast %31 : vector<1x1x128xf32> to vector<1x128xf32>
    %33 = vector.broadcast %32 : vector<1x128xf32> to vector<32x128xf32>
    %34 = arith.addf %30, %33 : vector<32x128xf32>
    %35 = vector.shape_cast %34 : vector<32x128xf32> to vector<2x16x128xf32>
    %36 = arith.truncf %35 : vector<2x16x128xf32> to vector<2x16x128xbf16>
    %c0_29 = arith.constant 0 : index
    %c2_30 = arith.constant 2 : index
    %c0_31 = arith.constant 0 : index
    %37 = vector.load %arg9[%c0_29, %c2_30, %c0_31] : memref<2x20x128xbf16, #tpu.memory_space<vmem>>, vector<2x16x128xbf16>
    tpu.vector_store %arg9[%c0_29, %c2_30, %c0_31], %36 {strides = array<i32>} : memref<2x20x128xbf16, #tpu.memory_space<vmem>>, vector<2x16x128xbf16>,
    %c0_32 = arith.constant 0 : index
    %c0_33 = arith.constant 0 : index
    %c0_34 = arith.constant 0 : index
    %38 = vector.load %arg9[%c0_32, %c0_33, %c0_34] : memref<2x20x128xbf16, #tpu.memory_space<vmem>>, vector<2x16x128xbf16>
    %c0_35 = arith.constant 0 : index
    %c1_36 = arith.constant 1 : index
    %c0_37 = arith.constant 0 : index
    %39 = vector.load %arg9[%c0_35, %c1_36, %c0_37] : memref<2x20x128xbf16, #tpu.memory_space<vmem>>, vector<2x16x128xbf16>
    %c0_38 = arith.constant 0 : index
    %c2_39 = arith.constant 2 : index
    %c0_40 = arith.constant 0 : index
    %40 = vector.load %arg9[%c0_38, %c2_39, %c0_40] : memref<2x20x128xbf16, #tpu.memory_space<vmem>>, vector<2x16x128xbf16>
    %c0_41 = arith.constant 0 : index
    %c3_42 = arith.constant 3 : index
    %c0_43 = arith.constant 0 : index
    %41 = vector.load %arg9[%c0_41, %c3_42, %c0_43] : memref<2x20x128xbf16, #tpu.memory_space<vmem>>, vector<2x16x128xbf16>
    %c0_44 = arith.constant 0 : index
    %c4_45 = arith.constant 4 : index
    %c0_46 = arith.constant 0 : index
    %42 = vector.load %arg9[%c0_44, %c4_45, %c0_46] : memref<2x20x128xbf16, #tpu.memory_space<vmem>>, vector<2x16x128xbf16>
    %43 = tpu.concatenate %38, %39, %40, %41, %42 in 2 : vector<2x16x128xbf16>, vector<2x16x128xbf16>, vector<2x16x128xbf16>, vector<2x16x128xbf16>, vector<2x16x128xbf16> -> vector<2x16x640xbf16>
    %44 = vector.shape_cast %43 : vector<2x16x640xbf16> to vector<32x640xbf16>
    %c1_47 = arith.constant 1 : index
    %c0_48 = arith.constant 0 : index
    %c0_49 = arith.constant 0 : index
    %45 = vector.load %arg3[%c1_47, %c0_48, %c0_49] : memref<3x640x128xbf16, #tpu.memory_space<vmem>>, vector<1x640x128xbf16>
    %46 = vector.shape_cast %45 : vector<1x640x128xbf16> to vector<640x128xbf16>
    %cst_50 = arith.constant dense<0.000000e+00> : vector<32x128xf32>
    %47 = tpu.matmul %44, %46, %cst_50 {dimension_numbers = #tpu.dot_dimension_numbers<[1], [0], [0], [1], [0, 0, 1, 1], [], []>} : vector<32x640xbf16>, vector<640x128xbf16>, vector<32x128xf32> -> vector<32x128xf32>
    %cst_51 = arith.constant 0.000000e+00 : f32
    %48 = vector.broadcast %cst_51 : f32 to vector<32x128xf32>
    %49 = arith.maximumf %47, %48 : vector<32x128xf32>
    %c1_52 = arith.constant 1 : index
    %c0_53 = arith.constant 0 : index
    %c0_54 = arith.constant 0 : index
    %50 = vector.load %arg4[%c1_52, %c0_53, %c0_54] : memref<3x1x128xf32, #tpu.memory_space<vmem>>, vector<1x1x128xf32>
    %51 = vector.shape_cast %50 : vector<1x1x128xf32> to vector<1x128xf32>
    %52 = vector.broadcast %51 : vector<1x128xf32> to vector<32x128xf32>
    %53 = arith.mulf %49, %52 : vector<32x128xf32>
    %c1_55 = arith.constant 1 : index
    %c0_56 = arith.constant 0 : index
    %c0_57 = arith.constant 0 : index
    %54 = vector.load %arg5[%c1_55, %c0_56, %c0_57] : memref<3x1x128xf32, #tpu.memory_space<vmem>>, vector<1x1x128xf32>
    %55 = vector.shape_cast %54 : vector<1x1x128xf32> to vector<1x128xf32>
    %56 = vector.broadcast %55 : vector<1x128xf32> to vector<32x128xf32>
    %57 = arith.addf %53, %56 : vector<32x128xf32>
    %58 = vector.shape_cast %57 : vector<32x128xf32> to vector<2x16x128xf32>
    %59 = arith.truncf %58 : vector<2x16x128xf32> to vector<2x16x128xbf16>
    %c0_58 = arith.constant 0 : index
    %c2_59 = arith.constant 2 : index
    %c0_60 = arith.constant 0 : index
    %60 = vector.load %arg9[%c0_58, %c2_59, %c0_60] : memref<2x20x128xbf16, #tpu.memory_space<vmem>>, vector<2x16x128xbf16>
    tpu.vector_store %arg9[%c0_58, %c2_59, %c0_60], %59 {strides = array<i32>} : memref<2x20x128xbf16, #tpu.memory_space<vmem>>, vector<2x16x128xbf16>,
    %c0_61 = arith.constant 0 : index
    %c0_62 = arith.constant 0 : index
    %c0_63 = arith.constant 0 : index
    %61 = vector.load %arg9[%c0_61, %c0_62, %c0_63] : memref<2x20x128xbf16, #tpu.memory_space<vmem>>, vector<2x16x128xbf16>
    %c0_64 = arith.constant 0 : index
    %c1_65 = arith.constant 1 : index
    %c0_66 = arith.constant 0 : index
    %62 = vector.load %arg9[%c0_64, %c1_65, %c0_66] : memref<2x20x128xbf16, #tpu.memory_space<vmem>>, vector<2x16x128xbf16>
    %c0_67 = arith.constant 0 : index
    %c2_68 = arith.constant 2 : index
    %c0_69 = arith.constant 0 : index
    %63 = vector.load %arg9[%c0_67, %c2_68, %c0_69] : memref<2x20x128xbf16, #tpu.memory_space<vmem>>, vector<2x16x128xbf16>
    %c0_70 = arith.constant 0 : index
    %c3_71 = arith.constant 3 : index
    %c0_72 = arith.constant 0 : index
    %64 = vector.load %arg9[%c0_70, %c3_71, %c0_72] : memref<2x20x128xbf16, #tpu.memory_space<vmem>>, vector<2x16x128xbf16>
    %c0_73 = arith.constant 0 : index
    %c4_74 = arith.constant 4 : index
    %c0_75 = arith.constant 0 : index
    %65 = vector.load %arg9[%c0_73, %c4_74, %c0_75] : memref<2x20x128xbf16, #tpu.memory_space<vmem>>, vector<2x16x128xbf16>
    %66 = tpu.concatenate %61, %62, %63, %64, %65 in 2 : vector<2x16x128xbf16>, vector<2x16x128xbf16>, vector<2x16x128xbf16>, vector<2x16x128xbf16>, vector<2x16x128xbf16> -> vector<2x16x640xbf16>
    %67 = vector.shape_cast %66 : vector<2x16x640xbf16> to vector<32x640xbf16>
    %c2_76 = arith.constant 2 : index
    %c0_77 = arith.constant 0 : index
    %c0_78 = arith.constant 0 : index
    %68 = vector.load %arg3[%c2_76, %c0_77, %c0_78] : memref<3x640x128xbf16, #tpu.memory_space<vmem>>, vector<1x640x128xbf16>
    %69 = vector.shape_cast %68 : vector<1x640x128xbf16> to vector<640x128xbf16>
    %cst_79 = arith.constant dense<0.000000e+00> : vector<32x128xf32>
    %70 = tpu.matmul %67, %69, %cst_79 {dimension_numbers = #tpu.dot_dimension_numbers<[1], [0], [0], [1], [0, 0, 1, 1], [], []>} : vector<32x640xbf16>, vector<640x128xbf16>, vector<32x128xf32> -> vector<32x128xf32>
    %cst_80 = arith.constant 0.000000e+00 : f32
    %71 = vector.broadcast %cst_80 : f32 to vector<32x128xf32>
    %72 = arith.maximumf %70, %71 : vector<32x128xf32>
    %c2_81 = arith.constant 2 : index
    %c0_82 = arith.constant 0 : index
    %c0_83 = arith.constant 0 : index
    %73 = vector.load %arg4[%c2_81, %c0_82, %c0_83] : memref<3x1x128xf32, #tpu.memory_space<vmem>>, vector<1x1x128xf32>
    %74 = vector.shape_cast %73 : vector<1x1x128xf32> to vector<1x128xf32>
    %75 = vector.broadcast %74 : vector<1x128xf32> to vector<32x128xf32>
    %76 = arith.mulf %72, %75 : vector<32x128xf32>
    %c2_84 = arith.constant 2 : index
    %c0_85 = arith.constant 0 : index
    %c0_86 = arith.constant 0 : index
    %77 = vector.load %arg5[%c2_84, %c0_85, %c0_86] : memref<3x1x128xf32, #tpu.memory_space<vmem>>, vector<1x1x128xf32>
    %78 = vector.shape_cast %77 : vector<1x1x128xf32> to vector<1x128xf32>
    %79 = vector.broadcast %78 : vector<1x128xf32> to vector<32x128xf32>
    %80 = arith.addf %76, %79 : vector<32x128xf32>
    %81 = arith.truncf %80 : vector<32x128xf32> to vector<32x128xbf16>
    %c0_87 = arith.constant 0 : index
    %c0_88 = arith.constant 0 : index
    %82 = vector.load %arg6[%c0_87, %c0_88] : memref<128x128xbf16, #tpu.memory_space<vmem>>, vector<128x128xbf16>
    %cst_89 = arith.constant dense<0.000000e+00> : vector<32x128xf32>
    %83 = tpu.matmul %81, %82, %cst_89 {dimension_numbers = #tpu.dot_dimension_numbers<[1], [0], [0], [1], [0, 0, 1, 1], [], []>} : vector<32x128xbf16>, vector<128x128xbf16>, vector<32x128xf32> -> vector<32x128xf32>
    %c0_90 = arith.constant 0 : index
    %c0_91 = arith.constant 0 : index
    %84 = vector.load %arg7[%c0_90, %c0_91] : memref<1x128xf32, #tpu.memory_space<vmem>>, vector<1x128xf32>
    %85 = vector.broadcast %84 : vector<1x128xf32> to vector<32x128xf32>
    %86 = arith.addf %83, %85 : vector<32x128xf32>
    %87 = vector.shape_cast %86 : vector<32x128xf32> to vector<2x16x128xf32>
    %c0_92 = arith.constant 0 : index
    %c0_93 = arith.constant 0 : index
    %c0_94 = arith.constant 0 : index
    %88 = vector.load %arg8[%c0_92, %c0_93, %c0_94] : memref<2x16x128xf32, #tpu.memory_space<vmem>>, vector<2x16x128xf32>
    tpu.vector_store %arg8[%c0_92, %c0_93, %c0_94], %87 {strides = array<i32>} : memref<2x16x128xf32, #tpu.memory_space<vmem>>, vector<2x16x128xf32>,
    return
  }
  func.func @transform_0(%arg0: i32) -> (i32, i32) {
    %c0_i32 = arith.constant 0 : i32
    %c0_i32_0 = arith.constant 0 : i32
    return %arg0, %c0_i32 : i32, i32
  }
  func.func @transform_1(%arg0: i32) -> (i32, i32) {
    %c0_i32 = arith.constant 0 : i32
    %c0_i32_0 = arith.constant 0 : i32
    %c0_i32_1 = arith.constant 0 : i32
    return %c0_i32, %c0_i32_0 : i32, i32
  }
  func.func @transform_2(%arg0: i32) -> (i32, i32, i32) {
    %c0_i32 = arith.constant 0 : i32
    %c0_i32_0 = arith.constant 0 : i32
    %c0_i32_1 = arith.constant 0 : i32
    %c0_i32_2 = arith.constant 0 : i32
    return %c0_i32, %c0_i32_0, %c0_i32_1 : i32, i32, i32
  }
  func.func @transform_3(%arg0: i32) -> (i32, i32, i32) {
    %c0_i32 = arith.constant 0 : i32
    %c0_i32_0 = arith.constant 0 : i32
    %c0_i32_1 = arith.constant 0 : i32
    %c0_i32_2 = arith.constant 0 : i32
    return %c0_i32, %c0_i32_0, %c0_i32_1 : i32, i32, i32
  }
  func.func @transform_4(%arg0: i32) -> (i32, i32, i32) {
    %c0_i32 = arith.constant 0 : i32
    %c0_i32_0 = arith.constant 0 : i32
    %c0_i32_1 = arith.constant 0 : i32
    %c0_i32_2 = arith.constant 0 : i32
    return %c0_i32, %c0_i32_0, %c0_i32_1 : i32, i32, i32
  }
  func.func @transform_5(%arg0: i32) -> (i32, i32) {
    %c0_i32 = arith.constant 0 : i32
    %c0_i32_0 = arith.constant 0 : i32
    %c0_i32_1 = arith.constant 0 : i32
    return %c0_i32, %c0_i32_0 : i32, i32
  }
  func.func @transform_6(%arg0: i32) -> (i32, i32) {
    %c0_i32 = arith.constant 0 : i32
    %c0_i32_0 = arith.constant 0 : i32
    %c0_i32_1 = arith.constant 0 : i32
    return %c0_i32, %c0_i32_0 : i32, i32
  }
  func.func @transform_7(%arg0: i32) -> (i32, i32, i32) {
    %c0_i32 = arith.constant 0 : i32
    %c0_i32_0 = arith.constant 0 : i32
    %c0_i32_1 = arith.constant 0 : i32
    return %arg0, %c0_i32, %c0_i32_0 : i32, i32, i32
  }
}

module attributes {stable_mosaic.version = 11 : i64} {
  func.func @_fused_prenet_kernel(%arg0: i32, %arg1: memref<32x1xi32, #tpu.memory_space<vmem>>, %arg2: memref<128x128xbf16, #tpu.memory_space<vmem>>, %arg3: memref<3x640x128xbf16, #tpu.memory_space<vmem>>, %arg4: memref<3x1x128xf32, #tpu.memory_space<vmem>>, %arg5: memref<3x1x128xf32, #tpu.memory_space<vmem>>, %arg6: memref<128x128xbf16, #tpu.memory_space<vmem>>, %arg7: memref<1x128xf32, #tpu.memory_space<vmem>>, %arg8: memref<2x16x128xf32, #tpu.memory_space<vmem>>, %arg9: memref<2x20x128xbf16, #tpu.memory_space<vmem>>) attributes {dimension_semantics = [#tpu.dimension_semantics<arbitrary>], iteration_bounds = array<i64: 1>, scalar_prefetch = 0 : i64, scratch_operands = 1 : i64, tpu.core_type = #tpu.core_type<tc>, window_params = [{transform_indices = @transform_0, window_bounds = array<i64: 32, 1>}, {pipeline_mode = #tpu.pipeline_mode<synchronous>, transform_indices = @transform_1, window_bounds = array<i64: 128, 128>}, {pipeline_mode = #tpu.pipeline_mode<synchronous>, transform_indices = @transform_2, window_bounds = array<i64: 3, 640, 128>}, {pipeline_mode = #tpu.pipeline_mode<synchronous>, transform_indices = @transform_3, window_bounds = array<i64: 3, 1, 128>}, {pipeline_mode = #tpu.pipeline_mode<synchronous>, transform_indices = @transform_4, window_bounds = array<i64: 3, 1, 128>}, {pipeline_mode = #tpu.pipeline_mode<synchronous>, transform_indices = @transform_5, window_bounds = array<i64: 128, 128>}, {pipeline_mode = #tpu.pipeline_mode<synchronous>, transform_indices = @transform_6, window_bounds = array<i64: 1, 128>}, {transform_indices = @transform_7, window_bounds = array<i64: 2, 16, 128>}]} {
    %c0_i32 = arith.constant 0 : i32
    %0 = arith.cmpi eq, %arg0, %c0_i32 : i32
    %1 = arith.extui %0 : i1 to i32
    %c0_i32_0 = arith.constant 0 : i32
    %2 = arith.cmpi ne, %1, %c0_i32_0 : i32
    scf.if %2 {
      %cst_95 = arith.constant 0.000000e+00 : bf16
      %89 = vector.broadcast %cst_95 : bf16 to vector<2x2x128xbf16>
      %c0_96 = arith.constant 0 : index
      %c0_97 = arith.constant 0 : index
      %c0_98 = arith.constant 0 : index
      %90 = vector.load %arg9[%c0_96, %c0_97, %c0_98] : memref<2x20x128xbf16, #tpu.memory_space<vmem>>, vector<2x2x128xbf16>
      tpu.vector_store %arg9[%c0_96, %c0_97, %c0_98], %89 {strides = array<i32>} : memref<2x20x128xbf16, #tpu.memory_space<vmem>>, vector<2x2x128xbf16>,
      %c0_99 = arith.constant 0 : index
      %c18 = arith.constant 18 : index
      %c0_100 = arith.constant 0 : index
      %91 = vector.load %arg9[%c0_99, %c18, %c0_100] : memref<2x20x128xbf16, #tpu.memory_space<vmem>>, vector<2x2x128xbf16>
      tpu.vector_store %arg9[%c0_99, %c18, %c0_100], %89 {strides = array<i32>} : memref<2x20x128xbf16, #tpu.memory_space<vmem>>, vector<2x2x128xbf16>,
    } else {
    }
    %c0 = arith.constant 0 : index
    %c0_1 = arith.constant 0 : index
    %3 = vector.load %arg1[%c0, %c0_1] : memref<32x1xi32, #tpu.memory_space<vmem>>, vector<32x1xi32>
    %4 = tpu.iota {dimensions = array<i32: 1>} : vector<32x128xi32>
    %5 = vector.broadcast %3 : vector<32x1xi32> to vector<32x128xi32>
    %6 = arith.cmpi eq, %4, %5 : vector<32x128xi32>
    %7 = arith.extui %6 : vector<32x128xi1> to vector<32x128xi32>
    %8 = arith.sitofp %7 : vector<32x128xi32> to vector<32x128xf32>
    %9 = arith.truncf %8 : vector<32x128xf32> to vector<32x128xbf16>
    %c0_2 = arith.constant 0 : index
    %c0_3 = arith.constant 0 : index
    %10 = vector.load %arg2[%c0_2, %c0_3] : memref<128x128xbf16, #tpu.memory_space<vmem>>, vector<128x128xbf16>
    %cst = arith.constant dense<0.000000e+00> : vector<32x128xf32>
    %11 = tpu.matmul %9, %10, %cst {dimension_numbers = #tpu.dot_dimension_numbers<[1], [0], [0], [1], [0, 0, 1, 1], [], []>} : vector<32x128xbf16>, vector<128x128xbf16>, vector<32x128xf32> -> vector<32x128xf32>
    %12 = vector.shape_cast %11 : vector<32x128xf32> to vector<2x16x128xf32>
    %13 = arith.truncf %12 : vector<2x16x128xf32> to vector<2x16x128xbf16>
    %c0_4 = arith.constant 0 : index
    %c2 = arith.constant 2 : index
    %c0_5 = arith.constant 0 : index
    %14 = vector.load %arg9[%c0_4, %c2, %c0_5] : memref<2x20x128xbf16, #tpu.memory_space<vmem>>, vector<2x16x128xbf16>
    tpu.vector_store %arg9[%c0_4, %c2, %c0_5], %13 {strides = array<i32>} : memref<2x20x128xbf16, #tpu.memory_space<vmem>>, vector<2x16x128xbf16>,
    %c0_6 = arith.constant 0 : index
    %c0_7 = arith.constant 0 : index
    %c0_8 = arith.constant 0 : index
    %15 = vector.load %arg9[%c0_6, %c0_7, %c0_8] : memref<2x20x128xbf16, #tpu.memory_space<vmem>>, vector<2x16x128xbf16>
    %c0_9 = arith.constant 0 : index
    %c1 = arith.constant 1 : index
    %c0_10 = arith.constant 0 : index
    %16 = vector.load %arg9[%c0_9, %c1, %c0_10] : memref<2x20x128xbf16, #tpu.memory_space<vmem>>, vector<2x16x128xbf16>
    %c0_11 = arith.constant 0 : index
    %c2_12 = arith.constant 2 : index
    %c0_13 = arith.constant 0 : index
    %17 = vector.load %arg9[%c0_11, %c2_12, %c0_13] : memref<2x20x128xbf16, #tpu.memory_space<vmem>>, vector<2x16x128xbf16>
    %c0_14 = arith.constant 0 : index
    %c3 = arith.constant 3 : index
    %c0_15 = arith.constant 0 : index
    %18 = vector.load %arg9[%c0_14, %c3, %c0_15] : memref<2x20x128xbf16, #tpu.memory_space<vmem>>, vector<2x16x128xbf16>
    %c0_16 = arith.constant 0 : index
    %c4 = arith.constant 4 : index
    %c0_17 = arith.constant 0 : index
    %19 = vector.load %arg9[%c0_16, %c4, %c0_17] : memref<2x20x128xbf16, #tpu.memory_space<vmem>>, vector<2x16x128xbf16>
    %20 = tpu.concatenate %15, %16, %17, %18, %19 in 2 : vector<2x16x128xbf16>, vector<2x16x128xbf16>, vector<2x16x128xbf16>, vector<2x16x128xbf16>, vector<2x16x128xbf16> -> vector<2x16x640xbf16>
    %21 = vector.shape_cast %20 : vector<2x16x640xbf16> to vector<32x640xbf16>
    %c0_18 = arith.constant 0 : index
    %c0_19 = arith.constant 0 : index
    %c0_20 = arith.constant 0 : index
    %22 = vector.load %arg3[%c0_18, %c0_19, %c0_20] : memref<3x640x128xbf16, #tpu.memory_space<vmem>>, vector<1x640x128xbf16>
    %23 = vector.shape_cast %22 : vector<1x640x128xbf16> to vector<640x128xbf16>
    %cst_21 = arith.constant dense<0.000000e+00> : vector<32x128xf32>
    %24 = tpu.matmul %21, %23, %cst_21 {dimension_numbers = #tpu.dot_dimension_numbers<[1], [0], [0], [1], [0, 0, 1, 1], [], []>} : vector<32x640xbf16>, vector<640x128xbf16>, vector<32x128xf32> -> vector<32x128xf32>
    %cst_22 = arith.constant 0.000000e+00 : f32
    %25 = vector.broadcast %cst_22 : f32 to vector<32x128xf32>
    %26 = arith.maximumf %24, %25 : vector<32x128xf32>
    %c0_23 = arith.constant 0 : index
    %c0_24 = arith.constant 0 : index
    %c0_25 = arith.constant 0 : index
    %27 = vector.load %arg4[%c0_23, %c0_24, %c0_25] : memref<3x1x128xf32, #tpu.memory_space<vmem>>, vector<1x1x128xf32>
    %28 = vector.shape_cast %27 : vector<1x1x128xf32> to vector<1x128xf32>
    %29 = vector.broadcast %28 : vector<1x128xf32> to vector<32x128xf32>
    %30 = arith.mulf %26, %29 : vector<32x128xf32>
    %c0_26 = arith.constant 0 : index
    %c0_27 = arith.constant 0 : index
    %c0_28 = arith.constant 0 : index
    %31 = vector.load %arg5[%c0_26, %c0_27, %c0_28] : memref<3x1x128xf32, #tpu.memory_space<vmem>>, vector<1x1x128xf32>
    %32 = vector.shape_cast %31 : vector<1x1x128xf32> to vector<1x128xf32>
    %33 = vector.broadcast %32 : vector<1x128xf32> to vector<32x128xf32>
    %34 = arith.addf %30, %33 : vector<32x128xf32>
    %35 = vector.shape_cast %34 : vector<32x128xf32> to vector<2x16x128xf32>
    %36 = arith.truncf %35 : vector<2x16x128xf32> to vector<2x16x128xbf16>
    %c0_29 = arith.constant 0 : index
    %c2_30 = arith.constant 2 : index
    %c0_31 = arith.constant 0 : index
    %37 = vector.load %arg9[%c0_29, %c2_30, %c0_31] : memref<2x20x128xbf16, #tpu.memory_space<vmem>>, vector<2x16x128xbf16>
    tpu.vector_store %arg9[%c0_29, %c2_30, %c0_31], %36 {strides = array<i32>} : memref<2x20x128xbf16, #tpu.memory_space<vmem>>, vector<2x16x128xbf16>,
    %c0_32 = arith.constant 0 : index
    %c0_33 = arith.constant 0 : index
    %c0_34 = arith.constant 0 : index
    %38 = vector.load %arg9[%c0_32, %c0_33, %c0_34] : memref<2x20x128xbf16, #tpu.memory_space<vmem>>, vector<2x16x128xbf16>
    %c0_35 = arith.constant 0 : index
    %c1_36 = arith.constant 1 : index
    %c0_37 = arith.constant 0 : index
    %39 = vector.load %arg9[%c0_35, %c1_36, %c0_37] : memref<2x20x128xbf16, #tpu.memory_space<vmem>>, vector<2x16x128xbf16>
    %c0_38 = arith.constant 0 : index
    %c2_39 = arith.constant 2 : index
    %c0_40 = arith.constant 0 : index
    %40 = vector.load %arg9[%c0_38, %c2_39, %c0_40] : memref<2x20x128xbf16, #tpu.memory_space<vmem>>, vector<2x16x128xbf16>
    %c0_41 = arith.constant 0 : index
    %c3_42 = arith.constant 3 : index
    %c0_43 = arith.constant 0 : index
    %41 = vector.load %arg9[%c0_41, %c3_42, %c0_43] : memref<2x20x128xbf16, #tpu.memory_space<vmem>>, vector<2x16x128xbf16>
    %c0_44 = arith.constant 0 : index
    %c4_45 = arith.constant 4 : index
    %c0_46 = arith.constant 0 : index
    %42 = vector.load %arg9[%c0_44, %c4_45, %c0_46] : memref<2x20x128xbf16, #tpu.memory_space<vmem>>, vector<2x16x128xbf16>
    %43 = tpu.concatenate %38, %39, %40, %41, %42 in 2 : vector<2x16x128xbf16>, vector<2x16x128xbf16>, vector<2x16x128xbf16>, vector<2x16x128xbf16>, vector<2x16x128xbf16> -> vector<2x16x640xbf16>
    %44 = vector.shape_cast %43 : vector<2x16x640xbf16> to vector<32x640xbf16>
    %c1_47 = arith.constant 1 : index
    %c0_48 = arith.constant 0 : index
    %c0_49 = arith.constant 0 : index
    %45 = vector.load %arg3[%c1_47, %c0_48, %c0_49] : memref<3x640x128xbf16, #tpu.memory_space<vmem>>, vector<1x640x128xbf16>
    %46 = vector.shape_cast %45 : vector<1x640x128xbf16> to vector<640x128xbf16>
    %cst_50 = arith.constant dense<0.000000e+00> : vector<32x128xf32>
    %47 = tpu.matmul %44, %46, %cst_50 {dimension_numbers = #tpu.dot_dimension_numbers<[1], [0], [0], [1], [0, 0, 1, 1], [], []>} : vector<32x640xbf16>, vector<640x128xbf16>, vector<32x128xf32> -> vector<32x128xf32>
    %cst_51 = arith.constant 0.000000e+00 : f32
    %48 = vector.broadcast %cst_51 : f32 to vector<32x128xf32>
    %49 = arith.maximumf %47, %48 : vector<32x128xf32>
    %c1_52 = arith.constant 1 : index
    %c0_53 = arith.constant 0 : index
    %c0_54 = arith.constant 0 : index
    %50 = vector.load %arg4[%c1_52, %c0_53, %c0_54] : memref<3x1x128xf32, #tpu.memory_space<vmem>>, vector<1x1x128xf32>
    %51 = vector.shape_cast %50 : vector<1x1x128xf32> to vector<1x128xf32>
    %52 = vector.broadcast %51 : vector<1x128xf32> to vector<32x128xf32>
    %53 = arith.mulf %49, %52 : vector<32x128xf32>
    %c1_55 = arith.constant 1 : index
    %c0_56 = arith.constant 0 : index
    %c0_57 = arith.constant 0 : index
    %54 = vector.load %arg5[%c1_55, %c0_56, %c0_57] : memref<3x1x128xf32, #tpu.memory_space<vmem>>, vector<1x1x128xf32>
    %55 = vector.shape_cast %54 : vector<1x1x128xf32> to vector<1x128xf32>
    %56 = vector.broadcast %55 : vector<1x128xf32> to vector<32x128xf32>
    %57 = arith.addf %53, %56 : vector<32x128xf32>
    %58 = vector.shape_cast %57 : vector<32x128xf32> to vector<2x16x128xf32>
    %59 = arith.truncf %58 : vector<2x16x128xf32> to vector<2x16x128xbf16>
    %c0_58 = arith.constant 0 : index
    %c2_59 = arith.constant 2 : index
    %c0_60 = arith.constant 0 : index
    %60 = vector.load %arg9[%c0_58, %c2_59, %c0_60] : memref<2x20x128xbf16, #tpu.memory_space<vmem>>, vector<2x16x128xbf16>
    tpu.vector_store %arg9[%c0_58, %c2_59, %c0_60], %59 {strides = array<i32>} : memref<2x20x128xbf16, #tpu.memory_space<vmem>>, vector<2x16x128xbf16>,
    %c0_61 = arith.constant 0 : index
    %c0_62 = arith.constant 0 : index
    %c0_63 = arith.constant 0 : index
    %61 = vector.load %arg9[%c0_61, %c0_62, %c0_63] : memref<2x20x128xbf16, #tpu.memory_space<vmem>>, vector<2x16x128xbf16>
    %c0_64 = arith.constant 0 : index
    %c1_65 = arith.constant 1 : index
    %c0_66 = arith.constant 0 : index
    %62 = vector.load %arg9[%c0_64, %c1_65, %c0_66] : memref<2x20x128xbf16, #tpu.memory_space<vmem>>, vector<2x16x128xbf16>
    %c0_67 = arith.constant 0 : index
    %c2_68 = arith.constant 2 : index
    %c0_69 = arith.constant 0 : index
    %63 = vector.load %arg9[%c0_67, %c2_68, %c0_69] : memref<2x20x128xbf16, #tpu.memory_space<vmem>>, vector<2x16x128xbf16>
    %c0_70 = arith.constant 0 : index
    %c3_71 = arith.constant 3 : index
    %c0_72 = arith.constant 0 : index
    %64 = vector.load %arg9[%c0_70, %c3_71, %c0_72] : memref<2x20x128xbf16, #tpu.memory_space<vmem>>, vector<2x16x128xbf16>
    %c0_73 = arith.constant 0 : index
    %c4_74 = arith.constant 4 : index
    %c0_75 = arith.constant 0 : index
    %65 = vector.load %arg9[%c0_73, %c4_74, %c0_75] : memref<2x20x128xbf16, #tpu.memory_space<vmem>>, vector<2x16x128xbf16>
    %66 = tpu.concatenate %61, %62, %63, %64, %65 in 2 : vector<2x16x128xbf16>, vector<2x16x128xbf16>, vector<2x16x128xbf16>, vector<2x16x128xbf16>, vector<2x16x128xbf16> -> vector<2x16x640xbf16>
    %67 = vector.shape_cast %66 : vector<2x16x640xbf16> to vector<32x640xbf16>
    %c2_76 = arith.constant 2 : index
    %c0_77 = arith.constant 0 : index
    %c0_78 = arith.constant 0 : index
    %68 = vector.load %arg3[%c2_76, %c0_77, %c0_78] : memref<3x640x128xbf16, #tpu.memory_space<vmem>>, vector<1x640x128xbf16>
    %69 = vector.shape_cast %68 : vector<1x640x128xbf16> to vector<640x128xbf16>
    %cst_79 = arith.constant dense<0.000000e+00> : vector<32x128xf32>
    %70 = tpu.matmul %67, %69, %cst_79 {dimension_numbers = #tpu.dot_dimension_numbers<[1], [0], [0], [1], [0, 0, 1, 1], [], []>} : vector<32x640xbf16>, vector<640x128xbf16>, vector<32x128xf32> -> vector<32x128xf32>
    %cst_80 = arith.constant 0.000000e+00 : f32
    %71 = vector.broadcast %cst_80 : f32 to vector<32x128xf32>
    %72 = arith.maximumf %70, %71 : vector<32x128xf32>
    %c2_81 = arith.constant 2 : index
    %c0_82 = arith.constant 0 : index
    %c0_83 = arith.constant 0 : index
    %73 = vector.load %arg4[%c2_81, %c0_82, %c0_83] : memref<3x1x128xf32, #tpu.memory_space<vmem>>, vector<1x1x128xf32>
    %74 = vector.shape_cast %73 : vector<1x1x128xf32> to vector<1x128xf32>
    %75 = vector.broadcast %74 : vector<1x128xf32> to vector<32x128xf32>
    %76 = arith.mulf %72, %75 : vector<32x128xf32>
    %c2_84 = arith.constant 2 : index
    %c0_85 = arith.constant 0 : index
    %c0_86 = arith.constant 0 : index
    %77 = vector.load %arg5[%c2_84, %c0_85, %c0_86] : memref<3x1x128xf32, #tpu.memory_space<vmem>>, vector<1x1x128xf32>
    %78 = vector.shape_cast %77 : vector<1x1x128xf32> to vector<1x128xf32>
    %79 = vector.broadcast %78 : vector<1x128xf32> to vector<32x128xf32>
    %80 = arith.addf %76, %79 : vector<32x128xf32>
    %81 = arith.truncf %80 : vector<32x128xf32> to vector<32x128xbf16>
    %c0_87 = arith.constant 0 : index
    %c0_88 = arith.constant 0 : index
    %82 = vector.load %arg6[%c0_87, %c0_88] : memref<128x128xbf16, #tpu.memory_space<vmem>>, vector<128x128xbf16>
    %cst_89 = arith.constant dense<0.000000e+00> : vector<32x128xf32>
    %83 = tpu.matmul %81, %82, %cst_89 {dimension_numbers = #tpu.dot_dimension_numbers<[1], [0], [0], [1], [0, 0, 1, 1], [], []>} : vector<32x128xbf16>, vector<128x128xbf16>, vector<32x128xf32> -> vector<32x128xf32>
    %c0_90 = arith.constant 0 : index
    %c0_91 = arith.constant 0 : index
    %84 = vector.load %arg7[%c0_90, %c0_91] : memref<1x128xf32, #tpu.memory_space<vmem>>, vector<1x128xf32>
    %85 = vector.broadcast %84 : vector<1x128xf32> to vector<32x128xf32>
    %86 = arith.addf %83, %85 : vector<32x128xf32>
    %87 = vector.shape_cast %86 : vector<32x128xf32> to vector<2x16x128xf32>
    %c0_92 = arith.constant 0 : index
    %c0_93 = arith.constant 0 : index
    %c0_94 = arith.constant 0 : index
    %88 = vector.load %arg8[%c0_92, %c0_93, %c0_94] : memref<2x16x128xf32, #tpu.memory_space<vmem>>, vector<2x16x128xf32>
    tpu.vector_store %arg8[%c0_92, %c0_93, %c0_94], %87 {strides = array<i32>} : memref<2x16x128xf32, #tpu.memory_space<vmem>>, vector<2x16x128xf32>,
    return
  }
  func.func @transform_0(%arg0: i32) -> (i32, i32) {
    %c0_i32 = arith.constant 0 : i32
    %c0_i32_0 = arith.constant 0 : i32
    return %arg0, %c0_i32 : i32, i32
  }
  func.func @transform_1(%arg0: i32) -> (i32, i32) {
    %c0_i32 = arith.constant 0 : i32
    %c0_i32_0 = arith.constant 0 : i32
    %c0_i32_1 = arith.constant 0 : i32
    return %c0_i32, %c0_i32_0 : i32, i32
  }
  func.func @transform_2(%arg0: i32) -> (i32, i32, i32) {
    %c0_i32 = arith.constant 0 : i32
    %c0_i32_0 = arith.constant 0 : i32
    %c0_i32_1 = arith.constant 0 : i32
    %c0_i32_2 = arith.constant 0 : i32
    return %c0_i32, %c0_i32_0, %c0_i32_1 : i32, i32, i32
  }
  func.func @transform_3(%arg0: i32) -> (i32, i32, i32) {
    %c0_i32 = arith.constant 0 : i32
    %c0_i32_0 = arith.constant 0 : i32
    %c0_i32_1 = arith.constant 0 : i32
    %c0_i32_2 = arith.constant 0 : i32
    return %c0_i32, %c0_i32_0, %c0_i32_1 : i32, i32, i32
  }
  func.func @transform_4(%arg0: i32) -> (i32, i32, i32) {
    %c0_i32 = arith.constant 0 : i32
    %c0_i32_0 = arith.constant 0 : i32
    %c0_i32_1 = arith.constant 0 : i32
    %c0_i32_2 = arith.constant 0 : i32
    return %c0_i32, %c0_i32_0, %c0_i32_1 : i32, i32, i32
  }
  func.func @transform_5(%arg0: i32) -> (i32, i32) {
    %c0_i32 = arith.constant 0 : i32
    %c0_i32_0 = arith.constant 0 : i32
    %c0_i32_1 = arith.constant 0 : i32
    return %c0_i32, %c0_i32_0 : i32, i32
  }
  func.func @transform_6(%arg0: i32) -> (i32, i32) {
    %c0_i32 = arith.constant 0 : i32
    %c0_i32_0 = arith.constant 0 : i32
    %c0_i32_1 = arith.constant 0 : i32
    return %c0_i32, %c0_i32_0 : i32, i32
  }
  func.func @transform_7(%arg0: i32) -> (i32, i32, i32) {
    %c0_i32 = arith.constant 0 : i32
    %c0_i32_0 = arith.constant 0 : i32
    %c0_i32_1 = arith.constant 0 : i32
    return %arg0, %c0_i32, %c0_i32_0 : i32, i32, i32
  }
}

</mosaic_0001>

<bundles_post_ra>
// kernel: tpu_custom_call.1
= control target key start
LH: loop header
LB: loop body
LE: loop exit
PB: predicated region body
PF: predicated region fallthrough
CT: control target
= control target key end

     0   :  { %12 = vsyncpa [#allocation4], 0  ;;  %s3363_s0 = inlined_call_operand.vmem [shape: s32[32,1], index: 0, kind: input, shape index: {}]   ;;  %s3364_s1 = inlined_call_operand.hbm [shape: bf16[128,128], index: 1, kind: input, shape index: {}]   ;;  %s3365_s2 = inlined_call_operand.hbm [shape: bf16[3,640,128], index: 2, kind: input, shape index: {}]   ;;  %s3366_s3 = inlined_call_operand.vmem [shape: f32[3,1,128], index: 3, kind: input, shape index: {}]   ;;  %s3367_s4 = inlined_call_operand.vmem [shape: f32[3,1,128], index: 4, kind: input, shape index: {}]   ;;  %s3368_s5 = inlined_call_operand.hbm [shape: bf16[128,128], index: 5, kind: input, shape index: {}]   ;;  %s3369_s6 = inlined_call_operand.vmem [shape: f32[1,128], index: 6, kind: input, shape index: {}]   ;;  %s3370_s7 = inlined_call_operand.hbm [shape: f32[2,16,128], index: 7, kind: output, shape index: {}]  }
   0x1   :  { %13 = vsyncpa [#allocation7], 0 }
   0x2   :  { %14 = vsyncpa [#allocation5], 0  ;;  %s3129_s24 = smov [#allocation6]   ;;  %s3130_s26 = smov [#allocation3]  }
   0x3   :  { %s34_s25 = sshll.u32 %s3129_s24, 4  ;;  %s22_s27 = sshll.u32 %s3130_s26, 4  ;;  %s35_s25 = int_to_ptr.vmem [resolvable:$true] %s34_s25  ;;  %s23_s27 = int_to_ptr.vmem [resolvable:$true] %s22_s27 }
   0x4   :  { %s3051_s28 = scalar_lea.vmem %s35_s25, 15360  ;;  %p3056_p1 = scmp.lt.s32.totalorder %s35_s25, %s35_s25 }
   0x5   :  { %p3052_p0 = scmp.ne.s32.totalorder %s35_s25, %s3051_s28  ;;  %p3057_p2 = scmp.lt.s32.totalorder %s3051_s28, %s3051_s28 }
   0x7   :  { %p3058_p3 = por %p3057_p2, %p3056_p1 }
   0x9   :  { %p3059_p4 = pnand %p3058_p3, %p3052_p0 }
   0xb   :  { %3062 = shalt.err (!%p3059_p4)
}
   0xc   :  { %s3131_s29 = smov 64   ;;  %s3132_s30 = smov 4  }
   0xd   :  { %40 = dma.hbm_to_vmem [thread:$0]  %s3365_s2, 15360, %s35_s25, [#allocation7], %s3131_s29, %s3131_s29, %s3132_s30  }
   0xe   :  { %s3071_s10 = scalar_lea.vmem %s23_s27, 1024  ;;  %p3076_p6 = scmp.lt.s32.totalorder %s23_s27, %s23_s27 }
   0xf   :  { %p3072_p5 = scmp.ne.s32.totalorder %s23_s27, %s3071_s10  ;;  %p3077_p7 = scmp.lt.s32.totalorder %s3071_s10, %s3071_s10 }
  0x11   :  { %p3078_p8 = por %p3077_p7, %p3076_p6 }
  0x13   :  { %p3079_p9 = pnand %p3078_p8, %p3072_p5 }
  0x15   :  { %3082 = shalt.err (!%p3079_p9)
}
  0x16   :  { %28 = dma.hbm_to_vmem [thread:$0]  %s3364_s1, 1024, %s23_s27, [#allocation4], %s3131_s29, %s3131_s29, %s3132_s30  }
  0x17   :  { %s3133_s13 = smov [#allocation8]  }
  0x18   :  { %s50_s14 = sshll.u32 %s3133_s13, 4  ;;  %s51_s14 = int_to_ptr.vmem [resolvable:$true] %s50_s14 }
  0x19   :  { %s3091_s15 = scalar_lea.vmem %s51_s14, 1024  ;;  %p3096_p11 = scmp.lt.s32.totalorder %s51_s14, %s51_s14 }
  0x1a   :  { %p3092_p10 = scmp.ne.s32.totalorder %s51_s14, %s3091_s15  ;;  %p3097_p12 = scmp.lt.s32.totalorder %s3091_s15, %s3091_s15 }
  0x1c   :  { %p3098_p13 = por %p3097_p12, %p3096_p11 }
  0x1e   :  { %p3099_p0 = pnand %p3098_p13, %p3092_p10 }
  0x20   :  { %3102 = shalt.err (!%p3099_p0)
}
  0x21   :  { %56 = dma.hbm_to_vmem [thread:$0]  %s3368_s5, 1024, %s51_s14, [#allocation7], %s3131_s29, %s3131_s29, %s3132_s30  }
  0x22   :  { %3123 = dma.done.wait [#allocation4], 1024  }
  0x23   :  { %3124 = vsyncadd [#allocation4], 4294966272 }
  0x24   :  { %3125 = dma.done.wait [#allocation7], 16384  }
  0x25   :  { %3126 = vsyncadd [#allocation7], 4294950912  ;;  %v3134_v0 = vmov 0   ;;  %v79_v1 = vld [vmem:[%s3363_s0 + $0x10] sm:$0xff]  ;;  %v77_v2 = vld [vmem:[%s3363_s0] sm:$0xff]  ;;  %v81_v16 = vlaneseq  ;;  %vm234_vm6 = vcmask 1040384  }
  0x26   :  { %2876 = vset.pattern.permute.xlu1 %v3134_v0  ;;  %73 = vst [vmem:[#allocation2] sm:$0x1] %v3134_v0  ;;  %74 = vst [vmem:[#allocation2 + $0xc] sm:$0x1] %v3134_v0  ;;  %2875 = vset.pattern.permute.xlu0 %v3134_v0  ;;  %v80_v3 = vld [vmem:[%s3363_s0 + $0x18] sm:$0xff]  ;;  %v78_v4 = vld [vmem:[%s3363_s0 + $0x8] sm:$0xff] }
  0x27   :  { %90 = vperm.xlu1 %2876, %v79_v1   ;;  %84 = vperm.xlu0 %2875, %v77_v2   ;;  %v2877_v5 = vld [vmem:[#allocation3 + $0x38] sm:$0xff]   ;;  %v2878_v6 = vld [vmem:[#allocation3 + $0x30] sm:$0xff]   ;;  %v2879_v7 = vld [vmem:[#allocation3 + $0x28] sm:$0xff]   ;;  %v82_v19 = vand.u32 127, %v81_v16  ;;  %v3135_v22 = vmov 1.0|1.0  }
  0x28   :  { %2765 = vmatprep.subr.bf16.mxu0 %v2877_v5  ;;  %v2880_v8 = vld [vmem:[#allocation3 + $0x20] sm:$0xff]   ;;  %v2885_v9 = vld [vmem:[#allocation6 + $0x78] sm:$0xff]   ;;  %v2882_v12 = vld [vmem:[#allocation3 + $0x10] sm:$0xff]   ;;  %vm235_vm7 = vcmask 1044484   ;;  %vm289_vm9 = vsmask.f32 7424 }
  0x29   :  { %2766 = vmatpush3.bf16.msra.mxu0 %v2877_v5  ;;  %2557 = vmatprep.subr.bf16.mxu1 %v2885_v9  ;;  %v2886_v10 = vld [vmem:[#allocation6 + $0x38] sm:$0xff]   ;;  %v2883_v13 = vld [vmem:[#allocation3 + $0x8] sm:$0xff]   ;;  %v2884_v14 = vld [vmem:[#allocation3] sm:$0xff]   ;;  %vm337_vm10 = vsmask.f32 6400  ;;  %vm322_vm11 = vcmask 1046528  }
  0x2a   :  { %2767 = vmatprep.subr.bf16.mxu0 %v2878_v6  ;;  %v2881_v11 = vld [vmem:[#allocation3 + $0x18] sm:$0xff]   ;;  %2558 = vmatpush3.bf16.msra.mxu1 %v2886_v10  ;;  %v2889_v24 = vld [vmem:[#allocation6 + $0x70] sm:$0xff]   ;;  %v2893_v28 = vld [vmem:[#allocation6 + $0x68] sm:$0xff]   ;;  %vm380_vm12 = vcmask 1045504  }
  0x2b   :  { %93 = vperm.xlu1 %2876, %v80_v3   ;;  %87 = vperm.xlu0 %2875, %v78_v4   ;;  %v2887_v15 = vld [vmem:[#allocation6 + $0xf8] sm:$0xff]   ;;  %v2890_v25 = vld [vmem:[#allocation6 + $0x30] sm:$0xff]   ;;  %v2894_v29 = vld [vmem:[#allocation6 + $0x28] sm:$0xff]  }
  0x2c   :  { %v2888_v23 = vld [vmem:[#allocation6 + $0xb8] sm:$0xff]   ;;  %v2891_v26 = vld [vmem:[#allocation6 + $0xf0] sm:$0xff]   ;;  %2559 = vmatprep.subr.bf16.mxu1 %v2889_v24  ;;  %v2895_v30 = vld [vmem:[#allocation6 + $0xe8] sm:$0xff]  }
  0x2d   :  { %2768 = vmatpush3.bf16.msra.mxu0 %v2878_v6  ;;  %v2892_v27 = vld [vmem:[#allocation6 + $0xb0] sm:$0xff]   ;;  %v2896_v31 = vld [vmem:[#allocation6 + $0xa8] sm:$0xff]   ;;  %v2897_v32 = vld [vmem:[#allocation6 + $0x60] sm:$0xff]  }
  0x2e   :  { %2769 = vmatprep.subr.bf16.mxu0 %v2879_v7  ;;  %2560 = vmatpush3.bf16.msra.mxu1 %v2890_v25  ;;  %v2898_v33 = vld [vmem:[#allocation6 + $0x20] sm:$0xff]   ;;  %v2901_v36 = vld [vmem:[#allocation6 + $0x58] sm:$0xff]   ;;  %v2905_v40 = vld [vmem:[#allocation6 + $0x50] sm:$0xff]  }
  0x2f   :  { %2561 = vmatprep.subr.bf16.mxu1 %v2893_v28  ;;  %v2899_v34 = vld [vmem:[#allocation6 + $0xe0] sm:$0xff]   ;;  %v2902_v37 = vld [vmem:[#allocation6 + $0x18] sm:$0xff]   ;;  %v2906_v41 = vld [vmem:[#allocation6 + $0x10] sm:$0xff]  }
  0x30   :  { %v2900_v35 = vld [vmem:[#allocation6 + $0xa0] sm:$0xff]   ;;  %v2903_v38 = vld [vmem:[#allocation6 + $0xd8] sm:$0xff]   ;;  %v2907_v42 = vld [vmem:[#allocation6 + $0xd0] sm:$0xff]  }
  0x31   :  { %2770 = vmatpush3.bf16.msra.mxu0 %v2879_v7  ;;  %v2904_v39 = vld [vmem:[#allocation6 + $0x98] sm:$0xff]   ;;  %v2908_v43 = vld [vmem:[#allocation6 + $0x90] sm:$0xff]   ;;  %v2909_v44 = vld [vmem:[#allocation6 + $0x48] sm:$0xff]  }
  0x32   :  { %2771 = vmatprep.subr.bf16.mxu0 %v2880_v8  ;;  %2562 = vmatpush3.bf16.msra.mxu1 %v2894_v29  ;;  %v2911_v45 = vld [vmem:[#allocation6 + $0xc8] sm:$0xff]   ;;  %v2913_v48 = vld [vmem:[#allocation6 + $0x40] sm:$0xff]   ;;  %v3200_v52 = vld [vmem:[#allocation6 + $0x138] sm:$0xff]  }
  0x33   :  { %2563 = vmatprep.subr.bf16.mxu1 %v2897_v32  ;;  %v2910_v46 = vld [vmem:[#allocation6 + $0x8] sm:$0xff]   ;;  %v2915_v49 = vld [vmem:[#allocation6 + $0xc0] sm:$0xff]   ;;  %vm3203_vm8 = vmor %vm234_vm6, %vm235_vm7 }
  0x34   :  { %v2912_v47 = vld [vmem:[#allocation6 + $0x88] sm:$0xff]   ;;  %v2914_v50 = vld [vmem:[#allocation6] sm:$0xff]  }
  0x35   :  { %2772 = vmatpush3.bf16.msra.mxu0 %v2880_v8  ;;  %v2916_v51 = vld [vmem:[#allocation6 + $0x80] sm:$0xff]  }
  0x36   :  { %2773 = vmatprep.subr.bf16.mxu0 %v2881_v11  ;;  %2564 = vmatpush3.bf16.msra.mxu1 %v2898_v33 }
  0x37   :  { %2565 = vmatprep.subr.bf16.mxu1 %v2901_v36 }
  0x39   :  { %2774 = vmatpush3.bf16.msra.mxu0 %v2881_v11 }
  0x3a   :  { %2775 = vmatprep.subr.bf16.mxu0 %v2882_v12  ;;  %2566 = vmatpush3.bf16.msra.mxu1 %v2902_v37 }
  0x3b   :  { %2567 = vmatprep.subr.bf16.mxu1 %v2905_v40 }
  0x3d   :  { %2776 = vmatpush3.bf16.msra.mxu0 %v2882_v12 }
  0x3e   :  { %2777 = vmatprep.subr.bf16.mxu0 %v2883_v13  ;;  %2568 = vmatpush3.bf16.msra.mxu1 %v2906_v41 }
  0x3f   :  { %2569 = vmatprep.subr.bf16.mxu1 %v2909_v44 }
  0x41   :  { %2778 = vmatpush3.bf16.msra.mxu0 %v2883_v13 }
  0x42   :  { %2779 = vmatprep.subr.bf16.mxu0 %v2884_v14  ;;  %2570 = vmatpush3.bf16.msra.mxu1 %v2910_v46 }
  0x43   :  { %2571 = vmatprep.subr.bf16.mxu1 %v2913_v48 }
  0x45   :  { %2780 = vmatpush3.bf16.msra.mxu0 %v2884_v14 }
  0x46   :  { %2585 = vmatprep.subr.bf16.mxu0 %v2887_v15  ;;  %2572 = vmatpush3.bf16.msra.mxu1 %v2914_v50  ;;  %v2926_v50 = vld [vmem:[#allocation6 + $0x130] sm:$0xff]  }
  0x47   :  { %2785 = vmatprep.subr.bf16.mxu1 %v3200_v52 }
  0xa2   :  { %v91_v17 = vpop.permute.xlu1 %90  ;;  %v85_v18 = vpop.permute.xlu0 %84 }
  0xa3   :  { %vm97_vm0 = vcmp.eq.s32.totalorder %v82_v19, %v91_v17  ;;  %vm95_vm3 = vcmp.eq.s32.totalorder %v82_v19, %v85_v18 }
  0xa6   :  { %v94_v20 = vpop.permute.xlu1 %93  ;;  %v88_v21 = vpop.permute.xlu0 %87 }
  0xa7   :  { %vm98_vm1 = vcmp.eq.s32.totalorder %v82_v19, %v94_v20  ;;  %vm96_vm2 = vcmp.eq.s32.totalorder %v82_v19, %v88_v21 }
  0xa8   :  { %vm2352_vm4 = vmpackc.low %vm98_vm1, %vm97_vm0 }
  0xa9   :  { %vm2350_vm5 = vmpackc.low %vm96_vm2, %vm95_vm3 }
  0xaa   :  { %2781 = vmatprep.mubr.msk.bf16.mxu0 %vm2350_vm5, %v3135_v22 }
  0xab   :  { %2782 = vmatmul.mubr.msk.bf16.vlgmr.msra.gmra.mxu0 %vm2352_vm4, %v3135_v22 }
  0xac   :  { %2586 = vmatpush3.bf16.msra.mxu0 %v2888_v23 }
  0xad   :  { %2587 = vmatprep.subr.bf16.mxu0 %v2891_v26 }
  0xb0   :  { %2588 = vmatpush3.bf16.msra.mxu0 %v2892_v27 }
  0xb1   :  { %2589 = vmatprep.subr.bf16.mxu0 %v2895_v30 }
  0xb4   :  { %2590 = vmatpush3.bf16.msra.mxu0 %v2896_v31 }
  0xb5   :  { %2591 = vmatprep.subr.bf16.mxu0 %v2899_v34 }
  0xb8   :  { %2592 = vmatpush3.bf16.msra.mxu0 %v2900_v35 }
  0xb9   :  { %2593 = vmatprep.subr.bf16.mxu0 %v2903_v38 }
  0xbc   :  { %2594 = vmatpush3.bf16.msra.mxu0 %v2904_v39 }
  0xbd   :  { %2595 = vmatprep.subr.bf16.mxu0 %v2907_v42 }
  0xc0   :  { %2596 = vmatpush3.bf16.msra.mxu0 %v2908_v43 }
  0xc1   :  { %2597 = vmatprep.subr.bf16.mxu0 %v2911_v45 }
  0xc4   :  { %2598 = vmatpush3.bf16.msra.mxu0 %v2912_v47 }
  0xc5   :  { %2599 = vmatprep.subr.bf16.mxu0 %v2915_v49 }
  0xc8   :  { %2600 = vmatpush3.bf16.msra.mxu0 %v2916_v51 }
 0x16b   :  { %v2783_v53 = vpop.f32.mrf.mxu0 }
 0x16c   :  { %v2537_v54 = vpack.c.bf16 %v2783_v53, %v2783_v53 }
 0x16d   :  { %v207_v55 = vpop.f32.mrf.mxu0 }
 0x16e   :  { %v242_v56 = vrot.slane %v2537_v54, 7  ;;  %v2535_v57 = vpack.c.bf16 %v207_v55, %v207_v55 }
 0x16f   :  { %v2784_v58 = vpop.f32.mrf.mxu0 }
 0x170   :  { %256 = vst [vmem:[#allocation2 + $0xc] sm:$0xe] %v242_v56  ;;  %v237_v59 = vrot.slane %v2535_v57, 7  ;;  %v2538_v60 = vpack.c.bf16 %v2784_v58, %v2784_v58  ;;  %v243_v63 = vrot.slane %v242_v56, 4 }
 0x171   :  { %v210_v62 = vpop.f32.mrf.mxu0 }
 0x172   :  { %253 = vst [vmem:[#allocation2] sm:$0xe] %v237_v59  ;;  %v244_v0 = vrot.slane %v2538_v60, 7  ;;  %v2536_v1 = vpack.c.bf16 %v210_v62, %v210_v62  ;;  %v238_v2 = vrot.slane %v237_v59, 4 }
 0x174   :  { %v245_v3 = vsel %vm3203_vm8, %v243_v63, %v244_v0  ;;  %v246_v4 = vrot.slane %v244_v0, 4  ;;  %v239_v5 = vrot.slane %v2536_v1, 7  ;;  %v2927_v0 = vld [vmem:[#allocation6 + $0x128] sm:$0xff]  }
 0x175   :  { %257 = vst [vmem:[#allocation2 + $0x10] sm:$0xf] %v245_v3 }
 0x176   :  { %258 = vst [vmem:[#allocation2 + $0x14] sm:$0x1] %v246_v4  ;;  %v240_v6 = vsel %vm3203_vm8, %v238_v2, %v239_v5  ;;  %v241_v7 = vrot.slane %v239_v5, 4 }
 0x177   :  { %254 = vst [vmem:[#allocation2 + $0x4] sm:$0xf] %v240_v6  ;;  %v261_v9 = vld [vmem:[#allocation2 + $0xc] sm:$0xf] }
 0x178   :  { %255 = vst [vmem:[#allocation2 + $0x8] sm:$0x1] %v241_v7  ;;  %v266_v13 = vld [vmem:[#allocation2 + $0xc] sm:$0xe] }
 0x179   :  { %v259_v8 = vld [vmem:[#allocation2] sm:$0xf] }
 0x17a   :  { %v265_v15 = vld [vmem:[#allocation2] sm:$0xe] }
 0x17b   :  { %v269_v56 = vld [vmem:[#allocation2] sm:$0xc] }
 0x17c   :  { %v3211_v10 = vld [vmem:[#allocation2 + $0x10] sm:$0xf] }
 0x17d   :  { %v3214_v11 = vcombine.low %v261_v9, %v3211_v10  ;;  %v3216_v12 = vld [vmem:[#allocation2 + $0x14] ss:$0 sps:$4 sm:$0x11]   ;;  %v3223_v22 = vcombine.low %v266_v13, %v3211_v10  ;;  %v2931_v13 = vld [vmem:[#allocation6 + $0x110] sm:$0xff]  }
 0x17e   :  { %v260_v14 = vld [vmem:[#allocation2 + $0x4] sm:$0xf]  ;;  %v310_v34 = vshll.u32 %v3216_v12, 16  ;;  %v3228_v38 = vld [vmem:[#allocation2 + $0x14] ss:$0 sps:$4 sm:$0x33]  }
 0x17f   :  { %v2358_v16 = vcombine.low %v259_v8, %v260_v14  ;;  %v2918_v17 = vld [vmem:[#allocation2 + $0x8] ss:$0 sps:$4 sm:$0x11]   ;;  %v2362_v18 = vcombine.low %v265_v15, %v260_v14  ;;  %v303_v19 = vshrl.u32 %v3214_v11, 16  ;;  %v305_v21 = vshll.u32 %v3214_v11, 16  ;;  %v2930_v9 = vld [vmem:[#allocation6 + $0x118] sm:$0xff]  }
 0x180   :  { %v3219_v20 = vld [vmem:[#allocation2 + $0x8] ss:$0 sps:$4 sm:$0x33]   ;;  %v298_v25 = vshll.u32 %v2918_v17, 16  ;;  %v324_v42 = vrot.slane %v2918_v17, 1  ;;  %v356_v45 = vshrl.u32 %v3223_v22, 16  ;;  %v2366_v59 = vcombine.low %v269_v56, %v260_v14 }
 0x181   :  { %v291_v23 = vshrl.u32 %v2358_v16, 16  ;;  %v293_v24 = vshll.u32 %v2358_v16, 16  ;;  %v339_v26 = vshrl.u32 %v2362_v18, 16  ;;  %v342_v27 = vshll.u32 %v2362_v18, 16  ;;  %v2933_v14 = vld [vmem:[#allocation6 + $0x100] sm:$0xff]  }
 0x182   :  { %v347_v28 = vshrl.u32 %v3219_v20, 16  ;;  %v350_v29 = vshll.u32 %v3219_v20, 16  ;;  %v307_v30 = vrot.slane %v305_v21, 1  ;;  %v300_v32 = vrot.slane %v298_v25, 1  ;;  %v270_v15 = vld [vmem:[#allocation2 + $0xc] sm:$0xc] }
 0x183   :  { %v295_v31 = vrot.slane %v293_v24, 1  ;;  %v341_v33 = vrot.slane %v339_v26, 1  ;;  %v344_v35 = vrot.slane %v342_v27, 2  ;;  %v323_v41 = vrot.slane %v2362_v18, 1  ;;  %v2937_v21 = vld [vmem:[#allocation6 + $0x238] sm:$0xff]   ;;  %v2940_v24 = vld [vmem:[#allocation6 + $0x170] sm:$0xff]  }
 0x184   :  { %v349_v36 = vrot.slane %v347_v28, 1  ;;  %v352_v37 = vrot.slane %v350_v29, 2  ;;  %v308_v40 = vor.u32 %v307_v30, %v303_v19  ;;  %v359_v46 = vshll.u32 %v3223_v22, 16  ;;  %v2935_v19 = vld [vmem:[#allocation6 + $0x1b8] sm:$0xff]   ;;  %v2942_v25 = vld [vmem:[#allocation6 + $0x1f0] sm:$0xff]   ;;  %v2943_v26 = vld [vmem:[#allocation6 + $0x1a8] sm:$0xff]  }
 0x185   :  { %v296_v39 = vor.u32 %v295_v31, %v291_v23  ;;  %v345_v43 = vor.u32 %v344_v35, %v341_v33  ;;  %v312_v48 = vrot.slane %v310_v34, 1  ;;  %v364_v49 = vshrl.u32 %v3228_v38, 16  ;;  %2623 = vmatprep.subr.bf16.mxu0 %v2935_v19  ;;  %v2939_v23 = vld [vmem:[#allocation6 + $0x1b0] sm:$0xff]   ;;  %v2944_v27 = vld [vmem:[#allocation6 + $0x168] sm:$0xff]   ;;  %v2947_v30 = vld [vmem:[#allocation6 + $0x1a0] sm:$0xff]  }
 0x186   :  { %v353_v44 = vor.u32 %v352_v37, %v349_v36  ;;  %v358_v53 = vrot.slane %v356_v45, 1  ;;  %v361_v54 = vrot.slane %v359_v46, 2  ;;  %v367_v55 = vshll.u32 %v3228_v38, 16  ;;  %v2945_v28 = vld [vmem:[#allocation6 + $0x228] sm:$0xff]   ;;  %v2949_v31 = vld [vmem:[#allocation6 + $0x220] sm:$0xff]   ;;  %v2951_v34 = vld [vmem:[#allocation6 + $0x198] sm:$0xff]  }
 0x187   :  { %v301_v47 = vsel %vm289_vm9, %v296_v39, %v300_v32  ;;  %v313_v57 = vsel %vm289_vm9, %v308_v40, %v312_v48  ;;  %v366_v58 = vrot.slane %v364_v49, 1  ;;  %v325_v60 = vsel %vm322_vm11, %v323_v41, %v324_v42  ;;  %v2946_v29 = vld [vmem:[#allocation6 + $0x1e8] sm:$0xff]   ;;  %v2948_v32 = vld [vmem:[#allocation6 + $0x160] sm:$0xff]   ;;  %v2953_v35 = vld [vmem:[#allocation6 + $0x218] sm:$0xff]  }
 0x188   :  { %741 = vmatprep.mubr.bf16.mxu1 %v301_v47  ;;  %v354_v51 = vsel %vm337_vm10, %v345_v43, %v353_v44  ;;  %v362_v62 = vor.u32 %v361_v54, %v358_v53  ;;  %v369_v63 = vrot.slane %v367_v55, 2  ;;  %v381_v2 = vrot.slane %v2366_v59, 2  ;;  %v2950_v33 = vld [vmem:[#allocation6 + $0x1e0] sm:$0xff]   ;;  %v2952_v36 = vld [vmem:[#allocation6 + $0x158] sm:$0xff]   ;;  %v2957_v39 = vld [vmem:[#allocation6 + $0x210] sm:$0xff]  }
 0x189   :  { %742 = vmatmul.mubr.bf16.vlgmr.msra.gmra.mxu1 %v2358_v16  ;;  %790 = vmatprep.mubr.bf16.mxu0 %v354_v51  ;;  %v382_v3 = vrot.slane %v3219_v20, 2  ;;  %v326_v5 = vrot.slane %v3223_v22, 1  ;;  %v327_v6 = vrot.slane %v3216_v12, 1  ;;  %v2932_v12 = vld [vmem:[#allocation6 + $0x108] sm:$0xff]   ;;  %v385_v17 = vrot.slane %v3228_v38, 2  ;;  %v2936_v20 = vld [vmem:[#allocation6 + $0x178] sm:$0xff]  }
 0x18a   :  { %2786 = vmatpush3.bf16.msra.mxu1 %v3200_v52  ;;  %749 = vmatprep.mubr.bf16.mxu1 %v313_v57  ;;  %v370_v1 = vor.u32 %v369_v63, %v366_v58  ;;  %v2929_v52 = vld [vmem:[#allocation6 + $0x120] sm:$0xff]   ;;  %v2938_v22 = vld [vmem:[#allocation6 + $0x1f8] sm:$0xff]   ;;  %v2955_v38 = vld [vmem:[#allocation6 + $0x190] sm:$0xff]  }
 0x18b   :  { %791 = vmatmul.mubr.bf16.vlgmr.msra.gmra.mxu0 %v325_v60  ;;  %2787 = vmatprep.subr.bf16.mxu1 %v2926_v50  ;;  %v383_v7 = vsel %vm380_vm12, %v381_v2, %v382_v3  ;;  %v328_v8 = vsel %vm322_vm11, %v326_v5, %v327_v6  ;;  %v2954_v37 = vld [vmem:[#allocation6 + $0x1d8] sm:$0xff]   ;;  %v2956_v40 = vld [vmem:[#allocation6 + $0x150] sm:$0xff]   ;;  %v2959_v42 = vld [vmem:[#allocation6 + $0x188] sm:$0xff]  }
 0x18c   :  { %v371_v4 = vsel %vm337_vm10, %v362_v62, %v370_v1  ;;  %2624 = vmatpush3.bf16.msra.mxu0 %v2936_v20  ;;  %v2958_v41 = vld [vmem:[#allocation6 + $0x1d0] sm:$0xff]   ;;  %v2961_v43 = vld [vmem:[#allocation6 + $0x208] sm:$0xff]   ;;  %v2963_v46 = vld [vmem:[#allocation6 + $0x180] sm:$0xff]  }
 0x18d   :  { %798 = vmatprep.mubr.bf16.mxu0 %v371_v4  ;;  %2625 = vmatprep.subr.bf16.mxu0 %v2939_v23  ;;  %v2960_v44 = vld [vmem:[#allocation6 + $0x148] sm:$0xff]   ;;  %v2965_v47 = vld [vmem:[#allocation6 + $0x200] sm:$0xff]  }
 0x18e   :  { %2788 = vmatpush3.bf16.msra.mxu1 %v2926_v50  ;;  %v2962_v45 = vld [vmem:[#allocation6 + $0x1c8] sm:$0xff]   ;;  %v2964_v48 = vld [vmem:[#allocation6 + $0x140] sm:$0xff]   ;;  %v3249_v50 = vld [vmem:[#allocation6 + $0x278] sm:$0xff]  }
 0x18f   :  { %2789 = vmatprep.subr.bf16.mxu1 %v2927_v0  ;;  %v2966_v49 = vld [vmem:[#allocation6 + $0x1c0] sm:$0xff]  }
 0x190   :  { %2626 = vmatpush3.bf16.msra.mxu0 %v2940_v24 }
 0x191   :  { %750 = vmatmul.mubr.bf16.gmra.mxu1 %v3214_v11  ;;  %v2367_v11 = vcombine.low %v270_v15, %v3211_v10  ;;  %v2941_v10 = vld [vmem:[#allocation6 + $0x230] sm:$0xff]   ;;  %2627 = vmatprep.subr.bf16.mxu0 %v2943_v26 }
 0x192   :  { %2790 = vmatpush3.bf16.msra.mxu1 %v2927_v0  ;;  %2801 = vmatprep.mubr.bf16.mxu1 %v383_v7 }
 0x193   :  { %799 = vmatmul.mubr.bf16.gmra.mxu0 %v328_v8  ;;  %2791 = vmatprep.subr.bf16.mxu1 %v2929_v52  ;;  %v384_v16 = vrot.slane %v2367_v11, 2 }
 0x194   :  { %2628 = vmatpush3.bf16.msra.mxu0 %v2944_v27 }
 0x195   :  { %v386_v18 = vsel %vm380_vm12, %v384_v16, %v385_v17  ;;  %2629 = vmatprep.subr.bf16.mxu0 %v2947_v30  ;;  %v2408_v17 = vld [vmem:[%s3366_s3] ss:$0 sm:$0xff] }
 0x196   :  { %2792 = vmatpush3.bf16.msra.mxu1 %v2929_v52 }
 0x197   :  { %2793 = vmatprep.subr.bf16.mxu1 %v2930_v9 }
 0x198   :  { %2630 = vmatpush3.bf16.msra.mxu0 %v2948_v32 }
 0x199   :  { %2631 = vmatprep.subr.bf16.mxu0 %v2951_v34 }
 0x19a   :  { %2794 = vmatpush3.bf16.msra.mxu1 %v2930_v9 }
 0x19b   :  { %2795 = vmatprep.subr.bf16.mxu1 %v2931_v13 }
 0x19c   :  { %2632 = vmatpush3.bf16.msra.mxu0 %v2952_v36 }
 0x19d   :  { %2633 = vmatprep.subr.bf16.mxu0 %v2955_v38 }
 0x19e   :  { %2796 = vmatpush3.bf16.msra.mxu1 %v2931_v13 }
 0x19f   :  { %2797 = vmatprep.subr.bf16.mxu1 %v2932_v12 }
 0x1a0   :  { %2634 = vmatpush3.bf16.msra.mxu0 %v2956_v40 }
 0x1a1   :  { %2635 = vmatprep.subr.bf16.mxu0 %v2959_v42 }
 0x1a2   :  { %2798 = vmatpush3.bf16.msra.mxu1 %v2932_v12 }
 0x1a3   :  { %2799 = vmatprep.subr.bf16.mxu1 %v2933_v14 }
 0x1a4   :  { %2636 = vmatpush3.bf16.msra.mxu0 %v2960_v44 }
 0x1a5   :  { %2637 = vmatprep.subr.bf16.mxu0 %v2963_v46 }
 0x1a6   :  { %2800 = vmatpush3.bf16.msra.mxu1 %v2933_v14 }
 0x1a7   :  { %2651 = vmatprep.subr.bf16.mxu1 %v2937_v21 }
 0x1a8   :  { %2638 = vmatpush3.bf16.msra.mxu0 %v2964_v48 }
 0x1a9   :  { %2802 = vmatmul.mubr.bf16.vlgmr.msra.gmra.mxu1 %v386_v18  ;;  %2805 = vmatprep.subr.bf16.mxu0 %v3249_v50 }
 0x1aa   :  { %2652 = vmatpush3.bf16.msra.mxu1 %v2938_v22  ;;  %v2409_v22 = vld [vmem:[%s3367_s4] ss:$0 sm:$0xff] }
 0x1ab   :  { %2653 = vmatprep.subr.bf16.mxu1 %v2941_v10 }
 0x1ae   :  { %2654 = vmatpush3.bf16.msra.mxu1 %v2942_v25 }
 0x1af   :  { %2655 = vmatprep.subr.bf16.mxu1 %v2945_v28 }
 0x1b2   :  { %2656 = vmatpush3.bf16.msra.mxu1 %v2946_v29 }
 0x1b3   :  { %2657 = vmatprep.subr.bf16.mxu1 %v2949_v31 }
 0x1b6   :  { %2658 = vmatpush3.bf16.msra.mxu1 %v2950_v33 }
 0x1b7   :  { %2659 = vmatprep.subr.bf16.mxu1 %v2953_v35 }
 0x1ba   :  { %2660 = vmatpush3.bf16.msra.mxu1 %v2954_v37 }
 0x1bb   :  { %2661 = vmatprep.subr.bf16.mxu1 %v2957_v39 }
 0x1be   :  { %2662 = vmatpush3.bf16.msra.mxu1 %v2958_v41 }
 0x1bf   :  { %2663 = vmatprep.subr.bf16.mxu1 %v2961_v43 }
 0x1c2   :  { %2664 = vmatpush3.bf16.msra.mxu1 %v2962_v45 }
 0x1c3   :  { %2665 = vmatprep.subr.bf16.mxu1 %v2965_v47 }
 0x1c6   :  { %2666 = vmatpush3.bf16.msra.mxu1 %v2966_v49 }
 0x249   :  { %v2573_v51 = vpop.f32.mrf.mxu1 }
 0x24b   :  { %v2601_v53 = vpop.f32.mrf.mxu0  ;;  %v2574_v54 = vpop.f32.mrf.mxu1 }
 0x24c   :  { %v2575_v52 = vadd.f32 %v2574_v54, %v2573_v51 }
 0x24d   :  { %v2602_v55 = vpop.f32.mrf.mxu0  ;;  %v2576_v56 = vpop.f32.mrf.mxu1 }
 0x24e   :  { %v2603_v7 = vadd.f32 %v2602_v55, %v2601_v53 }
 0x24f   :  { %v2604_v57 = vpop.f32.mrf.mxu0  ;;  %v2577_v58 = vpop.f32.mrf.mxu1 }
 0x250   :  { %v2578_v14 = vadd.f32 %v2577_v58, %v2576_v56  ;;  %v793_v16 = vadd.f32 %v2603_v7, %v2575_v52 }
 0x251   :  { %v2605_v59 = vpop.f32.mrf.mxu0  ;;  %v2579_v60 = vpop.f32.mrf.mxu1 }
 0x252   :  { %v2606_v15 = vadd.f32 %v2605_v59, %v2604_v57 }
 0x253   :  { %v2607_v62 = vpop.f32.mrf.mxu0  ;;  %v2580_v63 = vpop.f32.mrf.mxu1 }
 0x254   :  { %v2581_v3 = vadd.f32 %v2580_v63, %v2579_v60  ;;  %v796_v26 = vadd.f32 %v2606_v15, %v2578_v14 }
 0x255   :  { %v2608_v0 = vpop.f32.mrf.mxu0  ;;  %v2582_v1 = vpop.f32.mrf.mxu1 }
 0x256   :  { %v2609_v4 = vadd.f32 %v2608_v0, %v2607_v62 }
 0x257   :  { %v2610_v2 = vpop.f32.mrf.mxu0  ;;  %v2583_v5 = vpop.f32.mrf.mxu1 }
 0x258   :  { %v2584_v8 = vadd.f32 %v2583_v5, %v2582_v1  ;;  %v801_v13 = vadd.f32 %v2609_v4, %v2581_v3 }
 0x259   :  { %v2611_v6 = vpop.f32.mrf.mxu0 }
 0x25a   :  { %v2612_v9 = vadd.f32 %v2611_v6, %v2610_v2 }
 0x25c   :  { %v804_v21 = vadd.f32 %v2612_v9, %v2584_v8 }
 0x269   :  { %v2803_v12 = vpop.f32.mrf.mxu1 }
 0x26a   :  { %v850_v11 = vadd.f32 %v2803_v12, %v801_v13 }
 0x26b   :  { %v841_v18 = vpop.f32.mrf.mxu1 }
 0x26c   :  { %v858_v19 = vmax.f32 %v850_v11, 0.0  ;;  %v842_v20 = vadd.f32 %v841_v18, %v793_v16 }
 0x26d   :  { %v2804_v23 = vpop.f32.mrf.mxu1 }
 0x26e   :  { %v869_v24 = vmul.f32 %v2408_v17, %v858_v19  ;;  %v856_v10 = vmax.f32 %v842_v20, 0.0  ;;  %v853_v25 = vadd.f32 %v2804_v23, %v804_v21 }
 0x26f   :  { %v844_v27 = vpop.f32.mrf.mxu1 }
 0x270   :  { %v880_v28 = vadd.f32 %v2409_v22, %v869_v24  ;;  %v867_v29 = vmul.f32 %v2408_v17, %v856_v10  ;;  %v859_v30 = vmax.f32 %v853_v25, 0.0  ;;  %v845_v31 = vadd.f32 %v844_v27, %v796_v26 }
 0x272   :  { %v2541_v32 = vpack.c.bf16 %v880_v28, %v880_v28  ;;  %v878_v33 = vadd.f32 %v2409_v22, %v867_v29  ;;  %v870_v34 = vmul.f32 %v2408_v17, %v859_v30  ;;  %v857_v35 = vmax.f32 %v845_v31, 0.0 }
 0x274   :  { %v899_v36 = vrot.slane %v2541_v32, 7  ;;  %v2539_v37 = vpack.c.bf16 %v878_v33, %v878_v33  ;;  %v881_v38 = vadd.f32 %v2409_v22, %v870_v34  ;;  %v868_v39 = vmul.f32 %v2408_v17, %v857_v35  ;;  %v2976_v32 = vld [vmem:[#allocation6 + $0x270] sm:$0xff]  }
 0x276   :  { %913 = vst [vmem:[#allocation2 + $0xc] sm:$0xe] %v899_v36  ;;  %v894_v40 = vrot.slane %v2539_v37, 7  ;;  %v2542_v41 = vpack.c.bf16 %v881_v38, %v881_v38  ;;  %v879_v42 = vadd.f32 %v2409_v22, %v868_v39  ;;  %v900_v43 = vrot.slane %v899_v36, 4 }
 0x278   :  { %910 = vst [vmem:[#allocation2] sm:$0xe] %v894_v40  ;;  %v901_v44 = vrot.slane %v2542_v41, 7  ;;  %v2540_v45 = vpack.c.bf16 %v879_v42, %v879_v42  ;;  %v895_v46 = vrot.slane %v894_v40, 4 }
 0x27a   :  { %v902_v47 = vsel %vm3203_vm8, %v900_v43, %v901_v44  ;;  %v903_v48 = vrot.slane %v901_v44, 4  ;;  %v896_v49 = vrot.slane %v2540_v45, 7  ;;  %v2977_v44 = vld [vmem:[#allocation6 + $0x268] sm:$0xff]  }
 0x27b   :  { %914 = vst [vmem:[#allocation2 + $0x10] sm:$0xf] %v902_v47 }
 0x27c   :  { %915 = vst [vmem:[#allocation2 + $0x14] sm:$0x1] %v903_v48  ;;  %v897_v51 = vsel %vm3203_vm8, %v895_v46, %v896_v49  ;;  %v898_v53 = vrot.slane %v896_v49, 4 }
 0x27d   :  { %911 = vst [vmem:[#allocation2 + $0x4] sm:$0xf] %v897_v51  ;;  %v918_v55 = vld [vmem:[#allocation2 + $0xc] sm:$0xf] }
 0x27e   :  { %912 = vst [vmem:[#allocation2 + $0x8] sm:$0x1] %v898_v53  ;;  %v923_v59 = vld [vmem:[#allocation2 + $0xc] sm:$0xe] }
 0x27f   :  { %v916_v54 = vld [vmem:[#allocation2] sm:$0xf] }
 0x280   :  { %v922_v62 = vld [vmem:[#allocation2] sm:$0xe] }
 0x281   :  { %v926_v37 = vld [vmem:[#allocation2] sm:$0xc] }
 0x282   :  { %v3262_v56 = vld [vmem:[#allocation2 + $0x10] sm:$0xf] }
 0x283   :  { %v3265_v57 = vcombine.low %v918_v55, %v3262_v56  ;;  %v3267_v58 = vld [vmem:[#allocation2 + $0x14] ss:$0 sps:$4 sm:$0x11]   ;;  %v3274_v5 = vcombine.low %v923_v59, %v3262_v56  ;;  %v2981_v59 = vld [vmem:[#allocation6 + $0x250] sm:$0xff]  }
 0x284   :  { %v917_v60 = vld [vmem:[#allocation2 + $0x4] sm:$0xf]  ;;  %v966_v17 = vshll.u32 %v3267_v58, 16  ;;  %v3279_v21 = vld [vmem:[#allocation2 + $0x14] ss:$0 sps:$4 sm:$0x33]  }
 0x285   :  { %v2414_v63 = vcombine.low %v916_v54, %v917_v60  ;;  %v2968_v0 = vld [vmem:[#allocation2 + $0x8] ss:$0 sps:$4 sm:$0x11]   ;;  %v2418_v1 = vcombine.low %v922_v62, %v917_v60  ;;  %v959_v2 = vshrl.u32 %v3265_v57, 16  ;;  %v961_v4 = vshll.u32 %v3265_v57, 16  ;;  %v2980_v55 = vld [vmem:[#allocation6 + $0x258] sm:$0xff]  }
 0x286   :  { %v3270_v3 = vld [vmem:[#allocation2 + $0x8] ss:$0 sps:$4 sm:$0x33]   ;;  %v954_v7 = vshll.u32 %v2968_v0, 16  ;;  %v979_v10 = vrot.slane %v2968_v0, 1  ;;  %v1010_v27 = vshrl.u32 %v3274_v5, 16  ;;  %v2422_v40 = vcombine.low %v926_v37, %v917_v60 }
 0x287   :  { %v947_v6 = vshrl.u32 %v2414_v63, 16  ;;  %v949_v52 = vshll.u32 %v2414_v63, 16  ;;  %v993_v8 = vshrl.u32 %v2418_v1, 16  ;;  %v996_v9 = vshll.u32 %v2418_v1, 16  ;;  %v2983_v60 = vld [vmem:[#allocation6 + $0x240] sm:$0xff]  }
 0x288   :  { %v1001_v13 = vshrl.u32 %v3270_v3, 16  ;;  %v1004_v12 = vshll.u32 %v3270_v3, 16  ;;  %v963_v14 = vrot.slane %v961_v4, 1  ;;  %v956_v11 = vrot.slane %v954_v7, 1  ;;  %v927_v62 = vld [vmem:[#allocation2 + $0xc] sm:$0xc] }
 0x289   :  { %v951_v15 = vrot.slane %v949_v52, 1  ;;  %v995_v16 = vrot.slane %v993_v8, 1  ;;  %v998_v18 = vrot.slane %v996_v9, 2  ;;  %v978_v24 = vrot.slane %v2418_v1, 1  ;;  %v2987_v4 = vld [vmem:[#allocation6 + $0x378] sm:$0xff]   ;;  %v2990_v52 = vld [vmem:[#allocation6 + $0x2b0] sm:$0xff]  }
 0x28a   :  { %v1003_v19 = vrot.slane %v1001_v13, 1  ;;  %v1006_v20 = vrot.slane %v1004_v12, 2  ;;  %v964_v23 = vor.u32 %v963_v14, %v959_v2  ;;  %v1013_v28 = vshll.u32 %v3274_v5, 16  ;;  %v2985_v2 = vld [vmem:[#allocation6 + $0x2f8] sm:$0xff]   ;;  %v2992_v7 = vld [vmem:[#allocation6 + $0x330] sm:$0xff]   ;;  %v2993_v8 = vld [vmem:[#allocation6 + $0x2e8] sm:$0xff]  }
 0x28b   :  { %v952_v22 = vor.u32 %v951_v15, %v947_v6  ;;  %v999_v25 = vor.u32 %v998_v18, %v995_v16  ;;  %v968_v30 = vrot.slane %v966_v17, 1  ;;  %v1018_v31 = vshrl.u32 %v3279_v21, 16  ;;  %2689 = vmatprep.subr.bf16.mxu1 %v2985_v2  ;;  %v2989_v6 = vld [vmem:[#allocation6 + $0x2f0] sm:$0xff]   ;;  %v2994_v9 = vld [vmem:[#allocation6 + $0x2a8] sm:$0xff]   ;;  %v2997_v14 = vld [vmem:[#allocation6 + $0x2e0] sm:$0xff]  }
 0x28c   :  { %v1007_v26 = vor.u32 %v1006_v20, %v1003_v19  ;;  %v1012_v34 = vrot.slane %v1010_v27, 1  ;;  %v1015_v35 = vrot.slane %v1013_v28, 2  ;;  %v1021_v36 = vshll.u32 %v3279_v21, 16  ;;  %v2995_v13 = vld [vmem:[#allocation6 + $0x368] sm:$0xff]   ;;  %v2999_v15 = vld [vmem:[#allocation6 + $0x360] sm:$0xff]   ;;  %v3001_v17 = vld [vmem:[#allocation6 + $0x2d8] sm:$0xff]  }
 0x28d   :  { %v957_v29 = vsel %vm289_vm9, %v952_v22, %v956_v11  ;;  %v969_v38 = vsel %vm289_vm9, %v964_v23, %v968_v30  ;;  %v1020_v39 = vrot.slane %v1018_v31, 1  ;;  %v980_v41 = vsel %vm322_vm11, %v978_v24, %v979_v10  ;;  %v2996_v12 = vld [vmem:[#allocation6 + $0x328] sm:$0xff]   ;;  %v2998_v11 = vld [vmem:[#allocation6 + $0x2a0] sm:$0xff]   ;;  %v3003_v18 = vld [vmem:[#allocation6 + $0x358] sm:$0xff]  }
 0x28e   :  { %1395 = vmatprep.mubr.bf16.mxu0 %v957_v29  ;;  %v1008_v33 = vsel %vm337_vm10, %v999_v25, %v1007_v26  ;;  %v1016_v42 = vor.u32 %v1015_v35, %v1012_v34  ;;  %v1023_v43 = vrot.slane %v1021_v36, 2  ;;  %v1034_v46 = vrot.slane %v2422_v40, 2  ;;  %v3000_v16 = vld [vmem:[#allocation6 + $0x320] sm:$0xff]   ;;  %v3002_v19 = vld [vmem:[#allocation6 + $0x298] sm:$0xff]   ;;  %v3007_v22 = vld [vmem:[#allocation6 + $0x350] sm:$0xff]  }
 0x28f   :  { %1396 = vmatmul.mubr.bf16.vlgmr.msra.gmra.mxu0 %v2414_v63  ;;  %1444 = vmatprep.mubr.bf16.mxu1 %v1008_v33  ;;  %v1035_v47 = vrot.slane %v3270_v3, 2  ;;  %v981_v49 = vrot.slane %v3274_v5, 1  ;;  %v982_v51 = vrot.slane %v3267_v58, 1  ;;  %v2982_v58 = vld [vmem:[#allocation6 + $0x248] sm:$0xff]   ;;  %v1038_v0 = vrot.slane %v3279_v21, 2  ;;  %v2986_v3 = vld [vmem:[#allocation6 + $0x2b8] sm:$0xff]  }
 0x290   :  { %2806 = vmatpush3.bf16.msra.mxu0 %v3249_v50  ;;  %1403 = vmatprep.mubr.bf16.mxu0 %v969_v38  ;;  %v1024_v45 = vor.u32 %v1023_v43, %v1020_v39  ;;  %v2979_v50 = vld [vmem:[#allocation6 + $0x260] sm:$0xff]   ;;  %v2988_v5 = vld [vmem:[#allocation6 + $0x338] sm:$0xff]   ;;  %v3005_v21 = vld [vmem:[#allocation6 + $0x2d0] sm:$0xff]  }
 0x291   :  { %1445 = vmatmul.mubr.bf16.vlgmr.msra.gmra.mxu1 %v980_v41  ;;  %2807 = vmatprep.subr.bf16.mxu0 %v2976_v32  ;;  %v1036_v53 = vsel %vm380_vm12, %v1034_v46, %v1035_v47  ;;  %v983_v54 = vsel %vm322_vm11, %v981_v49, %v982_v51  ;;  %v3004_v20 = vld [vmem:[#allocation6 + $0x318] sm:$0xff]   ;;  %v3006_v23 = vld [vmem:[#allocation6 + $0x290] sm:$0xff]   ;;  %v3009_v10 = vld [vmem:[#allocation6 + $0x2c8] sm:$0xff]  }
 0x292   :  { %v1025_v48 = vsel %vm337_vm10, %v1016_v42, %v1024_v45  ;;  %2690 = vmatpush3.bf16.msra.mxu1 %v2986_v3  ;;  %v3008_v24 = vld [vmem:[#allocation6 + $0x310] sm:$0xff]   ;;  %v3011_v25 = vld [vmem:[#allocation6 + $0x348] sm:$0xff]   ;;  %v3013_v28 = vld [vmem:[#allocation6 + $0x2c0] sm:$0xff]  }
 0x293   :  { %1452 = vmatprep.mubr.bf16.mxu1 %v1025_v48  ;;  %2691 = vmatprep.subr.bf16.mxu1 %v2989_v6  ;;  %v3010_v26 = vld [vmem:[#allocation6 + $0x288] sm:$0xff]   ;;  %v3015_v29 = vld [vmem:[#allocation6 + $0x340] sm:$0xff]  }
 0x294   :  { %2808 = vmatpush3.bf16.msra.mxu0 %v2976_v32  ;;  %v3012_v27 = vld [vmem:[#allocation6 + $0x308] sm:$0xff]   ;;  %v3014_v30 = vld [vmem:[#allocation6 + $0x280] sm:$0xff]   ;;  %v3300_v32 = vld [vmem:[#allocation6 + $0x3b8] sm:$0xff]  }
 0x295   :  { %2809 = vmatprep.subr.bf16.mxu0 %v2977_v44  ;;  %v3016_v31 = vld [vmem:[#allocation6 + $0x300] sm:$0xff]  }
 0x296   :  { %2692 = vmatpush3.bf16.msra.mxu1 %v2990_v52 }
 0x297   :  { %1404 = vmatmul.mubr.bf16.gmra.mxu0 %v3265_v57  ;;  %v2423_v57 = vcombine.low %v927_v62, %v3262_v56  ;;  %v2991_v56 = vld [vmem:[#allocation6 + $0x370] sm:$0xff]   ;;  %2693 = vmatprep.subr.bf16.mxu1 %v2993_v8 }
 0x298   :  { %2810 = vmatpush3.bf16.msra.mxu0 %v2977_v44  ;;  %2821 = vmatprep.mubr.bf16.mxu0 %v1036_v53 }
 0x299   :  { %1453 = vmatmul.mubr.bf16.gmra.mxu1 %v983_v54  ;;  %2811 = vmatprep.subr.bf16.mxu0 %v2979_v50  ;;  %v1037_v63 = vrot.slane %v2423_v57, 2 }
 0x29a   :  { %2694 = vmatpush3.bf16.msra.mxu1 %v2994_v9 }
 0x29b   :  { %v1039_v1 = vsel %vm380_vm12, %v1037_v63, %v1038_v0  ;;  %2695 = vmatprep.subr.bf16.mxu1 %v2997_v14  ;;  %v2465_v0 = vld [vmem:[%s3366_s3 + $0x1] ss:$0 sm:$0xff] }
 0x29c   :  { %2812 = vmatpush3.bf16.msra.mxu0 %v2979_v50 }
 0x29d   :  { %2813 = vmatprep.subr.bf16.mxu0 %v2980_v55 }
 0x29e   :  { %2696 = vmatpush3.bf16.msra.mxu1 %v2998_v11 }
 0x29f   :  { %2697 = vmatprep.subr.bf16.mxu1 %v3001_v17 }
 0x2a0   :  { %2814 = vmatpush3.bf16.msra.mxu0 %v2980_v55 }
 0x2a1   :  { %2815 = vmatprep.subr.bf16.mxu0 %v2981_v59 }
 0x2a2   :  { %2698 = vmatpush3.bf16.msra.mxu1 %v3002_v19 }
 0x2a3   :  { %2699 = vmatprep.subr.bf16.mxu1 %v3005_v21 }
 0x2a4   :  { %2816 = vmatpush3.bf16.msra.mxu0 %v2981_v59 }
 0x2a5   :  { %2817 = vmatprep.subr.bf16.mxu0 %v2982_v58 }
 0x2a6   :  { %2700 = vmatpush3.bf16.msra.mxu1 %v3006_v23 }
 0x2a7   :  { %2701 = vmatprep.subr.bf16.mxu1 %v3009_v10 }
 0x2a8   :  { %2818 = vmatpush3.bf16.msra.mxu0 %v2982_v58 }
 0x2a9   :  { %2819 = vmatprep.subr.bf16.mxu0 %v2983_v60 }
 0x2aa   :  { %2702 = vmatpush3.bf16.msra.mxu1 %v3010_v26 }
 0x2ab   :  { %2703 = vmatprep.subr.bf16.mxu1 %v3013_v28 }
 0x2ac   :  { %2820 = vmatpush3.bf16.msra.mxu0 %v2983_v60 }
 0x2ad   :  { %2717 = vmatprep.subr.bf16.mxu0 %v2987_v4 }
 0x2ae   :  { %2704 = vmatpush3.bf16.msra.mxu1 %v3014_v30 }
 0x2af   :  { %2822 = vmatmul.mubr.bf16.vlgmr.msra.gmra.mxu0 %v1039_v1  ;;  %2825 = vmatprep.subr.bf16.mxu1 %v3300_v32 }
 0x2b0   :  { %2718 = vmatpush3.bf16.msra.mxu0 %v2988_v5  ;;  %v2467_v5 = vld [vmem:[%s3367_s4 + $0x1] ss:$0 sm:$0xff] }
 0x2b1   :  { %2719 = vmatprep.subr.bf16.mxu0 %v2991_v56 }
 0x2b4   :  { %2720 = vmatpush3.bf16.msra.mxu0 %v2992_v7 }
 0x2b5   :  { %2721 = vmatprep.subr.bf16.mxu0 %v2995_v13 }
 0x2b8   :  { %2722 = vmatpush3.bf16.msra.mxu0 %v2996_v12 }
 0x2b9   :  { %2723 = vmatprep.subr.bf16.mxu0 %v2999_v15 }
 0x2bc   :  { %2724 = vmatpush3.bf16.msra.mxu0 %v3000_v16 }
 0x2bd   :  { %2725 = vmatprep.subr.bf16.mxu0 %v3003_v18 }
 0x2c0   :  { %2726 = vmatpush3.bf16.msra.mxu0 %v3004_v20 }
 0x2c1   :  { %2727 = vmatprep.subr.bf16.mxu0 %v3007_v22 }
 0x2c4   :  { %2728 = vmatpush3.bf16.msra.mxu0 %v3008_v24 }
 0x2c5   :  { %2729 = vmatprep.subr.bf16.mxu0 %v3011_v25 }
 0x2c8   :  { %2730 = vmatpush3.bf16.msra.mxu0 %v3012_v27 }
 0x2c9   :  { %2731 = vmatprep.subr.bf16.mxu0 %v3015_v29 }
 0x2cc   :  { %2732 = vmatpush3.bf16.msra.mxu0 %v3016_v31 }
 0x34f   :  { %v2639_v33 = vpop.f32.mrf.mxu0 }
 0x351   :  { %v2667_v34 = vpop.f32.mrf.mxu1  ;;  %v2640_v35 = vpop.f32.mrf.mxu0 }
 0x352   :  { %v2641_v50 = vadd.f32 %v2640_v35, %v2639_v33 }
 0x353   :  { %v2668_v36 = vpop.f32.mrf.mxu1  ;;  %v2642_v37 = vpop.f32.mrf.mxu0 }
 0x354   :  { %v2669_v53 = vadd.f32 %v2668_v36, %v2667_v34 }
 0x355   :  { %v2670_v38 = vpop.f32.mrf.mxu1  ;;  %v2643_v39 = vpop.f32.mrf.mxu0 }
 0x356   :  { %v2644_v60 = vadd.f32 %v2643_v39, %v2642_v37  ;;  %v1447_v63 = vadd.f32 %v2669_v53, %v2641_v50 }
 0x357   :  { %v2671_v40 = vpop.f32.mrf.mxu1  ;;  %v2645_v41 = vpop.f32.mrf.mxu0 }
 0x358   :  { %v2672_v62 = vadd.f32 %v2671_v40, %v2670_v38 }
 0x359   :  { %v2673_v42 = vpop.f32.mrf.mxu1  ;;  %v2646_v43 = vpop.f32.mrf.mxu0 }
 0x35a   :  { %v2647_v47 = vadd.f32 %v2646_v43, %v2645_v41  ;;  %v1450_v8 = vadd.f32 %v2672_v62, %v2644_v60 }
 0x35b   :  { %v2674_v44 = vpop.f32.mrf.mxu1  ;;  %v2648_v45 = vpop.f32.mrf.mxu0 }
 0x35c   :  { %v2675_v48 = vadd.f32 %v2674_v44, %v2673_v42 }
 0x35d   :  { %v2676_v46 = vpop.f32.mrf.mxu1  ;;  %v2649_v49 = vpop.f32.mrf.mxu0 }
 0x35e   :  { %v2650_v54 = vadd.f32 %v2649_v49, %v2648_v45  ;;  %v1455_v59 = vadd.f32 %v2675_v48, %v2647_v47 }
 0x35f   :  { %v2677_v51 = vpop.f32.mrf.mxu1 }
 0x360   :  { %v2678_v55 = vadd.f32 %v2677_v51, %v2676_v46 }
 0x362   :  { %v1458_v4 = vadd.f32 %v2678_v55, %v2650_v54 }
 0x36f   :  { %v2823_v58 = vpop.f32.mrf.mxu0 }
 0x370   :  { %v1504_v57 = vadd.f32 %v2823_v58, %v1455_v59 }
 0x371   :  { %v1495_v1 = vpop.f32.mrf.mxu0 }
 0x372   :  { %v1512_v2 = vmax.f32 %v1504_v57, 0.0  ;;  %v1496_v3 = vadd.f32 %v1495_v1, %v1447_v63 }
 0x373   :  { %v2824_v6 = vpop.f32.mrf.mxu0 }
 0x374   :  { %v1524_v52 = vmul.f32 %v2465_v0, %v1512_v2  ;;  %v1510_v56 = vmax.f32 %v1496_v3, 0.0  ;;  %v1507_v7 = vadd.f32 %v2824_v6, %v1458_v4 }
 0x375   :  { %v1498_v9 = vpop.f32.mrf.mxu0 }
 0x376   :  { %v1536_v13 = vadd.f32 %v2467_v5, %v1524_v52  ;;  %v1522_v12 = vmul.f32 %v2465_v0, %v1510_v56  ;;  %v1513_v14 = vmax.f32 %v1507_v7, 0.0  ;;  %v1499_v15 = vadd.f32 %v1498_v9, %v1450_v8 }
 0x378   :  { %v2545_v11 = vpack.c.bf16 %v1536_v13, %v1536_v13  ;;  %v1534_v16 = vadd.f32 %v2467_v5, %v1522_v12  ;;  %v1525_v17 = vmul.f32 %v2465_v0, %v1513_v14  ;;  %v1511_v18 = vmax.f32 %v1499_v15, 0.0  ;;  %v3026_v15 = vld [vmem:[#allocation6 + $0x3b0] sm:$0xff]  }
 0x37a   :  { %v1555_v19 = vrot.slane %v2545_v11, 7  ;;  %v2543_v20 = vpack.c.bf16 %v1534_v16, %v1534_v16  ;;  %v1537_v21 = vadd.f32 %v2467_v5, %v1525_v17  ;;  %v1523_v22 = vmul.f32 %v2465_v0, %v1511_v18 }
 0x37c   :  { %1569 = vst [vmem:[#allocation2 + $0xc] sm:$0xe] %v1555_v19  ;;  %v1550_v23 = vrot.slane %v2543_v20, 7  ;;  %v2546_v24 = vpack.c.bf16 %v1537_v21, %v1537_v21  ;;  %v1535_v10 = vadd.f32 %v2467_v5, %v1523_v22  ;;  %v1556_v25 = vrot.slane %v1555_v19, 4 }
 0x37e   :  { %1566 = vst [vmem:[#allocation2] sm:$0xe] %v1550_v23  ;;  %v1557_v26 = vrot.slane %v2546_v24, 7  ;;  %v2544_v27 = vpack.c.bf16 %v1535_v10, %v1535_v10  ;;  %v1551_v28 = vrot.slane %v1550_v23, 4 }
 0x380   :  { %v1558_v29 = vsel %vm3203_vm8, %v1556_v25, %v1557_v26  ;;  %v1559_v30 = vrot.slane %v1557_v26, 4  ;;  %v1552_v31 = vrot.slane %v2544_v27, 7  ;;  %v3027_v25 = vld [vmem:[#allocation6 + $0x3a8] sm:$0xff]  }
 0x381   :  { %1570 = vst [vmem:[#allocation2 + $0x10] sm:$0xf] %v1558_v29 }
 0x382   :  { %1571 = vst [vmem:[#allocation2 + $0x14] sm:$0x1] %v1559_v30  ;;  %v1553_v33 = vsel %vm3203_vm8, %v1551_v28, %v1552_v31  ;;  %v1554_v34 = vrot.slane %v1552_v31, 4 }
 0x383   :  { %1567 = vst [vmem:[#allocation2 + $0x4] sm:$0xf] %v1553_v33  ;;  %v1574_v36 = vld [vmem:[#allocation2 + $0xc] sm:$0xf] }
 0x384   :  { %1568 = vst [vmem:[#allocation2 + $0x8] sm:$0x1] %v1554_v34  ;;  %v1579_v40 = vld [vmem:[#allocation2 + $0xc] sm:$0xe] }
 0x385   :  { %v1572_v35 = vld [vmem:[#allocation2] sm:$0xf] }
 0x386   :  { %v1578_v42 = vld [vmem:[#allocation2] sm:$0xe] }
 0x387   :  { %v1582_v19 = vld [vmem:[#allocation2] sm:$0xc] }
 0x388   :  { %v3313_v37 = vld [vmem:[#allocation2 + $0x10] sm:$0xf] }
 0x389   :  { %v3316_v38 = vcombine.low %v1574_v36, %v3313_v37  ;;  %v3318_v39 = vld [vmem:[#allocation2 + $0x14] ss:$0 sps:$4 sm:$0x11]   ;;  %v3325_v48 = vcombine.low %v1579_v40, %v3313_v37  ;;  %v3031_v36 = vld [vmem:[#allocation6 + $0x390] sm:$0xff]   ;;  %v3033_v40 = vld [vmem:[#allocation6 + $0x380] sm:$0xff]  }
 0x38a   :  { %v1573_v41 = vld [vmem:[#allocation2 + $0x4] sm:$0xf]  ;;  %v1622_v63 = vshll.u32 %v3318_v39, 16  ;;  %v3330_v3 = vld [vmem:[#allocation2 + $0x14] ss:$0 sps:$4 sm:$0x33]  }
 0x38b   :  { %v2472_v43 = vcombine.low %v1572_v35, %v1573_v41  ;;  %v3018_v44 = vld [vmem:[#allocation2 + $0x8] ss:$0 sps:$4 sm:$0x11]   ;;  %v2476_v45 = vcombine.low %v1578_v42, %v1573_v41  ;;  %v1615_v61 = vshrl.u32 %v3316_v38, 16  ;;  %v1617_v47 = vshll.u32 %v3316_v38, 16  ;;  %v3030_v35 = vld [vmem:[#allocation6 + $0x398] sm:$0xff]  }
 0x38c   :  { %v3321_v46 = vld [vmem:[#allocation2 + $0x8] ss:$0 sps:$4 sm:$0x33]   ;;  %v1610_v50 = vshll.u32 %v3018_v44, 16  ;;  %v1635_v52 = vrot.slane %v3018_v44, 1  ;;  %v1666_v8 = vshrl.u32 %v3325_v48, 16  ;;  %v2480_v22 = vcombine.low %v1582_v19, %v1573_v41 }
 0x38d   :  { %v1603_v49 = vshrl.u32 %v2472_v43, 16  ;;  %v1605_v51 = vshll.u32 %v2472_v43, 16  ;;  %v1649_v53 = vshrl.u32 %v2476_v45, 16  ;;  %v1652_v54 = vshll.u32 %v2476_v45, 16  ;;  %v1583_v41 = vld [vmem:[#allocation2 + $0xc] sm:$0xc] }
 0x38e   :  { %v1657_v55 = vshrl.u32 %v3321_v46, 16  ;;  %v1660_v59 = vshll.u32 %v3321_v46, 16  ;;  %v1619_v58 = vrot.slane %v1617_v47, 1  ;;  %v1612_v62 = vrot.slane %v1610_v50, 1  ;;  %v3038_v47 = vld [vmem:[#allocation8 + $0x20] sm:$0xff]  }
 0x38f   :  { %v1607_v60 = vrot.slane %v1605_v51, 1  ;;  %v1651_v57 = vrot.slane %v1649_v53, 1  ;;  %v1654_v0 = vrot.slane %v1652_v54, 2  ;;  %v1634_v6 = vrot.slane %v2476_v45, 1  ;;  %v3035_v45 = vld [vmem:[#allocation8 + $0x38] sm:$0xff]   ;;  %v3042_v51 = vld [vmem:[#allocation8] sm:$0xff]  }
 0x390   :  { %v1659_v1 = vrot.slane %v1657_v55, 1  ;;  %v1662_v2 = vrot.slane %v1660_v59, 2  ;;  %v1620_v5 = vor.u32 %v1619_v58, %v1615_v61  ;;  %v1669_v9 = vshll.u32 %v3325_v48, 16  ;;  %v3036_v61 = vld [vmem:[#allocation8 + $0x30] sm:$0xff]   ;;  %2845 = vmatprep.subr.bf16.mxu0 %v3035_v45 }
 0x391   :  { %v1608_v4 = vor.u32 %v1607_v60, %v1603_v49  ;;  %v1655_v56 = vor.u32 %v1654_v0, %v1651_v57  ;;  %v1624_v12 = vrot.slane %v1622_v63, 1  ;;  %v1674_v14 = vshrl.u32 %v3330_v3, 16  ;;  %v3041_v49 = vld [vmem:[#allocation8 + $0x8] sm:$0xff]  }
 0x392   :  { %v1663_v7 = vor.u32 %v1662_v2, %v1659_v1  ;;  %v1668_v16 = vrot.slane %v1666_v8, 1  ;;  %v1671_v17 = vrot.slane %v1669_v9, 2  ;;  %v1677_v18 = vshll.u32 %v3330_v3, 16 }
 0x393   :  { %v1613_v13 = vsel %vm289_vm9, %v1608_v4, %v1612_v62  ;;  %v1625_v20 = vsel %vm289_vm9, %v1620_v5, %v1624_v12  ;;  %v1676_v21 = vrot.slane %v1674_v14, 1  ;;  %v1636_v23 = vsel %vm322_vm11, %v1634_v6, %v1635_v52 }
 0x394   :  { %2051 = vmatprep.mubr.bf16.mxu1 %v1613_v13  ;;  %v1664_v11 = vsel %vm337_vm10, %v1655_v56, %v1663_v7  ;;  %v1672_v24 = vor.u32 %v1671_v17, %v1668_v16  ;;  %v1679_v10 = vrot.slane %v1677_v18, 2  ;;  %v1690_v27 = vrot.slane %v2480_v22, 2 }
 0x395   :  { %2052 = vmatmul.mubr.bf16.vlgmr.msra.gmra.mxu1 %v2472_v43  ;;  %2100 = vmatprep.mubr.bf16.mxu0 %v1664_v11  ;;  %v1691_v28 = vrot.slane %v3321_v46, 2  ;;  %v1637_v30 = vrot.slane %v3325_v48, 1  ;;  %v1638_v31 = vrot.slane %v3318_v39, 1  ;;  %v3032_v39 = vld [vmem:[#allocation6 + $0x388] sm:$0xff]   ;;  %v1694_v43 = vrot.slane %v3330_v3, 2  ;;  %v3040_v48 = vld [vmem:[#allocation8 + $0x10] sm:$0xff]  }
 0x396   :  { %2826 = vmatpush3.bf16.msra.mxu1 %v3300_v32  ;;  %2059 = vmatprep.mubr.bf16.mxu1 %v1625_v20  ;;  %v1680_v26 = vor.u32 %v1679_v10, %v1676_v21  ;;  %v3029_v32 = vld [vmem:[#allocation6 + $0x3a0] sm:$0xff]   ;;  %v3037_v46 = vld [vmem:[#allocation8 + $0x28] sm:$0xff]  }
 0x397   :  { %2101 = vmatmul.mubr.bf16.vlgmr.msra.gmra.mxu0 %v1636_v23  ;;  %2827 = vmatprep.subr.bf16.mxu1 %v3026_v15  ;;  %v1692_v33 = vsel %vm380_vm12, %v1690_v27, %v1691_v28  ;;  %v1639_v34 = vsel %vm322_vm11, %v1637_v30, %v1638_v31 }
 0x398   :  { %v1681_v29 = vsel %vm337_vm10, %v1672_v24, %v1680_v26  ;;  %2846 = vmatpush3.bf16.msra.mxu0 %v3035_v45 }
 0x399   :  { %2108 = vmatprep.mubr.bf16.mxu0 %v1681_v29  ;;  %2847 = vmatprep.subr.bf16.mxu0 %v3036_v61 }
 0x39a   :  { %2828 = vmatpush3.bf16.msra.mxu1 %v3026_v15 }
 0x39b   :  { %2829 = vmatprep.subr.bf16.mxu1 %v3027_v25 }
 0x39c   :  { %2848 = vmatpush3.bf16.msra.mxu0 %v3036_v61 }
 0x39d   :  { %2060 = vmatmul.mubr.bf16.gmra.mxu1 %v3316_v38  ;;  %v2481_v38 = vcombine.low %v1583_v41, %v3313_v37  ;;  %2849 = vmatprep.subr.bf16.mxu0 %v3037_v46  ;;  %v3039_v37 = vld [vmem:[#allocation8 + $0x18] sm:$0xff]  }
 0x39e   :  { %2830 = vmatpush3.bf16.msra.mxu1 %v3027_v25  ;;  %2841 = vmatprep.mubr.bf16.mxu1 %v1692_v33  ;;  %v2523_v25 = vld [vmem:[%s3366_s3 + $0x2] ss:$0 sm:$0xff] }
 0x39f   :  { %2109 = vmatmul.mubr.bf16.gmra.mxu0 %v1639_v34  ;;  %2831 = vmatprep.subr.bf16.mxu1 %v3029_v32  ;;  %v1693_v42 = vrot.slane %v2481_v38, 2  ;;  %v2526_v38 = vld [vmem:[%s3369_s6] ss:$0 sm:$0xff] }
 0x3a0   :  { %2850 = vmatpush3.bf16.msra.mxu0 %v3037_v46 }
 0x3a1   :  { %v1695_v44 = vsel %vm380_vm12, %v1693_v42, %v1694_v43  ;;  %2851 = vmatprep.subr.bf16.mxu0 %v3038_v47 }
 0x3a2   :  { %2832 = vmatpush3.bf16.msra.mxu1 %v3029_v32  ;;  %v2525_v32 = vld [vmem:[%s3367_s4 + $0x2] ss:$0 sm:$0xff]  ;;  %s3136_s4 = smov [#allocation9]  }
 0x3a3   :  { %2833 = vmatprep.subr.bf16.mxu1 %v3030_v35  ;;  %s2325_s12 = sshll.u32 %s3136_s4, 4  ;;  %s2326_s12 = int_to_ptr.vmem [resolvable:$true] %s2325_s12 }
 0x3a4   :  { %2852 = vmatpush3.bf16.msra.mxu0 %v3038_v47  ;;  %s3103_s13 = scalar_lea.vmem %s2326_s12, 512  ;;  %p3108_p2 = scmp.lt.s32.totalorder %s2326_s12, %s2326_s12 }
 0x3a5   :  { %2853 = vmatprep.subr.bf16.mxu0 %v3039_v37  ;;  %p3104_p1 = scmp.ne.s32.totalorder %s2326_s12, %s3103_s13  ;;  %p3109_p3 = scmp.lt.s32.totalorder %s3103_s13, %s3103_s13 }
 0x3a6   :  { %2834 = vmatpush3.bf16.msra.mxu1 %v3030_v35 }
 0x3a7   :  { %2835 = vmatprep.subr.bf16.mxu1 %v3031_v36  ;;  %p3110_p4 = por %p3109_p3, %p3108_p2 }
 0x3a8   :  { %2854 = vmatpush3.bf16.msra.mxu0 %v3039_v37 }
 0x3a9   :  { %2855 = vmatprep.subr.bf16.mxu0 %v3040_v48  ;;  %p3111_p5 = pnand %p3110_p4, %p3104_p1 }
 0x3aa   :  { %2836 = vmatpush3.bf16.msra.mxu1 %v3031_v36 }
 0x3ab   :  { %2837 = vmatprep.subr.bf16.mxu1 %v3032_v39 }
 0x3ac   :  { %2856 = vmatpush3.bf16.msra.mxu0 %v3040_v48 }
 0x3ad   :  { %2857 = vmatprep.subr.bf16.mxu0 %v3041_v49 }
 0x3ae   :  { %2838 = vmatpush3.bf16.msra.mxu1 %v3032_v39 }
 0x3af   :  { %2839 = vmatprep.subr.bf16.mxu1 %v3033_v40 }
 0x3b0   :  { %2858 = vmatpush3.bf16.msra.mxu0 %v3041_v49 }
 0x3b1   :  { %2859 = vmatprep.subr.bf16.mxu0 %v3042_v51 }
 0x3b2   :  { %2840 = vmatpush3.bf16.msra.mxu1 %v3033_v40 }
 0x3b4   :  { %2860 = vmatpush3.bf16.msra.mxu0 %v3042_v51 }
 0x3b5   :  { %2842 = vmatmul.mubr.bf16.vlgmr.msra.gmra.mxu1 %v1695_v44 }
 0x455   :  { %v2705_v50 = vpop.f32.mrf.mxu1 }
 0x457   :  { %v2733_v53 = vpop.f32.mrf.mxu0  ;;  %v2706_v54 = vpop.f32.mrf.mxu1 }
 0x458   :  { %v2707_v56 = vadd.f32 %v2706_v54, %v2705_v50 }
 0x459   :  { %v2734_v55 = vpop.f32.mrf.mxu0  ;;  %v2708_v59 = vpop.f32.mrf.mxu1 }
 0x45a   :  { %v2735_v7 = vadd.f32 %v2734_v55, %v2733_v53 }
 0x45b   :  { %v2736_v58 = vpop.f32.mrf.mxu0  ;;  %v2709_v60 = vpop.f32.mrf.mxu1 }
 0x45c   :  { %v2710_v14 = vadd.f32 %v2709_v60, %v2708_v59  ;;  %v2103_v11 = vadd.f32 %v2735_v7, %v2707_v56 }
 0x45d   :  { %v2737_v62 = vpop.f32.mrf.mxu0  ;;  %v2711_v57 = vpop.f32.mrf.mxu1 }
 0x45e   :  { %v2738_v15 = vadd.f32 %v2737_v62, %v2736_v58 }
 0x45f   :  { %v2739_v63 = vpop.f32.mrf.mxu0  ;;  %v2712_v0 = vpop.f32.mrf.mxu1 }
 0x460   :  { %v2713_v4 = vadd.f32 %v2712_v0, %v2711_v57  ;;  %v2106_v23 = vadd.f32 %v2738_v15, %v2710_v14 }
 0x461   :  { %v2740_v1 = vpop.f32.mrf.mxu0  ;;  %v2714_v2 = vpop.f32.mrf.mxu1 }
 0x462   :  { %v2741_v5 = vadd.f32 %v2740_v1, %v2739_v63 }
 0x463   :  { %v2742_v3 = vpop.f32.mrf.mxu0  ;;  %v2715_v6 = vpop.f32.mrf.mxu1 }
 0x464   :  { %v2716_v8 = vadd.f32 %v2715_v6, %v2714_v2  ;;  %v2111_v13 = vadd.f32 %v2741_v5, %v2713_v4 }
 0x465   :  { %v2743_v52 = vpop.f32.mrf.mxu0 }
 0x466   :  { %v2744_v9 = vadd.f32 %v2743_v52, %v2742_v3 }
 0x468   :  { %v2114_v19 = vadd.f32 %v2744_v9, %v2716_v8 }
 0x475   :  { %v2843_v12 = vpop.f32.mrf.mxu1 }
 0x476   :  { %v2160_v16 = vadd.f32 %v2843_v12, %v2111_v13 }
 0x477   :  { %v2151_v17 = vpop.f32.mrf.mxu1 }
 0x478   :  { %v2152_v18 = vadd.f32 %v2151_v17, %v2103_v11  ;;  %v2168_v24 = vmax.f32 %v2160_v16, 0.0 }
 0x479   :  { %v2844_v20 = vpop.f32.mrf.mxu1 }
 0x47a   :  { %v2166_v21 = vmax.f32 %v2152_v18, 0.0  ;;  %v2163_v22 = vadd.f32 %v2844_v20, %v2114_v19  ;;  %v2180_v31 = vmul.f32 %v2523_v25, %v2168_v24 }
 0x47b   :  { %v2154_v10 = vpop.f32.mrf.mxu1 }
 0x47c   :  { %v2169_v26 = vmax.f32 %v2163_v22, 0.0  ;;  %v2155_v27 = vadd.f32 %v2154_v10, %v2106_v23  ;;  %v2178_v28 = vmul.f32 %v2523_v25, %v2166_v21  ;;  %v2192_v39 = vadd.f32 %v2525_v32, %v2180_v31 }
 0x47e   :  { %v2181_v29 = vmul.f32 %v2523_v25, %v2169_v26  ;;  %v2167_v30 = vmax.f32 %v2155_v27, 0.0  ;;  %v2190_v35 = vadd.f32 %v2525_v32, %v2178_v28 }
 0x480   :  { %v2179_v33 = vmul.f32 %v2523_v25, %v2167_v30  ;;  %v2193_v34 = vadd.f32 %v2525_v32, %v2181_v29 }
 0x482   :  { %v2191_v36 = vadd.f32 %v2525_v32, %v2179_v33  ;;  %v2195_v41 = vpack.c.bf16 %v2193_v34, %v2192_v39 }
 0x484   :  { %v2194_v40 = vpack.c.bf16 %v2191_v36, %v2190_v35 }
 0x486   :  { %2861 = vmatprep.mubr.bf16.mxu0 %v2194_v40 }
 0x487   :  { %2862 = vmatmul.mubr.bf16.vlgmr.msra.gmra.mxu0 %v2195_v41 }
 0x547   :  { %v2863_v42 = vpop.f32.mrf.mxu0 }
 0x548   :  { %v2310_v43 = vadd.f32 %v2863_v42, %v2526_v38 }
 0x549   :  { %v2301_v44 = vpop.f32.mrf.mxu0 }
 0x54a   :  { %2318 = vst [vmem:[#allocation9 + $0x10] sm:$0xff] %v2310_v43  ;;  %v2302_v45 = vadd.f32 %v2526_v38, %v2301_v44 }
 0x54b   :  { %v2864_v61 = vpop.f32.mrf.mxu0 }
 0x54c   :  { %2316 = vst [vmem:[#allocation9] sm:$0xff] %v2302_v45  ;;  %v2313_v46 = vadd.f32 %v2864_v61, %v2526_v38 }
 0x54d   :  { %v2304_v47 = vpop.f32.mrf.mxu0 }
 0x54e   :  { %2319 = vst [vmem:[#allocation9 + $0x18] sm:$0xff] %v2313_v46  ;;  %v2305_v37 = vadd.f32 %v2526_v38, %v2304_v47 }
 0x550   :  { %2317 = vst [vmem:[#allocation9 + $0x8] sm:$0xff] %v2305_v37 }
 0x551   :  { %3114 = shalt.err (!%p3111_p5)
}
 0x552   :  { %s3137_s6 = smov 128   ;;  %s3138_s14 = smov 8  }
 0x553   :  { %2331 = dma.vmem_to_hbm [thread:$0]  %s2326_s12, 512, %s3370_s7, [#allocation5], %s3137_s6, %s3137_s6, %s3138_s14  }
 0x554   :  { %3127 = dma.done.wait [#allocation5], 512  }
 0x555   :  { %3128 = vsyncadd [#allocation5], 4294966784 }
 0x556   :  { %2335 = vsyncpa [#allocation4], 1 }
 0x557   :  { %2336 = vsyncpa [#allocation7], 1 }
 0x558   :  { %2337 = vsyncpa [#allocation5], 1 }

// kernel: tpu_custom_call.1
= control target key start
LH: loop header
LB: loop body
LE: loop exit
PB: predicated region body
PF: predicated region fallthrough
CT: control target
= control target key end

     0   :  { %12 = vsyncpa [#allocation4], 0  ;;  %s3363_s0 = inlined_call_operand.vmem [shape: s32[32,1], index: 0, kind: input, shape index: {}]   ;;  %s3364_s1 = inlined_call_operand.hbm [shape: bf16[128,128], index: 1, kind: input, shape index: {}]   ;;  %s3365_s2 = inlined_call_operand.hbm [shape: bf16[3,640,128], index: 2, kind: input, shape index: {}]   ;;  %s3366_s3 = inlined_call_operand.vmem [shape: f32[3,1,128], index: 3, kind: input, shape index: {}]   ;;  %s3367_s4 = inlined_call_operand.vmem [shape: f32[3,1,128], index: 4, kind: input, shape index: {}]   ;;  %s3368_s5 = inlined_call_operand.hbm [shape: bf16[128,128], index: 5, kind: input, shape index: {}]   ;;  %s3369_s6 = inlined_call_operand.vmem [shape: f32[1,128], index: 6, kind: input, shape index: {}]   ;;  %s3370_s7 = inlined_call_operand.hbm [shape: f32[2,16,128], index: 7, kind: output, shape index: {}]  }
   0x1   :  { %13 = vsyncpa [#allocation7], 0 }
   0x2   :  { %14 = vsyncpa [#allocation5], 0  ;;  %s3129_s24 = smov [#allocation6]   ;;  %s3130_s26 = smov [#allocation3]  }
   0x3   :  { %s34_s25 = sshll.u32 %s3129_s24, 4  ;;  %s22_s27 = sshll.u32 %s3130_s26, 4  ;;  %s35_s25 = int_to_ptr.vmem [resolvable:$true] %s34_s25  ;;  %s23_s27 = int_to_ptr.vmem [resolvable:$true] %s22_s27 }
   0x4   :  { %s3051_s28 = scalar_lea.vmem %s35_s25, 15360  ;;  %p3056_p1 = scmp.lt.s32.totalorder %s35_s25, %s35_s25 }
   0x5   :  { %p3052_p0 = scmp.ne.s32.totalorder %s35_s25, %s3051_s28  ;;  %p3057_p2 = scmp.lt.s32.totalorder %s3051_s28, %s3051_s28 }
   0x7   :  { %p3058_p3 = por %p3057_p2, %p3056_p1 }
   0x9   :  { %p3059_p4 = pnand %p3058_p3, %p3052_p0 }
   0xb   :  { %3062 = shalt.err (!%p3059_p4)
}
   0xc   :  { %s3131_s29 = smov 64   ;;  %s3132_s30 = smov 4  }
   0xd   :  { %40 = dma.hbm_to_vmem [thread:$0]  %s3365_s2, 15360, %s35_s25, [#allocation7], %s3131_s29, %s3131_s29, %s3132_s30  }
   0xe   :  { %s3071_s10 = scalar_lea.vmem %s23_s27, 1024  ;;  %p3076_p6 = scmp.lt.s32.totalorder %s23_s27, %s23_s27 }
   0xf   :  { %p3072_p5 = scmp.ne.s32.totalorder %s23_s27, %s3071_s10  ;;  %p3077_p7 = scmp.lt.s32.totalorder %s3071_s10, %s3071_s10 }
  0x11   :  { %p3078_p8 = por %p3077_p7, %p3076_p6 }
  0x13   :  { %p3079_p9 = pnand %p3078_p8, %p3072_p5 }
  0x15   :  { %3082 = shalt.err (!%p3079_p9)
}
  0x16   :  { %28 = dma.hbm_to_vmem [thread:$0]  %s3364_s1, 1024, %s23_s27, [#allocation4], %s3131_s29, %s3131_s29, %s3132_s30  }
  0x17   :  { %s3133_s13 = smov [#allocation8]  }
  0x18   :  { %s50_s14 = sshll.u32 %s3133_s13, 4  ;;  %s51_s14 = int_to_ptr.vmem [resolvable:$true] %s50_s14 }
  0x19   :  { %s3091_s15 = scalar_lea.vmem %s51_s14, 1024  ;;  %p3096_p11 = scmp.lt.s32.totalorder %s51_s14, %s51_s14 }
  0x1a   :  { %p3092_p10 = scmp.ne.s32.totalorder %s51_s14, %s3091_s15  ;;  %p3097_p12 = scmp.lt.s32.totalorder %s3091_s15, %s3091_s15 }
  0x1c   :  { %p3098_p13 = por %p3097_p12, %p3096_p11 }
  0x1e   :  { %p3099_p0 = pnand %p3098_p13, %p3092_p10 }
  0x20   :  { %3102 = shalt.err (!%p3099_p0)
}
  0x21   :  { %56 = dma.hbm_to_vmem [thread:$0]  %s3368_s5, 1024, %s51_s14, [#allocation7], %s3131_s29, %s3131_s29, %s3132_s30  }
  0x22   :  { %3123 = dma.done.wait [#allocation4], 1024  }
  0x23   :  { %3124 = vsyncadd [#allocation4], 4294966272 }
  0x24   :  { %3125 = dma.done.wait [#allocation7], 16384  }
  0x25   :  { %3126 = vsyncadd [#allocation7], 4294950912  ;;  %v3134_v0 = vmov 0   ;;  %v79_v1 = vld [vmem:[%s3363_s0 + $0x10] sm:$0xff]  ;;  %v77_v2 = vld [vmem:[%s3363_s0] sm:$0xff]  ;;  %v81_v16 = vlaneseq  ;;  %vm234_vm6 = vcmask 1040384  }
  0x26   :  { %2876 = vset.pattern.permute.xlu1 %v3134_v0  ;;  %73 = vst [vmem:[#allocation2] sm:$0x1] %v3134_v0  ;;  %74 = vst [vmem:[#allocation2 + $0xc] sm:$0x1] %v3134_v0  ;;  %2875 = vset.pattern.permute.xlu0 %v3134_v0  ;;  %v80_v3 = vld [vmem:[%s3363_s0 + $0x18] sm:$0xff]  ;;  %v78_v4 = vld [vmem:[%s3363_s0 + $0x8] sm:$0xff] }
  0x27   :  { %90 = vperm.xlu1 %2876, %v79_v1   ;;  %84 = vperm.xlu0 %2875, %v77_v2   ;;  %v2877_v5 = vld [vmem:[#allocation3 + $0x38] sm:$0xff]   ;;  %v2878_v6 = vld [vmem:[#allocation3 + $0x30] sm:$0xff]   ;;  %v2879_v7 = vld [vmem:[#allocation3 + $0x28] sm:$0xff]   ;;  %v82_v19 = vand.u32 127, %v81_v16  ;;  %v3135_v22 = vmov 1.0|1.0  }
  0x28   :  { %2765 = vmatprep.subr.bf16.mxu0 %v2877_v5  ;;  %v2880_v8 = vld [vmem:[#allocation3 + $0x20] sm:$0xff]   ;;  %v2885_v9 = vld [vmem:[#allocation6 + $0x78] sm:$0xff]   ;;  %v2882_v12 = vld [vmem:[#allocation3 + $0x10] sm:$0xff]   ;;  %vm235_vm7 = vcmask 1044484   ;;  %vm289_vm9 = vsmask.f32 7424 }
  0x29   :  { %2766 = vmatpush3.bf16.msra.mxu0 %v2877_v5  ;;  %2557 = vmatprep.subr.bf16.mxu1 %v2885_v9  ;;  %v2886_v10 = vld [vmem:[#allocation6 + $0x38] sm:$0xff]   ;;  %v2883_v13 = vld [vmem:[#allocation3 + $0x8] sm:$0xff]   ;;  %v2884_v14 = vld [vmem:[#allocation3] sm:$0xff]   ;;  %vm337_vm10 = vsmask.f32 6400  ;;  %vm322_vm11 = vcmask 1046528  }
  0x2a   :  { %2767 = vmatprep.subr.bf16.mxu0 %v2878_v6  ;;  %v2881_v11 = vld [vmem:[#allocation3 + $0x18] sm:$0xff]   ;;  %2558 = vmatpush3.bf16.msra.mxu1 %v2886_v10  ;;  %v2889_v24 = vld [vmem:[#allocation6 + $0x70] sm:$0xff]   ;;  %v2893_v28 = vld [vmem:[#allocation6 + $0x68] sm:$0xff]   ;;  %vm380_vm12 = vcmask 1045504  }
  0x2b   :  { %93 = vperm.xlu1 %2876, %v80_v3   ;;  %87 = vperm.xlu0 %2875, %v78_v4   ;;  %v2887_v15 = vld [vmem:[#allocation6 + $0xf8] sm:$0xff]   ;;  %v2890_v25 = vld [vmem:[#allocation6 + $0x30] sm:$0xff]   ;;  %v2894_v29 = vld [vmem:[#allocation6 + $0x28] sm:$0xff]  }
  0x2c   :  { %v2888_v23 = vld [vmem:[#allocation6 + $0xb8] sm:$0xff]   ;;  %v2891_v26 = vld [vmem:[#allocation6 + $0xf0] sm:$0xff]   ;;  %2559 = vmatprep.subr.bf16.mxu1 %v2889_v24  ;;  %v2895_v30 = vld [vmem:[#allocation6 + $0xe8] sm:$0xff]  }
  0x2d   :  { %2768 = vmatpush3.bf16.msra.mxu0 %v2878_v6  ;;  %v2892_v27 = vld [vmem:[#allocation6 + $0xb0] sm:$0xff]   ;;  %v2896_v31 = vld [vmem:[#allocation6 + $0xa8] sm:$0xff]   ;;  %v2897_v32 = vld [vmem:[#allocation6 + $0x60] sm:$0xff]  }
  0x2e   :  { %2769 = vmatprep.subr.bf16.mxu0 %v2879_v7  ;;  %2560 = vmatpush3.bf16.msra.mxu1 %v2890_v25  ;;  %v2898_v33 = vld [vmem:[#allocation6 + $0x20] sm:$0xff]   ;;  %v2901_v36 = vld [vmem:[#allocation6 + $0x58] sm:$0xff]   ;;  %v2905_v40 = vld [vmem:[#allocation6 + $0x50] sm:$0xff]  }
  0x2f   :  { %2561 = vmatprep.subr.bf16.mxu1 %v2893_v28  ;;  %v2899_v34 = vld [vmem:[#allocation6 + $0xe0] sm:$0xff]   ;;  %v2902_v37 = vld [vmem:[#allocation6 + $0x18] sm:$0xff]   ;;  %v2906_v41 = vld [vmem:[#allocation6 + $0x10] sm:$0xff]  }
  0x30   :  { %v2900_v35 = vld [vmem:[#allocation6 + $0xa0] sm:$0xff]   ;;  %v2903_v38 = vld [vmem:[#allocation6 + $0xd8] sm:$0xff]   ;;  %v2907_v42 = vld [vmem:[#allocation6 + $0xd0] sm:$0xff]  }
  0x31   :  { %2770 = vmatpush3.bf16.msra.mxu0 %v2879_v7  ;;  %v2904_v39 = vld [vmem:[#allocation6 + $0x98] sm:$0xff]   ;;  %v2908_v43 = vld [vmem:[#allocation6 + $0x90] sm:$0xff]   ;;  %v2909_v44 = vld [vmem:[#allocation6 + $0x48] sm:$0xff]  }
  0x32   :  { %2771 = vmatprep.subr.bf16.mxu0 %v2880_v8  ;;  %2562 = vmatpush3.bf16.msra.mxu1 %v2894_v29  ;;  %v2911_v45 = vld [vmem:[#allocation6 + $0xc8] sm:$0xff]   ;;  %v2913_v48 = vld [vmem:[#allocation6 + $0x40] sm:$0xff]   ;;  %v3200_v52 = vld [vmem:[#allocation6 + $0x138] sm:$0xff]  }
  0x33   :  { %2563 = vmatprep.subr.bf16.mxu1 %v2897_v32  ;;  %v2910_v46 = vld [vmem:[#allocation6 + $0x8] sm:$0xff]   ;;  %v2915_v49 = vld [vmem:[#allocation6 + $0xc0] sm:$0xff]   ;;  %vm3203_vm8 = vmor %vm234_vm6, %vm235_vm7 }
  0x34   :  { %v2912_v47 = vld [vmem:[#allocation6 + $0x88] sm:$0xff]   ;;  %v2914_v50 = vld [vmem:[#allocation6] sm:$0xff]  }
  0x35   :  { %2772 = vmatpush3.bf16.msra.mxu0 %v2880_v8  ;;  %v2916_v51 = vld [vmem:[#allocation6 + $0x80] sm:$0xff]  }
  0x36   :  { %2773 = vmatprep.subr.bf16.mxu0 %v2881_v11  ;;  %2564 = vmatpush3.bf16.msra.mxu1 %v2898_v33 }
  0x37   :  { %2565 = vmatprep.subr.bf16.mxu1 %v2901_v36 }
  0x39   :  { %2774 = vmatpush3.bf16.msra.mxu0 %v2881_v11 }
  0x3a   :  { %2775 = vmatprep.subr.bf16.mxu0 %v2882_v12  ;;  %2566 = vmatpush3.bf16.msra.mxu1 %v2902_v37 }
  0x3b   :  { %2567 = vmatprep.subr.bf16.mxu1 %v2905_v40 }
  0x3d   :  { %2776 = vmatpush3.bf16.msra.mxu0 %v2882_v12 }
  0x3e   :  { %2777 = vmatprep.subr.bf16.mxu0 %v2883_v13  ;;  %2568 = vmatpush3.bf16.msra.mxu1 %v2906_v41 }
  0x3f   :  { %2569 = vmatprep.subr.bf16.mxu1 %v2909_v44 }
  0x41   :  { %2778 = vmatpush3.bf16.msra.mxu0 %v2883_v13 }
  0x42   :  { %2779 = vmatprep.subr.bf16.mxu0 %v2884_v14  ;;  %2570 = vmatpush3.bf16.msra.mxu1 %v2910_v46 }
  0x43   :  { %2571 = vmatprep.subr.bf16.mxu1 %v2913_v48 }
  0x45   :  { %2780 = vmatpush3.bf16.msra.mxu0 %v2884_v14 }
  0x46   :  { %2585 = vmatprep.subr.bf16.mxu0 %v2887_v15  ;;  %2572 = vmatpush3.bf16.msra.mxu1 %v2914_v50  ;;  %v2926_v50 = vld [vmem:[#allocation6 + $0x130] sm:$0xff]  }
  0x47   :  { %2785 = vmatprep.subr.bf16.mxu1 %v3200_v52 }
  0xa2   :  { %v91_v17 = vpop.permute.xlu1 %90  ;;  %v85_v18 = vpop.permute.xlu0 %84 }
  0xa3   :  { %vm97_vm0 = vcmp.eq.s32.totalorder %v82_v19, %v91_v17  ;;  %vm95_vm3 = vcmp.eq.s32.totalorder %v82_v19, %v85_v18 }
  0xa6   :  { %v94_v20 = vpop.permute.xlu1 %93  ;;  %v88_v21 = vpop.permute.xlu0 %87 }
  0xa7   :  { %vm98_vm1 = vcmp.eq.s32.totalorder %v82_v19, %v94_v20  ;;  %vm96_vm2 = vcmp.eq.s32.totalorder %v82_v19, %v88_v21 }
  0xa8   :  { %vm2352_vm4 = vmpackc.low %vm98_vm1, %vm97_vm0 }
  0xa9   :  { %vm2350_vm5 = vmpackc.low %vm96_vm2, %vm95_vm3 }
  0xaa   :  { %2781 = vmatprep.mubr.msk.bf16.mxu0 %vm2350_vm5, %v3135_v22 }
  0xab   :  { %2782 = vmatmul.mubr.msk.bf16.vlgmr.msra.gmra.mxu0 %vm2352_vm4, %v3135_v22 }
  0xac   :  { %2586 = vmatpush3.bf16.msra.mxu0 %v2888_v23 }
  0xad   :  { %2587 = vmatprep.subr.bf16.mxu0 %v2891_v26 }
  0xb0   :  { %2588 = vmatpush3.bf16.msra.mxu0 %v2892_v27 }
  0xb1   :  { %2589 = vmatprep.subr.bf16.mxu0 %v2895_v30 }
  0xb4   :  { %2590 = vmatpush3.bf16.msra.mxu0 %v2896_v31 }
  0xb5   :  { %2591 = vmatprep.subr.bf16.mxu0 %v2899_v34 }
  0xb8   :  { %2592 = vmatpush3.bf16.msra.mxu0 %v2900_v35 }
  0xb9   :  { %2593 = vmatprep.subr.bf16.mxu0 %v2903_v38 }
  0xbc   :  { %2594 = vmatpush3.bf16.msra.mxu0 %v2904_v39 }
  0xbd   :  { %2595 = vmatprep.subr.bf16.mxu0 %v2907_v42 }
  0xc0   :  { %2596 = vmatpush3.bf16.msra.mxu0 %v2908_v43 }
  0xc1   :  { %2597 = vmatprep.subr.bf16.mxu0 %v2911_v45 }
  0xc4   :  { %2598 = vmatpush3.bf16.msra.mxu0 %v2912_v47 }
  0xc5   :  { %2599 = vmatprep.subr.bf16.mxu0 %v2915_v49 }
  0xc8   :  { %2600 = vmatpush3.bf16.msra.mxu0 %v2916_v51 }
 0x16b   :  { %v2783_v53 = vpop.f32.mrf.mxu0 }
 0x16c   :  { %v2537_v54 = vpack.c.bf16 %v2783_v53, %v2783_v53 }
 0x16d   :  { %v207_v55 = vpop.f32.mrf.mxu0 }
 0x16e   :  { %v242_v56 = vrot.slane %v2537_v54, 7  ;;  %v2535_v57 = vpack.c.bf16 %v207_v55, %v207_v55 }
 0x16f   :  { %v2784_v58 = vpop.f32.mrf.mxu0 }
 0x170   :  { %256 = vst [vmem:[#allocation2 + $0xc] sm:$0xe] %v242_v56  ;;  %v237_v59 = vrot.slane %v2535_v57, 7  ;;  %v2538_v60 = vpack.c.bf16 %v2784_v58, %v2784_v58  ;;  %v243_v63 = vrot.slane %v242_v56, 4 }
 0x171   :  { %v210_v62 = vpop.f32.mrf.mxu0 }
 0x172   :  { %253 = vst [vmem:[#allocation2] sm:$0xe] %v237_v59  ;;  %v244_v0 = vrot.slane %v2538_v60, 7  ;;  %v2536_v1 = vpack.c.bf16 %v210_v62, %v210_v62  ;;  %v238_v2 = vrot.slane %v237_v59, 4 }
 0x174   :  { %v245_v3 = vsel %vm3203_vm8, %v243_v63, %v244_v0  ;;  %v246_v4 = vrot.slane %v244_v0, 4  ;;  %v239_v5 = vrot.slane %v2536_v1, 7  ;;  %v2927_v0 = vld [vmem:[#allocation6 + $0x128] sm:$0xff]  }
 0x175   :  { %257 = vst [vmem:[#allocation2 + $0x10] sm:$0xf] %v245_v3 }
 0x176   :  { %258 = vst [vmem:[#allocation2 + $0x14] sm:$0x1] %v246_v4  ;;  %v240_v6 = vsel %vm3203_vm8, %v238_v2, %v239_v5  ;;  %v241_v7 = vrot.slane %v239_v5, 4 }
 0x177   :  { %254 = vst [vmem:[#allocation2 + $0x4] sm:$0xf] %v240_v6  ;;  %v261_v9 = vld [vmem:[#allocation2 + $0xc] sm:$0xf] }
 0x178   :  { %255 = vst [vmem:[#allocation2 + $0x8] sm:$0x1] %v241_v7  ;;  %v266_v13 = vld [vmem:[#allocation2 + $0xc] sm:$0xe] }
 0x179   :  { %v259_v8 = vld [vmem:[#allocation2] sm:$0xf] }
 0x17a   :  { %v265_v15 = vld [vmem:[#allocation2] sm:$0xe] }
 0x17b   :  { %v269_v56 = vld [vmem:[#allocation2] sm:$0xc] }
 0x17c   :  { %v3211_v10 = vld [vmem:[#allocation2 + $0x10] sm:$0xf] }
 0x17d   :  { %v3214_v11 = vcombine.low %v261_v9, %v3211_v10  ;;  %v3216_v12 = vld [vmem:[#allocation2 + $0x14] ss:$0 sps:$4 sm:$0x11]   ;;  %v3223_v22 = vcombine.low %v266_v13, %v3211_v10  ;;  %v2931_v13 = vld [vmem:[#allocation6 + $0x110] sm:$0xff]  }
 0x17e   :  { %v260_v14 = vld [vmem:[#allocation2 + $0x4] sm:$0xf]  ;;  %v310_v34 = vshll.u32 %v3216_v12, 16  ;;  %v3228_v38 = vld [vmem:[#allocation2 + $0x14] ss:$0 sps:$4 sm:$0x33]  }
 0x17f   :  { %v2358_v16 = vcombine.low %v259_v8, %v260_v14  ;;  %v2918_v17 = vld [vmem:[#allocation2 + $0x8] ss:$0 sps:$4 sm:$0x11]   ;;  %v2362_v18 = vcombine.low %v265_v15, %v260_v14  ;;  %v303_v19 = vshrl.u32 %v3214_v11, 16  ;;  %v305_v21 = vshll.u32 %v3214_v11, 16  ;;  %v2930_v9 = vld [vmem:[#allocation6 + $0x118] sm:$0xff]  }
 0x180   :  { %v3219_v20 = vld [vmem:[#allocation2 + $0x8] ss:$0 sps:$4 sm:$0x33]   ;;  %v298_v25 = vshll.u32 %v2918_v17, 16  ;;  %v324_v42 = vrot.slane %v2918_v17, 1  ;;  %v356_v45 = vshrl.u32 %v3223_v22, 16  ;;  %v2366_v59 = vcombine.low %v269_v56, %v260_v14 }
 0x181   :  { %v291_v23 = vshrl.u32 %v2358_v16, 16  ;;  %v293_v24 = vshll.u32 %v2358_v16, 16  ;;  %v339_v26 = vshrl.u32 %v2362_v18, 16  ;;  %v342_v27 = vshll.u32 %v2362_v18, 16  ;;  %v2933_v14 = vld [vmem:[#allocation6 + $0x100] sm:$0xff]  }
 0x182   :  { %v347_v28 = vshrl.u32 %v3219_v20, 16  ;;  %v350_v29 = vshll.u32 %v3219_v20, 16  ;;  %v307_v30 = vrot.slane %v305_v21, 1  ;;  %v300_v32 = vrot.slane %v298_v25, 1  ;;  %v270_v15 = vld [vmem:[#allocation2 + $0xc] sm:$0xc] }
 0x183   :  { %v295_v31 = vrot.slane %v293_v24, 1  ;;  %v341_v33 = vrot.slane %v339_v26, 1  ;;  %v344_v35 = vrot.slane %v342_v27, 2  ;;  %v323_v41 = vrot.slane %v2362_v18, 1  ;;  %v2937_v21 = vld [vmem:[#allocation6 + $0x238] sm:$0xff]   ;;  %v2940_v24 = vld [vmem:[#allocation6 + $0x170] sm:$0xff]  }
 0x184   :  { %v349_v36 = vrot.slane %v347_v28, 1  ;;  %v352_v37 = vrot.slane %v350_v29, 2  ;;  %v308_v40 = vor.u32 %v307_v30, %v303_v19  ;;  %v359_v46 = vshll.u32 %v3223_v22, 16  ;;  %v2935_v19 = vld [vmem:[#allocation6 + $0x1b8] sm:$0xff]   ;;  %v2942_v25 = vld [vmem:[#allocation6 + $0x1f0] sm:$0xff]   ;;  %v2943_v26 = vld [vmem:[#allocation6 + $0x1a8] sm:$0xff]  }
 0x185   :  { %v296_v39 = vor.u32 %v295_v31, %v291_v23  ;;  %v345_v43 = vor.u32 %v344_v35, %v341_v33  ;;  %v312_v48 = vrot.slane %v310_v34, 1  ;;  %v364_v49 = vshrl.u32 %v3228_v38, 16  ;;  %2623 = vmatprep.subr.bf16.mxu0 %v2935_v19  ;;  %v2939_v23 = vld [vmem:[#allocation6 + $0x1b0] sm:$0xff]   ;;  %v2944_v27 = vld [vmem:[#allocation6 + $0x168] sm:$0xff]   ;;  %v2947_v30 = vld [vmem:[#allocation6 + $0x1a0] sm:$0xff]  }
 0x186   :  { %v353_v44 = vor.u32 %v352_v37, %v349_v36  ;;  %v358_v53 = vrot.slane %v356_v45, 1  ;;  %v361_v54 = vrot.slane %v359_v46, 2  ;;  %v367_v55 = vshll.u32 %v3228_v38, 16  ;;  %v2945_v28 = vld [vmem:[#allocation6 + $0x228] sm:$0xff]   ;;  %v2949_v31 = vld [vmem:[#allocation6 + $0x220] sm:$0xff]   ;;  %v2951_v34 = vld [vmem:[#allocation6 + $0x198] sm:$0xff]  }
 0x187   :  { %v301_v47 = vsel %vm289_vm9, %v296_v39, %v300_v32  ;;  %v313_v57 = vsel %vm289_vm9, %v308_v40, %v312_v48  ;;  %v366_v58 = vrot.slane %v364_v49, 1  ;;  %v325_v60 = vsel %vm322_vm11, %v323_v41, %v324_v42  ;;  %v2946_v29 = vld [vmem:[#allocation6 + $0x1e8] sm:$0xff]   ;;  %v2948_v32 = vld [vmem:[#allocation6 + $0x160] sm:$0xff]   ;;  %v2953_v35 = vld [vmem:[#allocation6 + $0x218] sm:$0xff]  }
 0x188   :  { %741 = vmatprep.mubr.bf16.mxu1 %v301_v47  ;;  %v354_v51 = vsel %vm337_vm10, %v345_v43, %v353_v44  ;;  %v362_v62 = vor.u32 %v361_v54, %v358_v53  ;;  %v369_v63 = vrot.slane %v367_v55, 2  ;;  %v381_v2 = vrot.slane %v2366_v59, 2  ;;  %v2950_v33 = vld [vmem:[#allocation6 + $0x1e0] sm:$0xff]   ;;  %v2952_v36 = vld [vmem:[#allocation6 + $0x158] sm:$0xff]   ;;  %v2957_v39 = vld [vmem:[#allocation6 + $0x210] sm:$0xff]  }
 0x189   :  { %742 = vmatmul.mubr.bf16.vlgmr.msra.gmra.mxu1 %v2358_v16  ;;  %790 = vmatprep.mubr.bf16.mxu0 %v354_v51  ;;  %v382_v3 = vrot.slane %v3219_v20, 2  ;;  %v326_v5 = vrot.slane %v3223_v22, 1  ;;  %v327_v6 = vrot.slane %v3216_v12, 1  ;;  %v2932_v12 = vld [vmem:[#allocation6 + $0x108] sm:$0xff]   ;;  %v385_v17 = vrot.slane %v3228_v38, 2  ;;  %v2936_v20 = vld [vmem:[#allocation6 + $0x178] sm:$0xff]  }
 0x18a   :  { %2786 = vmatpush3.bf16.msra.mxu1 %v3200_v52  ;;  %749 = vmatprep.mubr.bf16.mxu1 %v313_v57  ;;  %v370_v1 = vor.u32 %v369_v63, %v366_v58  ;;  %v2929_v52 = vld [vmem:[#allocation6 + $0x120] sm:$0xff]   ;;  %v2938_v22 = vld [vmem:[#allocation6 + $0x1f8] sm:$0xff]   ;;  %v2955_v38 = vld [vmem:[#allocation6 + $0x190] sm:$0xff]  }
 0x18b   :  { %791 = vmatmul.mubr.bf16.vlgmr.msra.gmra.mxu0 %v325_v60  ;;  %2787 = vmatprep.subr.bf16.mxu1 %v2926_v50  ;;  %v383_v7 = vsel %vm380_vm12, %v381_v2, %v382_v3  ;;  %v328_v8 = vsel %vm322_vm11, %v326_v5, %v327_v6  ;;  %v2954_v37 = vld [vmem:[#allocation6 + $0x1d8] sm:$0xff]   ;;  %v2956_v40 = vld [vmem:[#allocation6 + $0x150] sm:$0xff]   ;;  %v2959_v42 = vld [vmem:[#allocation6 + $0x188] sm:$0xff]  }
 0x18c   :  { %v371_v4 = vsel %vm337_vm10, %v362_v62, %v370_v1  ;;  %2624 = vmatpush3.bf16.msra.mxu0 %v2936_v20  ;;  %v2958_v41 = vld [vmem:[#allocation6 + $0x1d0] sm:$0xff]   ;;  %v2961_v43 = vld [vmem:[#allocation6 + $0x208] sm:$0xff]   ;;  %v2963_v46 = vld [vmem:[#allocation6 + $0x180] sm:$0xff]  }
 0x18d   :  { %798 = vmatprep.mubr.bf16.mxu0 %v371_v4  ;;  %2625 = vmatprep.subr.bf16.mxu0 %v2939_v23  ;;  %v2960_v44 = vld [vmem:[#allocation6 + $0x148] sm:$0xff]   ;;  %v2965_v47 = vld [vmem:[#allocation6 + $0x200] sm:$0xff]  }
 0x18e   :  { %2788 = vmatpush3.bf16.msra.mxu1 %v2926_v50  ;;  %v2962_v45 = vld [vmem:[#allocation6 + $0x1c8] sm:$0xff]   ;;  %v2964_v48 = vld [vmem:[#allocation6 + $0x140] sm:$0xff]   ;;  %v3249_v50 = vld [vmem:[#allocation6 + $0x278] sm:$0xff]  }
 0x18f   :  { %2789 = vmatprep.subr.bf16.mxu1 %v2927_v0  ;;  %v2966_v49 = vld [vmem:[#allocation6 + $0x1c0] sm:$0xff]  }
 0x190   :  { %2626 = vmatpush3.bf16.msra.mxu0 %v2940_v24 }
 0x191   :  { %750 = vmatmul.mubr.bf16.gmra.mxu1 %v3214_v11  ;;  %v2367_v11 = vcombine.low %v270_v15, %v3211_v10  ;;  %v2941_v10 = vld [vmem:[#allocation6 + $0x230] sm:$0xff]   ;;  %2627 = vmatprep.subr.bf16.mxu0 %v2943_v26 }
 0x192   :  { %2790 = vmatpush3.bf16.msra.mxu1 %v2927_v0  ;;  %2801 = vmatprep.mubr.bf16.mxu1 %v383_v7 }
 0x193   :  { %799 = vmatmul.mubr.bf16.gmra.mxu0 %v328_v8  ;;  %2791 = vmatprep.subr.bf16.mxu1 %v2929_v52  ;;  %v384_v16 = vrot.slane %v2367_v11, 2 }
 0x194   :  { %2628 = vmatpush3.bf16.msra.mxu0 %v2944_v27 }
 0x195   :  { %v386_v18 = vsel %vm380_vm12, %v384_v16, %v385_v17  ;;  %2629 = vmatprep.subr.bf16.mxu0 %v2947_v30  ;;  %v2408_v17 = vld [vmem:[%s3366_s3] ss:$0 sm:$0xff] }
 0x196   :  { %2792 = vmatpush3.bf16.msra.mxu1 %v2929_v52 }
 0x197   :  { %2793 = vmatprep.subr.bf16.mxu1 %v2930_v9 }
 0x198   :  { %2630 = vmatpush3.bf16.msra.mxu0 %v2948_v32 }
 0x199   :  { %2631 = vmatprep.subr.bf16.mxu0 %v2951_v34 }
 0x19a   :  { %2794 = vmatpush3.bf16.msra.mxu1 %v2930_v9 }
 0x19b   :  { %2795 = vmatprep.subr.bf16.mxu1 %v2931_v13 }
 0x19c   :  { %2632 = vmatpush3.bf16.msra.mxu0 %v2952_v36 }
 0x19d   :  { %2633 = vmatprep.subr.bf16.mxu0 %v2955_v38 }
 0x19e   :  { %2796 = vmatpush3.bf16.msra.mxu1 %v2931_v13 }
 0x19f   :  { %2797 = vmatprep.subr.bf16.mxu1 %v2932_v12 }
 0x1a0   :  { %2634 = vmatpush3.bf16.msra.mxu0 %v2956_v40 }
 0x1a1   :  { %2635 = vmatprep.subr.bf16.mxu0 %v2959_v42 }
 0x1a2   :  { %2798 = vmatpush3.bf16.msra.mxu1 %v2932_v12 }
 0x1a3   :  { %2799 = vmatprep.subr.bf16.mxu1 %v2933_v14 }
 0x1a4   :  { %2636 = vmatpush3.bf16.msra.mxu0 %v2960_v44 }
 0x1a5   :  { %2637 = vmatprep.subr.bf16.mxu0 %v2963_v46 }
 0x1a6   :  { %2800 = vmatpush3.bf16.msra.mxu1 %v2933_v14 }
 0x1a7   :  { %2651 = vmatprep.subr.bf16.mxu1 %v2937_v21 }
 0x1a8   :  { %2638 = vmatpush3.bf16.msra.mxu0 %v2964_v48 }
 0x1a9   :  { %2802 = vmatmul.mubr.bf16.vlgmr.msra.gmra.mxu1 %v386_v18  ;;  %2805 = vmatprep.subr.bf16.mxu0 %v3249_v50 }
 0x1aa   :  { %2652 = vmatpush3.bf16.msra.mxu1 %v2938_v22  ;;  %v2409_v22 = vld [vmem:[%s3367_s4] ss:$0 sm:$0xff] }
 0x1ab   :  { %2653 = vmatprep.subr.bf16.mxu1 %v2941_v10 }
 0x1ae   :  { %2654 = vmatpush3.bf16.msra.mxu1 %v2942_v25 }
 0x1af   :  { %2655 = vmatprep.subr.bf16.mxu1 %v2945_v28 }
 0x1b2   :  { %2656 = vmatpush3.bf16.msra.mxu1 %v2946_v29 }
 0x1b3   :  { %2657 = vmatprep.subr.bf16.mxu1 %v2949_v31 }
 0x1b6   :  { %2658 = vmatpush3.bf16.msra.mxu1 %v2950_v33 }
 0x1b7   :  { %2659 = vmatprep.subr.bf16.mxu1 %v2953_v35 }
 0x1ba   :  { %2660 = vmatpush3.bf16.msra.mxu1 %v2954_v37 }
 0x1bb   :  { %2661 = vmatprep.subr.bf16.mxu1 %v2957_v39 }
 0x1be   :  { %2662 = vmatpush3.bf16.msra.mxu1 %v2958_v41 }
 0x1bf   :  { %2663 = vmatprep.subr.bf16.mxu1 %v2961_v43 }
 0x1c2   :  { %2664 = vmatpush3.bf16.msra.mxu1 %v2962_v45 }
 0x1c3   :  { %2665 = vmatprep.subr.bf16.mxu1 %v2965_v47 }
 0x1c6   :  { %2666 = vmatpush3.bf16.msra.mxu1 %v2966_v49 }
 0x249   :  { %v2573_v51 = vpop.f32.mrf.mxu1 }
 0x24b   :  { %v2601_v53 = vpop.f32.mrf.mxu0  ;;  %v2574_v54 = vpop.f32.mrf.mxu1 }
 0x24c   :  { %v2575_v52 = vadd.f32 %v2574_v54, %v2573_v51 }
 0x24d   :  { %v2602_v55 = vpop.f32.mrf.mxu0  ;;  %v2576_v56 = vpop.f32.mrf.mxu1 }
 0x24e   :  { %v2603_v7 = vadd.f32 %v2602_v55, %v2601_v53 }
 0x24f   :  { %v2604_v57 = vpop.f32.mrf.mxu0  ;;  %v2577_v58 = vpop.f32.mrf.mxu1 }
 0x250   :  { %v2578_v14 = vadd.f32 %v2577_v58, %v2576_v56  ;;  %v793_v16 = vadd.f32 %v2603_v7, %v2575_v52 }
 0x251   :  { %v2605_v59 = vpop.f32.mrf.mxu0  ;;  %v2579_v60 = vpop.f32.mrf.mxu1 }
 0x252   :  { %v2606_v15 = vadd.f32 %v2605_v59, %v2604_v57 }
 0x253   :  { %v2607_v62 = vpop.f32.mrf.mxu0  ;;  %v2580_v63 = vpop.f32.mrf.mxu1 }
 0x254   :  { %v2581_v3 = vadd.f32 %v2580_v63, %v2579_v60  ;;  %v796_v26 = vadd.f32 %v2606_v15, %v2578_v14 }
 0x255   :  { %v2608_v0 = vpop.f32.mrf.mxu0  ;;  %v2582_v1 = vpop.f32.mrf.mxu1 }
 0x256   :  { %v2609_v4 = vadd.f32 %v2608_v0, %v2607_v62 }
 0x257   :  { %v2610_v2 = vpop.f32.mrf.mxu0  ;;  %v2583_v5 = vpop.f32.mrf.mxu1 }
 0x258   :  { %v2584_v8 = vadd.f32 %v2583_v5, %v2582_v1  ;;  %v801_v13 = vadd.f32 %v2609_v4, %v2581_v3 }
 0x259   :  { %v2611_v6 = vpop.f32.mrf.mxu0 }
 0x25a   :  { %v2612_v9 = vadd.f32 %v2611_v6, %v2610_v2 }
 0x25c   :  { %v804_v21 = vadd.f32 %v2612_v9, %v2584_v8 }
 0x269   :  { %v2803_v12 = vpop.f32.mrf.mxu1 }
 0x26a   :  { %v850_v11 = vadd.f32 %v2803_v12, %v801_v13 }
 0x26b   :  { %v841_v18 = vpop.f32.mrf.mxu1 }
 0x26c   :  { %v858_v19 = vmax.f32 %v850_v11, 0.0  ;;  %v842_v20 = vadd.f32 %v841_v18, %v793_v16 }
 0x26d   :  { %v2804_v23 = vpop.f32.mrf.mxu1 }
 0x26e   :  { %v869_v24 = vmul.f32 %v2408_v17, %v858_v19  ;;  %v856_v10 = vmax.f32 %v842_v20, 0.0  ;;  %v853_v25 = vadd.f32 %v2804_v23, %v804_v21 }
 0x26f   :  { %v844_v27 = vpop.f32.mrf.mxu1 }
 0x270   :  { %v880_v28 = vadd.f32 %v2409_v22, %v869_v24  ;;  %v867_v29 = vmul.f32 %v2408_v17, %v856_v10  ;;  %v859_v30 = vmax.f32 %v853_v25, 0.0  ;;  %v845_v31 = vadd.f32 %v844_v27, %v796_v26 }
 0x272   :  { %v2541_v32 = vpack.c.bf16 %v880_v28, %v880_v28  ;;  %v878_v33 = vadd.f32 %v2409_v22, %v867_v29  ;;  %v870_v34 = vmul.f32 %v2408_v17, %v859_v30  ;;  %v857_v35 = vmax.f32 %v845_v31, 0.0 }
 0x274   :  { %v899_v36 = vrot.slane %v2541_v32, 7  ;;  %v2539_v37 = vpack.c.bf16 %v878_v33, %v878_v33  ;;  %v881_v38 = vadd.f32 %v2409_v22, %v870_v34  ;;  %v868_v39 = vmul.f32 %v2408_v17, %v857_v35  ;;  %v2976_v32 = vld [vmem:[#allocation6 + $0x270] sm:$0xff]  }
 0x276   :  { %913 = vst [vmem:[#allocation2 + $0xc] sm:$0xe] %v899_v36  ;;  %v894_v40 = vrot.slane %v2539_v37, 7  ;;  %v2542_v41 = vpack.c.bf16 %v881_v38, %v881_v38  ;;  %v879_v42 = vadd.f32 %v2409_v22, %v868_v39  ;;  %v900_v43 = vrot.slane %v899_v36, 4 }
 0x278   :  { %910 = vst [vmem:[#allocation2] sm:$0xe] %v894_v40  ;;  %v901_v44 = vrot.slane %v2542_v41, 7  ;;  %v2540_v45 = vpack.c.bf16 %v879_v42, %v879_v42  ;;  %v895_v46 = vrot.slane %v894_v40, 4 }
 0x27a   :  { %v902_v47 = vsel %vm3203_vm8, %v900_v43, %v901_v44  ;;  %v903_v48 = vrot.slane %v901_v44, 4  ;;  %v896_v49 = vrot.slane %v2540_v45, 7  ;;  %v2977_v44 = vld [vmem:[#allocation6 + $0x268] sm:$0xff]  }
 0x27b   :  { %914 = vst [vmem:[#allocation2 + $0x10] sm:$0xf] %v902_v47 }
 0x27c   :  { %915 = vst [vmem:[#allocation2 + $0x14] sm:$0x1] %v903_v48  ;;  %v897_v51 = vsel %vm3203_vm8, %v895_v46, %v896_v49  ;;  %v898_v53 = vrot.slane %v896_v49, 4 }
 0x27d   :  { %911 = vst [vmem:[#allocation2 + $0x4] sm:$0xf] %v897_v51  ;;  %v918_v55 = vld [vmem:[#allocation2 + $0xc] sm:$0xf] }
 0x27e   :  { %912 = vst [vmem:[#allocation2 + $0x8] sm:$0x1] %v898_v53  ;;  %v923_v59 = vld [vmem:[#allocation2 + $0xc] sm:$0xe] }
 0x27f   :  { %v916_v54 = vld [vmem:[#allocation2] sm:$0xf] }
 0x280   :  { %v922_v62 = vld [vmem:[#allocation2] sm:$0xe] }
 0x281   :  { %v926_v37 = vld [vmem:[#allocation2] sm:$0xc] }
 0x282   :  { %v3262_v56 = vld [vmem:[#allocation2 + $0x10] sm:$0xf] }
 0x283   :  { %v3265_v57 = vcombine.low %v918_v55, %v3262_v56  ;;  %v3267_v58 = vld [vmem:[#allocation2 + $0x14] ss:$0 sps:$4 sm:$0x11]   ;;  %v3274_v5 = vcombine.low %v923_v59, %v3262_v56  ;;  %v2981_v59 = vld [vmem:[#allocation6 + $0x250] sm:$0xff]  }
 0x284   :  { %v917_v60 = vld [vmem:[#allocation2 + $0x4] sm:$0xf]  ;;  %v966_v17 = vshll.u32 %v3267_v58, 16  ;;  %v3279_v21 = vld [vmem:[#allocation2 + $0x14] ss:$0 sps:$4 sm:$0x33]  }
 0x285   :  { %v2414_v63 = vcombine.low %v916_v54, %v917_v60  ;;  %v2968_v0 = vld [vmem:[#allocation2 + $0x8] ss:$0 sps:$4 sm:$0x11]   ;;  %v2418_v1 = vcombine.low %v922_v62, %v917_v60  ;;  %v959_v2 = vshrl.u32 %v3265_v57, 16  ;;  %v961_v4 = vshll.u32 %v3265_v57, 16  ;;  %v2980_v55 = vld [vmem:[#allocation6 + $0x258] sm:$0xff]  }
 0x286   :  { %v3270_v3 = vld [vmem:[#allocation2 + $0x8] ss:$0 sps:$4 sm:$0x33]   ;;  %v954_v7 = vshll.u32 %v2968_v0, 16  ;;  %v979_v10 = vrot.slane %v2968_v0, 1  ;;  %v1010_v27 = vshrl.u32 %v3274_v5, 16  ;;  %v2422_v40 = vcombine.low %v926_v37, %v917_v60 }
 0x287   :  { %v947_v6 = vshrl.u32 %v2414_v63, 16  ;;  %v949_v52 = vshll.u32 %v2414_v63, 16  ;;  %v993_v8 = vshrl.u32 %v2418_v1, 16  ;;  %v996_v9 = vshll.u32 %v2418_v1, 16  ;;  %v2983_v60 = vld [vmem:[#allocation6 + $0x240] sm:$0xff]  }
 0x288   :  { %v1001_v13 = vshrl.u32 %v3270_v3, 16  ;;  %v1004_v12 = vshll.u32 %v3270_v3, 16  ;;  %v963_v14 = vrot.slane %v961_v4, 1  ;;  %v956_v11 = vrot.slane %v954_v7, 1  ;;  %v927_v62 = vld [vmem:[#allocation2 + $0xc] sm:$0xc] }
 0x289   :  { %v951_v15 = vrot.slane %v949_v52, 1  ;;  %v995_v16 = vrot.slane %v993_v8, 1  ;;  %v998_v18 = vrot.slane %v996_v9, 2  ;;  %v978_v24 = vrot.slane %v2418_v1, 1  ;;  %v2987_v4 = vld [vmem:[#allocation6 + $0x378] sm:$0xff]   ;;  %v2990_v52 = vld [vmem:[#allocation6 + $0x2b0] sm:$0xff]  }
 0x28a   :  { %v1003_v19 = vrot.slane %v1001_v13, 1  ;;  %v1006_v20 = vrot.slane %v1004_v12, 2  ;;  %v964_v23 = vor.u32 %v963_v14, %v959_v2  ;;  %v1013_v28 = vshll.u32 %v3274_v5, 16  ;;  %v2985_v2 = vld [vmem:[#allocation6 + $0x2f8] sm:$0xff]   ;;  %v2992_v7 = vld [vmem:[#allocation6 + $0x330] sm:$0xff]   ;;  %v2993_v8 = vld [vmem:[#allocation6 + $0x2e8] sm:$0xff]  }
 0x28b   :  { %v952_v22 = vor.u32 %v951_v15, %v947_v6  ;;  %v999_v25 = vor.u32 %v998_v18, %v995_v16  ;;  %v968_v30 = vrot.slane %v966_v17, 1  ;;  %v1018_v31 = vshrl.u32 %v3279_v21, 16  ;;  %2689 = vmatprep.subr.bf16.mxu1 %v2985_v2  ;;  %v2989_v6 = vld [vmem:[#allocation6 + $0x2f0] sm:$0xff]   ;;  %v2994_v9 = vld [vmem:[#allocation6 + $0x2a8] sm:$0xff]   ;;  %v2997_v14 = vld [vmem:[#allocation6 + $0x2e0] sm:$0xff]  }
 0x28c   :  { %v1007_v26 = vor.u32 %v1006_v20, %v1003_v19  ;;  %v1012_v34 = vrot.slane %v1010_v27, 1  ;;  %v1015_v35 = vrot.slane %v1013_v28, 2  ;;  %v1021_v36 = vshll.u32 %v3279_v21, 16  ;;  %v2995_v13 = vld [vmem:[#allocation6 + $0x368] sm:$0xff]   ;;  %v2999_v15 = vld [vmem:[#allocation6 + $0x360] sm:$0xff]   ;;  %v3001_v17 = vld [vmem:[#allocation6 + $0x2d8] sm:$0xff]  }
 0x28d   :  { %v957_v29 = vsel %vm289_vm9, %v952_v22, %v956_v11  ;;  %v969_v38 = vsel %vm289_vm9, %v964_v23, %v968_v30  ;;  %v1020_v39 = vrot.slane %v1018_v31, 1  ;;  %v980_v41 = vsel %vm322_vm11, %v978_v24, %v979_v10  ;;  %v2996_v12 = vld [vmem:[#allocation6 + $0x328] sm:$0xff]   ;;  %v2998_v11 = vld [vmem:[#allocation6 + $0x2a0] sm:$0xff]   ;;  %v3003_v18 = vld [vmem:[#allocation6 + $0x358] sm:$0xff]  }
 0x28e   :  { %1395 = vmatprep.mubr.bf16.mxu0 %v957_v29  ;;  %v1008_v33 = vsel %vm337_vm10, %v999_v25, %v1007_v26  ;;  %v1016_v42 = vor.u32 %v1015_v35, %v1012_v34  ;;  %v1023_v43 = vrot.slane %v1021_v36, 2  ;;  %v1034_v46 = vrot.slane %v2422_v40, 2  ;;  %v3000_v16 = vld [vmem:[#allocation6 + $0x320] sm:$0xff]   ;;  %v3002_v19 = vld [vmem:[#allocation6 + $0x298] sm:$0xff]   ;;  %v3007_v22 = vld [vmem:[#allocation6 + $0x350] sm:$0xff]  }
 0x28f   :  { %1396 = vmatmul.mubr.bf16.vlgmr.msra.gmra.mxu0 %v2414_v63  ;;  %1444 = vmatprep.mubr.bf16.mxu1 %v1008_v33  ;;  %v1035_v47 = vrot.slane %v3270_v3, 2  ;;  %v981_v49 = vrot.slane %v3274_v5, 1  ;;  %v982_v51 = vrot.slane %v3267_v58, 1  ;;  %v2982_v58 = vld [vmem:[#allocation6 + $0x248] sm:$0xff]   ;;  %v1038_v0 = vrot.slane %v3279_v21, 2  ;;  %v2986_v3 = vld [vmem:[#allocation6 + $0x2b8] sm:$0xff]  }
 0x290   :  { %2806 = vmatpush3.bf16.msra.mxu0 %v3249_v50  ;;  %1403 = vmatprep.mubr.bf16.mxu0 %v969_v38  ;;  %v1024_v45 = vor.u32 %v1023_v43, %v1020_v39  ;;  %v2979_v50 = vld [vmem:[#allocation6 + $0x260] sm:$0xff]   ;;  %v2988_v5 = vld [vmem:[#allocation6 + $0x338] sm:$0xff]   ;;  %v3005_v21 = vld [vmem:[#allocation6 + $0x2d0] sm:$0xff]  }
 0x291   :  { %1445 = vmatmul.mubr.bf16.vlgmr.msra.gmra.mxu1 %v980_v41  ;;  %2807 = vmatprep.subr.bf16.mxu0 %v2976_v32  ;;  %v1036_v53 = vsel %vm380_vm12, %v1034_v46, %v1035_v47  ;;  %v983_v54 = vsel %vm322_vm11, %v981_v49, %v982_v51  ;;  %v3004_v20 = vld [vmem:[#allocation6 + $0x318] sm:$0xff]   ;;  %v3006_v23 = vld [vmem:[#allocation6 + $0x290] sm:$0xff]   ;;  %v3009_v10 = vld [vmem:[#allocation6 + $0x2c8] sm:$0xff]  }
 0x292   :  { %v1025_v48 = vsel %vm337_vm10, %v1016_v42, %v1024_v45  ;;  %2690 = vmatpush3.bf16.msra.mxu1 %v2986_v3  ;;  %v3008_v24 = vld [vmem:[#allocation6 + $0x310] sm:$0xff]   ;;  %v3011_v25 = vld [vmem:[#allocation6 + $0x348] sm:$0xff]   ;;  %v3013_v28 = vld [vmem:[#allocation6 + $0x2c0] sm:$0xff]  }
 0x293   :  { %1452 = vmatprep.mubr.bf16.mxu1 %v1025_v48  ;;  %2691 = vmatprep.subr.bf16.mxu1 %v2989_v6  ;;  %v3010_v26 = vld [vmem:[#allocation6 + $0x288] sm:$0xff]   ;;  %v3015_v29 = vld [vmem:[#allocation6 + $0x340] sm:$0xff]  }
 0x294   :  { %2808 = vmatpush3.bf16.msra.mxu0 %v2976_v32  ;;  %v3012_v27 = vld [vmem:[#allocation6 + $0x308] sm:$0xff]   ;;  %v3014_v30 = vld [vmem:[#allocation6 + $0x280] sm:$0xff]   ;;  %v3300_v32 = vld [vmem:[#allocation6 + $0x3b8] sm:$0xff]  }
 0x295   :  { %2809 = vmatprep.subr.bf16.mxu0 %v2977_v44  ;;  %v3016_v31 = vld [vmem:[#allocation6 + $0x300] sm:$0xff]  }
 0x296   :  { %2692 = vmatpush3.bf16.msra.mxu1 %v2990_v52 }
 0x297   :  { %1404 = vmatmul.mubr.bf16.gmra.mxu0 %v3265_v57  ;;  %v2423_v57 = vcombine.low %v927_v62, %v3262_v56  ;;  %v2991_v56 = vld [vmem:[#allocation6 + $0x370] sm:$0xff]   ;;  %2693 = vmatprep.subr.bf16.mxu1 %v2993_v8 }
 0x298   :  { %2810 = vmatpush3.bf16.msra.mxu0 %v2977_v44  ;;  %2821 = vmatprep.mubr.bf16.mxu0 %v1036_v53 }
 0x299   :  { %1453 = vmatmul.mubr.bf16.gmra.mxu1 %v983_v54  ;;  %2811 = vmatprep.subr.bf16.mxu0 %v2979_v50  ;;  %v1037_v63 = vrot.slane %v2423_v57, 2 }
 0x29a   :  { %2694 = vmatpush3.bf16.msra.mxu1 %v2994_v9 }
 0x29b   :  { %v1039_v1 = vsel %vm380_vm12, %v1037_v63, %v1038_v0  ;;  %2695 = vmatprep.subr.bf16.mxu1 %v2997_v14  ;;  %v2465_v0 = vld [vmem:[%s3366_s3 + $0x1] ss:$0 sm:$0xff] }
 0x29c   :  { %2812 = vmatpush3.bf16.msra.mxu0 %v2979_v50 }
 0x29d   :  { %2813 = vmatprep.subr.bf16.mxu0 %v2980_v55 }
 0x29e   :  { %2696 = vmatpush3.bf16.msra.mxu1 %v2998_v11 }
 0x29f   :  { %2697 = vmatprep.subr.bf16.mxu1 %v3001_v17 }
 0x2a0   :  { %2814 = vmatpush3.bf16.msra.mxu0 %v2980_v55 }
 0x2a1   :  { %2815 = vmatprep.subr.bf16.mxu0 %v2981_v59 }
 0x2a2   :  { %2698 = vmatpush3.bf16.msra.mxu1 %v3002_v19 }
 0x2a3   :  { %2699 = vmatprep.subr.bf16.mxu1 %v3005_v21 }
 0x2a4   :  { %2816 = vmatpush3.bf16.msra.mxu0 %v2981_v59 }
 0x2a5   :  { %2817 = vmatprep.subr.bf16.mxu0 %v2982_v58 }
 0x2a6   :  { %2700 = vmatpush3.bf16.msra.mxu1 %v3006_v23 }
 0x2a7   :  { %2701 = vmatprep.subr.bf16.mxu1 %v3009_v10 }
 0x2a8   :  { %2818 = vmatpush3.bf16.msra.mxu0 %v2982_v58 }
 0x2a9   :  { %2819 = vmatprep.subr.bf16.mxu0 %v2983_v60 }
 0x2aa   :  { %2702 = vmatpush3.bf16.msra.mxu1 %v3010_v26 }
 0x2ab   :  { %2703 = vmatprep.subr.bf16.mxu1 %v3013_v28 }
 0x2ac   :  { %2820 = vmatpush3.bf16.msra.mxu0 %v2983_v60 }
 0x2ad   :  { %2717 = vmatprep.subr.bf16.mxu0 %v2987_v4 }
 0x2ae   :  { %2704 = vmatpush3.bf16.msra.mxu1 %v3014_v30 }
 0x2af   :  { %2822 = vmatmul.mubr.bf16.vlgmr.msra.gmra.mxu0 %v1039_v1  ;;  %2825 = vmatprep.subr.bf16.mxu1 %v3300_v32 }
 0x2b0   :  { %2718 = vmatpush3.bf16.msra.mxu0 %v2988_v5  ;;  %v2467_v5 = vld [vmem:[%s3367_s4 + $0x1] ss:$0 sm:$0xff] }
 0x2b1   :  { %2719 = vmatprep.subr.bf16.mxu0 %v2991_v56 }
 0x2b4   :  { %2720 = vmatpush3.bf16.msra.mxu0 %v2992_v7 }
 0x2b5   :  { %2721 = vmatprep.subr.bf16.mxu0 %v2995_v13 }
 0x2b8   :  { %2722 = vmatpush3.bf16.msra.mxu0 %v2996_v12 }
 0x2b9   :  { %2723 = vmatprep.subr.bf16.mxu0 %v2999_v15 }
 0x2bc   :  { %2724 = vmatpush3.bf16.msra.mxu0 %v3000_v16 }
 0x2bd   :  { %2725 = vmatprep.subr.bf16.mxu0 %v3003_v18 }
 0x2c0   :  { %2726 = vmatpush3.bf16.msra.mxu0 %v3004_v20 }
 0x2c1   :  { %2727 = vmatprep.subr.bf16.mxu0 %v3007_v22 }
 0x2c4   :  { %2728 = vmatpush3.bf16.msra.mxu0 %v3008_v24 }
 0x2c5   :  { %2729 = vmatprep.subr.bf16.mxu0 %v3011_v25 }
 0x2c8   :  { %2730 = vmatpush3.bf16.msra.mxu0 %v3012_v27 }
 0x2c9   :  { %2731 = vmatprep.subr.bf16.mxu0 %v3015_v29 }
 0x2cc   :  { %2732 = vmatpush3.bf16.msra.mxu0 %v3016_v31 }
 0x34f   :  { %v2639_v33 = vpop.f32.mrf.mxu0 }
 0x351   :  { %v2667_v34 = vpop.f32.mrf.mxu1  ;;  %v2640_v35 = vpop.f32.mrf.mxu0 }
 0x352   :  { %v2641_v50 = vadd.f32 %v2640_v35, %v2639_v33 }
 0x353   :  { %v2668_v36 = vpop.f32.mrf.mxu1  ;;  %v2642_v37 = vpop.f32.mrf.mxu0 }
 0x354   :  { %v2669_v53 = vadd.f32 %v2668_v36, %v2667_v34 }
 0x355   :  { %v2670_v38 = vpop.f32.mrf.mxu1  ;;  %v2643_v39 = vpop.f32.mrf.mxu0 }
 0x356   :  { %v2644_v60 = vadd.f32 %v2643_v39, %v2642_v37  ;;  %v1447_v63 = vadd.f32 %v2669_v53, %v2641_v50 }
 0x357   :  { %v2671_v40 = vpop.f32.mrf.mxu1  ;;  %v2645_v41 = vpop.f32.mrf.mxu0 }
 0x358   :  { %v2672_v62 = vadd.f32 %v2671_v40, %v2670_v38 }
 0x359   :  { %v2673_v42 = vpop.f32.mrf.mxu1  ;;  %v2646_v43 = vpop.f32.mrf.mxu0 }
 0x35a   :  { %v2647_v47 = vadd.f32 %v2646_v43, %v2645_v41  ;;  %v1450_v8 = vadd.f32 %v2672_v62, %v2644_v60 }
 0x35b   :  { %v2674_v44 = vpop.f32.mrf.mxu1  ;;  %v2648_v45 = vpop.f32.mrf.mxu0 }
 0x35c   :  { %v2675_v48 = vadd.f32 %v2674_v44, %v2673_v42 }
 0x35d   :  { %v2676_v46 = vpop.f32.mrf.mxu1  ;;  %v2649_v49 = vpop.f32.mrf.mxu0 }
 0x35e   :  { %v2650_v54 = vadd.f32 %v2649_v49, %v2648_v45  ;;  %v1455_v59 = vadd.f32 %v2675_v48, %v2647_v47 }
 0x35f   :  { %v2677_v51 = vpop.f32.mrf.mxu1 }
 0x360   :  { %v2678_v55 = vadd.f32 %v2677_v51, %v2676_v46 }
 0x362   :  { %v1458_v4 = vadd.f32 %v2678_v55, %v2650_v54 }
 0x36f   :  { %v2823_v58 = vpop.f32.mrf.mxu0 }
 0x370   :  { %v1504_v57 = vadd.f32 %v2823_v58, %v1455_v59 }
 0x371   :  { %v1495_v1 = vpop.f32.mrf.mxu0 }
 0x372   :  { %v1512_v2 = vmax.f32 %v1504_v57, 0.0  ;;  %v1496_v3 = vadd.f32 %v1495_v1, %v1447_v63 }
 0x373   :  { %v2824_v6 = vpop.f32.mrf.mxu0 }
 0x374   :  { %v1524_v52 = vmul.f32 %v2465_v0, %v1512_v2  ;;  %v1510_v56 = vmax.f32 %v1496_v3, 0.0  ;;  %v1507_v7 = vadd.f32 %v2824_v6, %v1458_v4 }
 0x375   :  { %v1498_v9 = vpop.f32.mrf.mxu0 }
 0x376   :  { %v1536_v13 = vadd.f32 %v2467_v5, %v1524_v52  ;;  %v1522_v12 = vmul.f32 %v2465_v0, %v1510_v56  ;;  %v1513_v14 = vmax.f32 %v1507_v7, 0.0  ;;  %v1499_v15 = vadd.f32 %v1498_v9, %v1450_v8 }
 0x378   :  { %v2545_v11 = vpack.c.bf16 %v1536_v13, %v1536_v13  ;;  %v1534_v16 = vadd.f32 %v2467_v5, %v1522_v12  ;;  %v1525_v17 = vmul.f32 %v2465_v0, %v1513_v14  ;;  %v1511_v18 = vmax.f32 %v1499_v15, 0.0  ;;  %v3026_v15 = vld [vmem:[#allocation6 + $0x3b0] sm:$0xff]  }
 0x37a   :  { %v1555_v19 = vrot.slane %v2545_v11, 7  ;;  %v2543_v20 = vpack.c.bf16 %v1534_v16, %v1534_v16  ;;  %v1537_v21 = vadd.f32 %v2467_v5, %v1525_v17  ;;  %v1523_v22 = vmul.f32 %v2465_v0, %v1511_v18 }
 0x37c   :  { %1569 = vst [vmem:[#allocation2 + $0xc] sm:$0xe] %v1555_v19  ;;  %v1550_v23 = vrot.slane %v2543_v20, 7  ;;  %v2546_v24 = vpack.c.bf16 %v1537_v21, %v1537_v21  ;;  %v1535_v10 = vadd.f32 %v2467_v5, %v1523_v22  ;;  %v1556_v25 = vrot.slane %v1555_v19, 4 }
 0x37e   :  { %1566 = vst [vmem:[#allocation2] sm:$0xe] %v1550_v23  ;;  %v1557_v26 = vrot.slane %v2546_v24, 7  ;;  %v2544_v27 = vpack.c.bf16 %v1535_v10, %v1535_v10  ;;  %v1551_v28 = vrot.slane %v1550_v23, 4 }
 0x380   :  { %v1558_v29 = vsel %vm3203_vm8, %v1556_v25, %v1557_v26  ;;  %v1559_v30 = vrot.slane %v1557_v26, 4  ;;  %v1552_v31 = vrot.slane %v2544_v27, 7  ;;  %v3027_v25 = vld [vmem:[#allocation6 + $0x3a8] sm:$0xff]  }
 0x381   :  { %1570 = vst [vmem:[#allocation2 + $0x10] sm:$0xf] %v1558_v29 }
 0x382   :  { %1571 = vst [vmem:[#allocation2 + $0x14] sm:$0x1] %v1559_v30  ;;  %v1553_v33 = vsel %vm3203_vm8, %v1551_v28, %v1552_v31  ;;  %v1554_v34 = vrot.slane %v1552_v31, 4 }
 0x383   :  { %1567 = vst [vmem:[#allocation2 + $0x4] sm:$0xf] %v1553_v33  ;;  %v1574_v36 = vld [vmem:[#allocation2 + $0xc] sm:$0xf] }
 0x384   :  { %1568 = vst [vmem:[#allocation2 + $0x8] sm:$0x1] %v1554_v34  ;;  %v1579_v40 = vld [vmem:[#allocation2 + $0xc] sm:$0xe] }
 0x385   :  { %v1572_v35 = vld [vmem:[#allocation2] sm:$0xf] }
 0x386   :  { %v1578_v42 = vld [vmem:[#allocation2] sm:$0xe] }
 0x387   :  { %v1582_v19 = vld [vmem:[#allocation2] sm:$0xc] }
 0x388   :  { %v3313_v37 = vld [vmem:[#allocation2 + $0x10] sm:$0xf] }
 0x389   :  { %v3316_v38 = vcombine.low %v1574_v36, %v3313_v37  ;;  %v3318_v39 = vld [vmem:[#allocation2 + $0x14] ss:$0 sps:$4 sm:$0x11]   ;;  %v3325_v48 = vcombine.low %v1579_v40, %v3313_v37  ;;  %v3031_v36 = vld [vmem:[#allocation6 + $0x390] sm:$0xff]   ;;  %v3033_v40 = vld [vmem:[#allocation6 + $0x380] sm:$0xff]  }
 0x38a   :  { %v1573_v41 = vld [vmem:[#allocation2 + $0x4] sm:$0xf]  ;;  %v1622_v63 = vshll.u32 %v3318_v39, 16  ;;  %v3330_v3 = vld [vmem:[#allocation2 + $0x14] ss:$0 sps:$4 sm:$0x33]  }
 0x38b   :  { %v2472_v43 = vcombine.low %v1572_v35, %v1573_v41  ;;  %v3018_v44 = vld [vmem:[#allocation2 + $0x8] ss:$0 sps:$4 sm:$0x11]   ;;  %v2476_v45 = vcombine.low %v1578_v42, %v1573_v41  ;;  %v1615_v61 = vshrl.u32 %v3316_v38, 16  ;;  %v1617_v47 = vshll.u32 %v3316_v38, 16  ;;  %v3030_v35 = vld [vmem:[#allocation6 + $0x398] sm:$0xff]  }
 0x38c   :  { %v3321_v46 = vld [vmem:[#allocation2 + $0x8] ss:$0 sps:$4 sm:$0x33]   ;;  %v1610_v50 = vshll.u32 %v3018_v44, 16  ;;  %v1635_v52 = vrot.slane %v3018_v44, 1  ;;  %v1666_v8 = vshrl.u32 %v3325_v48, 16  ;;  %v2480_v22 = vcombine.low %v1582_v19, %v1573_v41 }
 0x38d   :  { %v1603_v49 = vshrl.u32 %v2472_v43, 16  ;;  %v1605_v51 = vshll.u32 %v2472_v43, 16  ;;  %v1649_v53 = vshrl.u32 %v2476_v45, 16  ;;  %v1652_v54 = vshll.u32 %v2476_v45, 16  ;;  %v1583_v41 = vld [vmem:[#allocation2 + $0xc] sm:$0xc] }
 0x38e   :  { %v1657_v55 = vshrl.u32 %v3321_v46, 16  ;;  %v1660_v59 = vshll.u32 %v3321_v46, 16  ;;  %v1619_v58 = vrot.slane %v1617_v47, 1  ;;  %v1612_v62 = vrot.slane %v1610_v50, 1  ;;  %v3038_v47 = vld [vmem:[#allocation8 + $0x20] sm:$0xff]  }
 0x38f   :  { %v1607_v60 = vrot.slane %v1605_v51, 1  ;;  %v1651_v57 = vrot.slane %v1649_v53, 1  ;;  %v1654_v0 = vrot.slane %v1652_v54, 2  ;;  %v1634_v6 = vrot.slane %v2476_v45, 1  ;;  %v3035_v45 = vld [vmem:[#allocation8 + $0x38] sm:$0xff]   ;;  %v3042_v51 = vld [vmem:[#allocation8] sm:$0xff]  }
 0x390   :  { %v1659_v1 = vrot.slane %v1657_v55, 1  ;;  %v1662_v2 = vrot.slane %v1660_v59, 2  ;;  %v1620_v5 = vor.u32 %v1619_v58, %v1615_v61  ;;  %v1669_v9 = vshll.u32 %v3325_v48, 16  ;;  %v3036_v61 = vld [vmem:[#allocation8 + $0x30] sm:$0xff]   ;;  %2845 = vmatprep.subr.bf16.mxu0 %v3035_v45 }
 0x391   :  { %v1608_v4 = vor.u32 %v1607_v60, %v1603_v49  ;;  %v1655_v56 = vor.u32 %v1654_v0, %v1651_v57  ;;  %v1624_v12 = vrot.slane %v1622_v63, 1  ;;  %v1674_v14 = vshrl.u32 %v3330_v3, 16  ;;  %v3041_v49 = vld [vmem:[#allocation8 + $0x8] sm:$0xff]  }
 0x392   :  { %v1663_v7 = vor.u32 %v1662_v2, %v1659_v1  ;;  %v1668_v16 = vrot.slane %v1666_v8, 1  ;;  %v1671_v17 = vrot.slane %v1669_v9, 2  ;;  %v1677_v18 = vshll.u32 %v3330_v3, 16 }
 0x393   :  { %v1613_v13 = vsel %vm289_vm9, %v1608_v4, %v1612_v62  ;;  %v1625_v20 = vsel %vm289_vm9, %v1620_v5, %v1624_v12  ;;  %v1676_v21 = vrot.slane %v1674_v14, 1  ;;  %v1636_v23 = vsel %vm322_vm11, %v1634_v6, %v1635_v52 }
 0x394   :  { %2051 = vmatprep.mubr.bf16.mxu1 %v1613_v13  ;;  %v1664_v11 = vsel %vm337_vm10, %v1655_v56, %v1663_v7  ;;  %v1672_v24 = vor.u32 %v1671_v17, %v1668_v16  ;;  %v1679_v10 = vrot.slane %v1677_v18, 2  ;;  %v1690_v27 = vrot.slane %v2480_v22, 2 }
 0x395   :  { %2052 = vmatmul.mubr.bf16.vlgmr.msra.gmra.mxu1 %v2472_v43  ;;  %2100 = vmatprep.mubr.bf16.mxu0 %v1664_v11  ;;  %v1691_v28 = vrot.slane %v3321_v46, 2  ;;  %v1637_v30 = vrot.slane %v3325_v48, 1  ;;  %v1638_v31 = vrot.slane %v3318_v39, 1  ;;  %v3032_v39 = vld [vmem:[#allocation6 + $0x388] sm:$0xff]   ;;  %v1694_v43 = vrot.slane %v3330_v3, 2  ;;  %v3040_v48 = vld [vmem:[#allocation8 + $0x10] sm:$0xff]  }
 0x396   :  { %2826 = vmatpush3.bf16.msra.mxu1 %v3300_v32  ;;  %2059 = vmatprep.mubr.bf16.mxu1 %v1625_v20  ;;  %v1680_v26 = vor.u32 %v1679_v10, %v1676_v21  ;;  %v3029_v32 = vld [vmem:[#allocation6 + $0x3a0] sm:$0xff]   ;;  %v3037_v46 = vld [vmem:[#allocation8 + $0x28] sm:$0xff]  }
 0x397   :  { %2101 = vmatmul.mubr.bf16.vlgmr.msra.gmra.mxu0 %v1636_v23  ;;  %2827 = vmatprep.subr.bf16.mxu1 %v3026_v15  ;;  %v1692_v33 = vsel %vm380_vm12, %v1690_v27, %v1691_v28  ;;  %v1639_v34 = vsel %vm322_vm11, %v1637_v30, %v1638_v31 }
 0x398   :  { %v1681_v29 = vsel %vm337_vm10, %v1672_v24, %v1680_v26  ;;  %2846 = vmatpush3.bf16.msra.mxu0 %v3035_v45 }
 0x399   :  { %2108 = vmatprep.mubr.bf16.mxu0 %v1681_v29  ;;  %2847 = vmatprep.subr.bf16.mxu0 %v3036_v61 }
 0x39a   :  { %2828 = vmatpush3.bf16.msra.mxu1 %v3026_v15 }
 0x39b   :  { %2829 = vmatprep.subr.bf16.mxu1 %v3027_v25 }
 0x39c   :  { %2848 = vmatpush3.bf16.msra.mxu0 %v3036_v61 }
 0x39d   :  { %2060 = vmatmul.mubr.bf16.gmra.mxu1 %v3316_v38  ;;  %v2481_v38 = vcombine.low %v1583_v41, %v3313_v37  ;;  %2849 = vmatprep.subr.bf16.mxu0 %v3037_v46  ;;  %v3039_v37 = vld [vmem:[#allocation8 + $0x18] sm:$0xff]  }
 0x39e   :  { %2830 = vmatpush3.bf16.msra.mxu1 %v3027_v25  ;;  %2841 = vmatprep.mubr.bf16.mxu1 %v1692_v33  ;;  %v2523_v25 = vld [vmem:[%s3366_s3 + $0x2] ss:$0 sm:$0xff] }
 0x39f   :  { %2109 = vmatmul.mubr.bf16.gmra.mxu0 %v1639_v34  ;;  %2831 = vmatprep.subr.bf16.mxu1 %v3029_v32  ;;  %v1693_v42 = vrot.slane %v2481_v38, 2  ;;  %v2526_v38 = vld [vmem:[%s3369_s6] ss:$0 sm:$0xff] }
 0x3a0   :  { %2850 = vmatpush3.bf16.msra.mxu0 %v3037_v46 }
 0x3a1   :  { %v1695_v44 = vsel %vm380_vm12, %v1693_v42, %v1694_v43  ;;  %2851 = vmatprep.subr.bf16.mxu0 %v3038_v47 }
 0x3a2   :  { %2832 = vmatpush3.bf16.msra.mxu1 %v3029_v32  ;;  %v2525_v32 = vld [vmem:[%s3367_s4 + $0x2] ss:$0 sm:$0xff]  ;;  %s3136_s4 = smov [#allocation9]  }
 0x3a3   :  { %2833 = vmatprep.subr.bf16.mxu1 %v3030_v35  ;;  %s2325_s12 = sshll.u32 %s3136_s4, 4  ;;  %s2326_s12 = int_to_ptr.vmem [resolvable:$true] %s2325_s12 }
 0x3a4   :  { %2852 = vmatpush3.bf16.msra.mxu0 %v3038_v47  ;;  %s3103_s13 = scalar_lea.vmem %s2326_s12, 512  ;;  %p3108_p2 = scmp.lt.s32.totalorder %s2326_s12, %s2326_s12 }
 0x3a5   :  { %2853 = vmatprep.subr.bf16.mxu0 %v3039_v37  ;;  %p3104_p1 = scmp.ne.s32.totalorder %s2326_s12, %s3103_s13  ;;  %p3109_p3 = scmp.lt.s32.totalorder %s3103_s13, %s3103_s13 }
 0x3a6   :  { %2834 = vmatpush3.bf16.msra.mxu1 %v3030_v35 }
 0x3a7   :  { %2835 = vmatprep.subr.bf16.mxu1 %v3031_v36  ;;  %p3110_p4 = por %p3109_p3, %p3108_p2 }
 0x3a8   :  { %2854 = vmatpush3.bf16.msra.mxu0 %v3039_v37 }
 0x3a9   :  { %2855 = vmatprep.subr.bf16.mxu0 %v3040_v48  ;;  %p3111_p5 = pnand %p3110_p4, %p3104_p1 }
 0x3aa   :  { %2836 = vmatpush3.bf16.msra.mxu1 %v3031_v36 }
 0x3ab   :  { %2837 = vmatprep.subr.bf16.mxu1 %v3032_v39 }
 0x3ac   :  { %2856 = vmatpush3.bf16.msra.mxu0 %v3040_v48 }
 0x3ad   :  { %2857 = vmatprep.subr.bf16.mxu0 %v3041_v49 }
 0x3ae   :  { %2838 = vmatpush3.bf16.msra.mxu1 %v3032_v39 }
 0x3af   :  { %2839 = vmatprep.subr.bf16.mxu1 %v3033_v40 }
 0x3b0   :  { %2858 = vmatpush3.bf16.msra.mxu0 %v3041_v49 }
 0x3b1   :  { %2859 = vmatprep.subr.bf16.mxu0 %v3042_v51 }
 0x3b2   :  { %2840 = vmatpush3.bf16.msra.mxu1 %v3033_v40 }
 0x3b4   :  { %2860 = vmatpush3.bf16.msra.mxu0 %v3042_v51 }
 0x3b5   :  { %2842 = vmatmul.mubr.bf16.vlgmr.msra.gmra.mxu1 %v1695_v44 }
 0x455   :  { %v2705_v50 = vpop.f32.mrf.mxu1 }
 0x457   :  { %v2733_v53 = vpop.f32.mrf.mxu0  ;;  %v2706_v54 = vpop.f32.mrf.mxu1 }
 0x458   :  { %v2707_v56 = vadd.f32 %v2706_v54, %v2705_v50 }
 0x459   :  { %v2734_v55 = vpop.f32.mrf.mxu0  ;;  %v2708_v59 = vpop.f32.mrf.mxu1 }
 0x45a   :  { %v2735_v7 = vadd.f32 %v2734_v55, %v2733_v53 }
 0x45b   :  { %v2736_v58 = vpop.f32.mrf.mxu0  ;;  %v2709_v60 = vpop.f32.mrf.mxu1 }
 0x45c   :  { %v2710_v14 = vadd.f32 %v2709_v60, %v2708_v59  ;;  %v2103_v11 = vadd.f32 %v2735_v7, %v2707_v56 }
 0x45d   :  { %v2737_v62 = vpop.f32.mrf.mxu0  ;;  %v2711_v57 = vpop.f32.mrf.mxu1 }
 0x45e   :  { %v2738_v15 = vadd.f32 %v2737_v62, %v2736_v58 }
 0x45f   :  { %v2739_v63 = vpop.f32.mrf.mxu0  ;;  %v2712_v0 = vpop.f32.mrf.mxu1 }
 0x460   :  { %v2713_v4 = vadd.f32 %v2712_v0, %v2711_v57  ;;  %v2106_v23 = vadd.f32 %v2738_v15, %v2710_v14 }
 0x461   :  { %v2740_v1 = vpop.f32.mrf.mxu0  ;;  %v2714_v2 = vpop.f32.mrf.mxu1 }
 0x462   :  { %v2741_v5 = vadd.f32 %v2740_v1, %v2739_v63 }
 0x463   :  { %v2742_v3 = vpop.f32.mrf.mxu0  ;;  %v2715_v6 = vpop.f32.mrf.mxu1 }
 0x464   :  { %v2716_v8 = vadd.f32 %v2715_v6, %v2714_v2  ;;  %v2111_v13 = vadd.f32 %v2741_v5, %v2713_v4 }
 0x465   :  { %v2743_v52 = vpop.f32.mrf.mxu0 }
 0x466   :  { %v2744_v9 = vadd.f32 %v2743_v52, %v2742_v3 }
 0x468   :  { %v2114_v19 = vadd.f32 %v2744_v9, %v2716_v8 }
 0x475   :  { %v2843_v12 = vpop.f32.mrf.mxu1 }
 0x476   :  { %v2160_v16 = vadd.f32 %v2843_v12, %v2111_v13 }
 0x477   :  { %v2151_v17 = vpop.f32.mrf.mxu1 }
 0x478   :  { %v2152_v18 = vadd.f32 %v2151_v17, %v2103_v11  ;;  %v2168_v24 = vmax.f32 %v2160_v16, 0.0 }
 0x479   :  { %v2844_v20 = vpop.f32.mrf.mxu1 }
 0x47a   :  { %v2166_v21 = vmax.f32 %v2152_v18, 0.0  ;;  %v2163_v22 = vadd.f32 %v2844_v20, %v2114_v19  ;;  %v2180_v31 = vmul.f32 %v2523_v25, %v2168_v24 }
 0x47b   :  { %v2154_v10 = vpop.f32.mrf.mxu1 }
 0x47c   :  { %v2169_v26 = vmax.f32 %v2163_v22, 0.0  ;;  %v2155_v27 = vadd.f32 %v2154_v10, %v2106_v23  ;;  %v2178_v28 = vmul.f32 %v2523_v25, %v2166_v21  ;;  %v2192_v39 = vadd.f32 %v2525_v32, %v2180_v31 }
 0x47e   :  { %v2181_v29 = vmul.f32 %v2523_v25, %v2169_v26  ;;  %v2167_v30 = vmax.f32 %v2155_v27, 0.0  ;;  %v2190_v35 = vadd.f32 %v2525_v32, %v2178_v28 }
 0x480   :  { %v2179_v33 = vmul.f32 %v2523_v25, %v2167_v30  ;;  %v2193_v34 = vadd.f32 %v2525_v32, %v2181_v29 }
 0x482   :  { %v2191_v36 = vadd.f32 %v2525_v32, %v2179_v33  ;;  %v2195_v41 = vpack.c.bf16 %v2193_v34, %v2192_v39 }
 0x484   :  { %v2194_v40 = vpack.c.bf16 %v2191_v36, %v2190_v35 }
 0x486   :  { %2861 = vmatprep.mubr.bf16.mxu0 %v2194_v40 }
 0x487   :  { %2862 = vmatmul.mubr.bf16.vlgmr.msra.gmra.mxu0 %v2195_v41 }
 0x547   :  { %v2863_v42 = vpop.f32.mrf.mxu0 }
 0x548   :  { %v2310_v43 = vadd.f32 %v2863_v42, %v2526_v38 }
 0x549   :  { %v2301_v44 = vpop.f32.mrf.mxu0 }
 0x54a   :  { %2318 = vst [vmem:[#allocation9 + $0x10] sm:$0xff] %v2310_v43  ;;  %v2302_v45 = vadd.f32 %v2526_v38, %v2301_v44 }
 0x54b   :  { %v2864_v61 = vpop.f32.mrf.mxu0 }
 0x54c   :  { %2316 = vst [vmem:[#allocation9] sm:$0xff] %v2302_v45  ;;  %v2313_v46 = vadd.f32 %v2864_v61, %v2526_v38 }
 0x54d   :  { %v2304_v47 = vpop.f32.mrf.mxu0 }
 0x54e   :  { %2319 = vst [vmem:[#allocation9 + $0x18] sm:$0xff] %v2313_v46  ;;  %v2305_v37 = vadd.f32 %v2526_v38, %v2304_v47 }
 0x550   :  { %2317 = vst [vmem:[#allocation9 + $0x8] sm:$0xff] %v2305_v37 }
 0x551   :  { %3114 = shalt.err (!%p3111_p5)
}
 0x552   :  { %s3137_s6 = smov 128   ;;  %s3138_s14 = smov 8  }
 0x553   :  { %2331 = dma.vmem_to_hbm [thread:$0]  %s2326_s12, 512, %s3370_s7, [#allocation5], %s3137_s6, %s3137_s6, %s3138_s14  }
 0x554   :  { %3127 = dma.done.wait [#allocation5], 512  }
 0x555   :  { %3128 = vsyncadd [#allocation5], 4294966784 }
 0x556   :  { %2335 = vsyncpa [#allocation4], 1 }
 0x557   :  { %2336 = vsyncpa [#allocation7], 1 }
 0x558   :  { %2337 = vsyncpa [#allocation5], 1 }

</bundles_post_ra>
